<compile_context>
chip_gen: v6e
topology: v6e:2x2x1
jax: 0.10.0
libtpu: 0.0.40
codegen_flags: <defaults>
</compile_context>

<pallas_src>
import functools

import numpy as np
import jax
import jax.numpy as jnp
from jax.experimental import pallas as pl
from jax.experimental.pallas import tpu as pltpu


# ---------------------------------------------------------------------------
# Glue: NeRF sinusoidal positional encoding (pure-JAX, used by the reference).
# ---------------------------------------------------------------------------
def positional_encoding(positions, freqs):
    freq_bands = 2.0 ** jnp.arange(freqs, dtype=positions.dtype)          # [freqs]
    pts = (positions[..., None] * freq_bands).reshape(
        positions.shape[:-1] + (freqs * positions.shape[-1],))
    return jnp.concatenate([jnp.sin(pts), jnp.cos(pts)], axis=-1)


# ---------------------------------------------------------------------------
# Pallas kernel: fused PE + 3-layer MLP, lane-dense epilogue.
#   pe     = x @ E2            (f32, HIGHEST; cos offset rides on the const-1 col)
#   lhs    = [x | sin(pe)]     (bf16)
#   h1     = relu(lhs @ W1 + b1)           (bf16 MXU, f32 acc)
#   h2     = relu(h1  @ W2 + b2)
#   logits = h2 @ W3                        -> packed [tm/16, 128]
#   out    = sigmoid(packed + b3_tiled)
# ---------------------------------------------------------------------------
def _mlp_fea_kernel(x_ref, e2_ref, w1_ref, b1_ref, w2_ref, b2_ref, w3_ref,
                    b3_ref, o_ref):
    x = x_ref[...]                                          # [tm, xw] f32
    # Phase slab. HIGHEST keeps the f32 phases exact on the MXU (inputs are
    # scaled by up to 2^(feape-1)); the +pi/2 offset for the cos half is baked
    # into E2's constant-1 row, so ONE sin covers both sin and cos.
    pe = jnp.dot(x, e2_ref[...], preferred_element_type=jnp.float32,
                 precision=jax.lax.Precision.HIGHEST)       # [tm, 2*npe]
    s = jnp.sin(pe).astype(jnp.bfloat16)

    # Layer 1: single stacked matmul over [x | sin-slab] (no 3-way add chain).
    lhs = jnp.concatenate([x.astype(jnp.bfloat16), s], axis=-1)   # [tm, xw+2*npe]
    h = jnp.dot(lhs, w1_ref[...], preferred_element_type=jnp.float32) + b1_ref[...]
    h = jnp.maximum(h, 0.0)

    h = jnp.dot(h.astype(jnp.bfloat16), w2_ref[...],
                preferred_element_type=jnp.float32) + b2_ref[...]
    h = jnp.maximum(h, 0.0)

    logits = jnp.dot(h.astype(jnp.bfloat16), w3_ref[...],
                     preferred_element_type=jnp.float32)          # [tm, 8]

    # Lane-dense epilogue: pack 16 contiguous row chunks side by side so the
    # bias add, sigmoid (EUP) and the store all run on full 128-lane vregs.
    g = o_ref.shape[0]                                            # tm // 16
    packed = jnp.concatenate(
        [logits[j * g:(j + 1) * g, :] for j in range(16)], axis=-1)   # [g, 128]
    o_ref[...] = jax.nn.sigmoid(packed + b3_ref[...]).astype(o_ref.dtype)


def _mlp_fea_pallas(x, e2, w1, b1, w2, b2, w3, b3t, *, tm):
    n_pad, xw = x.shape
    pe_w = e2.shape[1]
    k1 = w1.shape[0]
    feat_c = w2.shape[0]
    ow = w3.shape[1]
    g = tm // 16
    grid = (n_pad // tm,)

    rep = lambda i: (0, 0)   # weights / biases: same full block every step

    cost = pl.CostEstimate(
        flops=int(2 * n_pad * (xw * pe_w + k1 * feat_c
                               + feat_c * feat_c + feat_c * ow)),
        transcendentals=int(n_pad * (pe_w + ow)),
        bytes_accessed=int(x.size * 4 + (n_pad // 16) * 128 * 4
                           + (w1.size + w2.size + w3.size) * 2
                           + (e2.size + b1.size + b2.size + b3t.size) * 4),
    )

    return pl.pallas_call(
        _mlp_fea_kernel,
        out_shape=jax.ShapeDtypeStruct((n_pad // 16, 128), jnp.float32),
        grid_spec=pltpu.PrefetchScalarGridSpec(
            num_scalar_prefetch=0,
            grid=grid,
            in_specs=[
                pl.BlockSpec((tm, xw), lambda i: (i, 0)),   # compact activations
                pl.BlockSpec((xw, pe_w), rep),              # E2 (phase map, f32)
                pl.BlockSpec((k1, feat_c), rep),            # stacked W1 (bf16)
                pl.BlockSpec((1, feat_c), rep),             # b1 (f32)
                pl.BlockSpec((feat_c, feat_c), rep),        # W2 (bf16)
                pl.BlockSpec((1, feat_c), rep),             # b2 (f32)
                pl.BlockSpec((feat_c, ow), rep),            # W3 (padded to 8 cols)
                pl.BlockSpec((1, 128), rep),                # b3 tiled to 128 lanes
            ],
            out_specs=pl.BlockSpec((g, 128), lambda i: (i, 0)),
        ),
        compiler_params=pltpu.CompilerParams(
            dimension_semantics=("parallel",),
            vmem_limit_bytes=48 * 1024 * 1024),
        cost_estimate=cost,
    )(x, e2, w1, b1, w2, b2, w3, b3t)


# ---------------------------------------------------------------------------
# Module wrapper
# ---------------------------------------------------------------------------
class MLPFeaPallas:
    # Max rows per grid step (multiple of 128). 4096 amortizes the ~0.35 us/step
    # grid overhead and, with vmem_limit_bytes=48 MiB, fits v5e/v6e/v7x.
    TM_MAX = 4096

    def __init__(self, in_chanel, viewpe=6, feape=6, featureC=128, key=None):
        self.in_chanel = in_chanel
        self.viewpe = viewpe
        self.feape = feape
        self.featureC = featureC
        self.in_mlpC = 2 * viewpe * 3 + 2 * feape * in_chanel + 3 + in_chanel

        if key is None:
            key = jax.random.PRNGKey(0)
        k1, k2, k3, k4, k5 = jax.random.split(key, 5)

        def uinit(k, shape, fan_in):
            bound = 1.0 / jnp.sqrt(fan_in)
            return jax.random.uniform(k, shape, jnp.float32, -bound, bound)

        # Canonical weights stored as (in, out) so the math is x @ W + b.
        self.w1 = uinit(k1, (self.in_mlpC, featureC), self.in_mlpC)
        self.b1 = uinit(k2, (1, featureC), self.in_mlpC)
        self.w2 = uinit(k3, (featureC, featureC), featureC)
        self.b2 = uinit(k4, (1, featureC), featureC)
        self.w3 = uinit(k5, (featureC, 3), featureC)
        self.b3 = jnp.zeros((1, 3), jnp.float32)   # matches constant_(bias, 0)

        self._build_kernel_params()

    # -- one-time weight repack for the kernel (split / stack / pad / bf16) -----
    def _build_kernel_params(self):
        C = self.featureC
        ic, fp, vp = self.in_chanel, self.feape, self.viewpe
        n_fpe = fp * ic
        n_vpe = vp * 3
        npe = max(n_fpe + n_vpe, 8)          # phase cols per half (pads harmless)
        pe_w = 2 * npe                       # sin half ++ cos half
        xw = ((ic + 3 + 1 + 7) // 8) * 8     # feat + view + const-1 col, round to 8
        one_col = ic + 3                     # the constant-1 input column

        # E2: [xw, 2*npe]. Columns [0,npe) are the sin phases (channel-major,
        # matching positional_encoding's reshape order); columns [npe,2npe) are
        # the same phases + pi/2 (supplied through the const-1 row) -> cos.
        e2 = np.zeros((xw, pe_w), np.float32)
        for ch in range(ic):
            for f in range(fp):
                e2[ch, ch * fp + f] = 2.0 ** f
        for ch in range(3):
            for f in range(vp):
                e2[ic + ch, n_fpe + ch * vp + f] = 2.0 ** f
        e2[:, npe:] = e2[:, :npe]
        e2[one_col, npe:] = np.pi / 2.0

        # Stacked layer-1 weight for lhs = [x | sin(pe)]  (K = xw + pe_w).
        # canonical w1 row order: [feat, view, sin_fpe, cos_fpe, sin_vpe, cos_vpe]
        w1 = np.asarray(self.w1, np.float32)
        o = ic + 3
        w1f = np.zeros((xw + pe_w, C), np.float32)
        w1f[:o] = w1[:o]                                             # direct rows
        w1f[xw:xw + n_fpe] = w1[o:o + n_fpe]                         # sin(feat)
        w1f[xw + n_fpe:xw + n_fpe + n_vpe] = \
            w1[o + 2 * n_fpe:o + 2 * n_fpe + n_vpe]                  # sin(view)
        w1f[xw + npe:xw + npe + n_fpe] = w1[o + n_fpe:o + 2 * n_fpe] # cos(feat)
        w1f[xw + npe + n_fpe:xw + npe + n_fpe + n_vpe] = \
            w1[o + 2 * n_fpe + n_vpe:o + 2 * n_fpe + 2 * n_vpe]      # cos(view)

        ow = 8                                # narrow logical output width
        w3p = np.zeros((C, ow), np.float32)
        w3p[:, :3] = np.asarray(self.w3, np.float32)
        b3p = np.zeros((1, ow), np.float32)
        b3p[:, :3] = np.asarray(self.b3, np.float32)
        b3t = np.tile(b3p, (1, 128 // ow))    # [1, 128] for lane-packed epilogue

        self.xw, self.pe_w, self.ow = xw, pe_w, ow
        self.k_e2 = jnp.asarray(e2)                            # f32
        self.k_w1 = jnp.asarray(w1f, jnp.bfloat16)
        self.k_w2 = self.w2.astype(jnp.bfloat16)
        self.k_w3 = jnp.asarray(w3p, jnp.bfloat16)
        self.k_b3 = jnp.asarray(b3t)                           # f32

    # -- pure-JAX reference (for correctness checking) --------------------------
    def _build_mlp_in(self, viewdirs, features):
        indata = [features, viewdirs]
        if self.feape > 0:
            indata.append(positional_encoding(features, self.feape))
        if self.viewpe > 0:
            indata.append(positional_encoding(viewdirs, self.viewpe))
        return jnp.concatenate(indata, axis=-1)                # [N, in_mlpC]

    def forward_reference(self, pts, viewdirs, features):
        x = self._build_mlp_in(viewdirs, features)
        h = jnp.maximum(x @ self.w1 + self.b1, 0.0)
        h = jnp.maximum(h @ self.w2 + self.b2, 0.0)
        return jax.nn.sigmoid(h @ self.w3 + self.b3)

    # -- Pallas forward ----------------------------------------------------------
    @functools.partial(jax.jit, static_argnums=0)
    def __call__(self, pts, viewdirs, features):
        # `pts` is unused by MLP_Fea.forward, kept for interface parity.
        n = features.shape[0]
        ic = self.in_chanel

        # Compact [N, xw] f32 input: [features | viewdirs | 1 | zero-pad].
        ones = jnp.ones((n, 1), jnp.float32)
        x = jnp.concatenate(
            [features.astype(jnp.float32), viewdirs.astype(jnp.float32), ones],
            axis=-1)

        # Row tile: multiple of 128 (keeps the lane-packed epilogue aligned),
        # capped at TM_MAX, and >= 2 grid steps whenever n > 128 so both v7x
        # TensorCores get work under dimension_semantics=("parallel",).
        if n <= 128:
            tm = 128
        else:
            steps = max(2, -(-n // self.TM_MAX))
            tm = min(self.TM_MAX, ((-(-n // steps) + 127) // 128) * 128)
        n_pad = ((n + tm - 1) // tm) * tm

        x = jnp.pad(x, ((0, n_pad - n), (0, self.xw - (ic + 4))))

        out = _mlp_fea_pallas(x, self.k_e2, self.k_w1, self.b1, self.k_w2,
                              self.b2, self.k_w3, self.k_b3, tm=tm)

        # Undo the kernel's 16-way lane packing: [n_pad//16, 128] -> [n_pad, 8].
        nb, g = n_pad // tm, tm // 16
        res = out.reshape(nb, g, 16, self.ow).transpose(0, 2, 1, 3)
        res = res.reshape(n_pad, self.ow)
        return res[:n, :3]


# ---------------------------------------------------------------------------
# Demo / smoke test
# ---------------------------------------------------------------------------
if __name__ == "__main__":
    key = jax.random.PRNGKey(0)
    k_pts, k_view, k_feat, k_params = jax.random.split(key, 4)

    n_points = 200           # deliberately not a multiple of the tile size
    in_chanel = 4

    pts = jax.random.normal(k_pts, (n_points, 3), jnp.float32)
    viewdirs = jax.random.normal(k_view, (n_points, 3), jnp.float32)
    viewdirs = viewdirs / jnp.linalg.norm(viewdirs, axis=-1, keepdims=True)
    features = jax.random.normal(k_feat, (n_points, in_chanel), jnp.float32)

    model = MLPFeaPallas(in_chanel, viewpe=6, feape=6, featureC=128, key=k_params)

    rgb = model(pts, viewdirs, features)
    rgb = jax.block_until_ready(rgb)

    rgb_ref = jax.block_until_ready(model.forward_reference(pts, viewdirs, features))

    assert rgb.shape == (n_points, 3), rgb.shape
    assert jnp.all(jnp.isfinite(rgb))
    assert jnp.allclose(rgb, rgb_ref, atol=2e-2, rtol=2e-2), (
        float(jnp.max(jnp.abs(rgb - rgb_ref))))

    print("KERNEL_OK")
</pallas_src>

<mosaic_0001>
module attributes {stable_mosaic.version = 11 : i64} {
  func.func @_mlp_fea_kernel(%arg0: i32, %arg1: memref<128x8xf32, #tpu.memory_space<vmem>>, %arg2: memref<8x84xf32, #tpu.memory_space<vmem>>, %arg3: memref<92x128xbf16, #tpu.memory_space<vmem>>, %arg4: memref<1x128xf32, #tpu.memory_space<vmem>>, %arg5: memref<128x128xbf16, #tpu.memory_space<vmem>>, %arg6: memref<1x128xf32, #tpu.memory_space<vmem>>, %arg7: memref<128x8xbf16, #tpu.memory_space<vmem>>, %arg8: memref<1x128xf32, #tpu.memory_space<vmem>>, %arg9: memref<8x128xf32, #tpu.memory_space<vmem>>) attributes {dimension_semantics = [#tpu.dimension_semantics<parallel>], iteration_bounds = array<i64: 2>, scalar_prefetch = 0 : i64, scratch_operands = 0 : i64, tpu.core_type = #tpu.core_type<tc>, window_params = [{transform_indices = @transform_0, window_bounds = array<i64: 128, 8>}, {pipeline_mode = #tpu.pipeline_mode<synchronous>, transform_indices = @transform_1, window_bounds = array<i64: 8, 84>}, {pipeline_mode = #tpu.pipeline_mode<synchronous>, transform_indices = @transform_2, window_bounds = array<i64: 92, 128>}, {pipeline_mode = #tpu.pipeline_mode<synchronous>, transform_indices = @transform_3, window_bounds = array<i64: 1, 128>}, {pipeline_mode = #tpu.pipeline_mode<synchronous>, transform_indices = @transform_4, window_bounds = array<i64: 128, 128>}, {pipeline_mode = #tpu.pipeline_mode<synchronous>, transform_indices = @transform_5, window_bounds = array<i64: 1, 128>}, {pipeline_mode = #tpu.pipeline_mode<synchronous>, transform_indices = @transform_6, window_bounds = array<i64: 128, 8>}, {pipeline_mode = #tpu.pipeline_mode<synchronous>, transform_indices = @transform_7, window_bounds = array<i64: 1, 128>}, {transform_indices = @transform_8, window_bounds = array<i64: 8, 128>}]} {
    %c0 = arith.constant 0 : index
    %c0_0 = arith.constant 0 : index
    %0 = vector.load %arg1[%c0, %c0_0] : memref<128x8xf32, #tpu.memory_space<vmem>>, vector<128x8xf32>
    %c0_1 = arith.constant 0 : index
    %c0_2 = arith.constant 0 : index
    %1 = vector.load %arg2[%c0_1, %c0_2] : memref<8x84xf32, #tpu.memory_space<vmem>>, vector<8x84xf32>
    %cst = arith.constant dense<0.000000e+00> : vector<128x84xf32>
    %2 = tpu.matmul %0, %1, %cst {dimension_numbers = #tpu.dot_dimension_numbers<[1], [0], [0], [1], [0, 0, 1, 1], [], []>, precision = #tpu.contract_precision<fp32>} : vector<128x8xf32>, vector<8x84xf32>, vector<128x84xf32> -> vector<128x84xf32>
    %3 = math.sin %2 : vector<128x84xf32>
    %4 = arith.truncf %3 : vector<128x84xf32> to vector<128x84xbf16>
    %5 = arith.truncf %0 : vector<128x8xf32> to vector<128x8xbf16>
    %6 = tpu.concatenate %5, %4 in 1 : vector<128x8xbf16>, vector<128x84xbf16> -> vector<128x92xbf16>
    %c0_3 = arith.constant 0 : index
    %c0_4 = arith.constant 0 : index
    %7 = vector.load %arg3[%c0_3, %c0_4] : memref<92x128xbf16, #tpu.memory_space<vmem>>, vector<92x128xbf16>
    %cst_5 = arith.constant dense<0.000000e+00> : vector<128x128xf32>
    %8 = tpu.matmul %6, %7, %cst_5 {dimension_numbers = #tpu.dot_dimension_numbers<[1], [0], [0], [1], [0, 0, 1, 1], [], []>} : vector<128x92xbf16>, vector<92x128xbf16>, vector<128x128xf32> -> vector<128x128xf32>
    %c0_6 = arith.constant 0 : index
    %c0_7 = arith.constant 0 : index
    %9 = vector.load %arg4[%c0_6, %c0_7] : memref<1x128xf32, #tpu.memory_space<vmem>>, vector<1x128xf32>
    %10 = vector.broadcast %9 : vector<1x128xf32> to vector<128x128xf32>
    %11 = arith.addf %8, %10 : vector<128x128xf32>
    %cst_8 = arith.constant 0.000000e+00 : f32
    %12 = vector.broadcast %cst_8 : f32 to vector<128x128xf32>
    %13 = arith.maximumf %11, %12 : vector<128x128xf32>
    %14 = arith.truncf %13 : vector<128x128xf32> to vector<128x128xbf16>
    %c0_9 = arith.constant 0 : index
    %c0_10 = arith.constant 0 : index
    %15 = vector.load %arg5[%c0_9, %c0_10] : memref<128x128xbf16, #tpu.memory_space<vmem>>, vector<128x128xbf16>
    %cst_11 = arith.constant dense<0.000000e+00> : vector<128x128xf32>
    %16 = tpu.matmul %14, %15, %cst_11 {dimension_numbers = #tpu.dot_dimension_numbers<[1], [0], [0], [1], [0, 0, 1, 1], [], []>} : vector<128x128xbf16>, vector<128x128xbf16>, vector<128x128xf32> -> vector<128x128xf32>
    %c0_12 = arith.constant 0 : index
    %c0_13 = arith.constant 0 : index
    %17 = vector.load %arg6[%c0_12, %c0_13] : memref<1x128xf32, #tpu.memory_space<vmem>>, vector<1x128xf32>
    %18 = vector.broadcast %17 : vector<1x128xf32> to vector<128x128xf32>
    %19 = arith.addf %16, %18 : vector<128x128xf32>
    %cst_14 = arith.constant 0.000000e+00 : f32
    %20 = vector.broadcast %cst_14 : f32 to vector<128x128xf32>
    %21 = arith.maximumf %19, %20 : vector<128x128xf32>
    %22 = arith.truncf %21 : vector<128x128xf32> to vector<128x128xbf16>
    %c0_15 = arith.constant 0 : index
    %c0_16 = arith.constant 0 : index
    %23 = vector.load %arg7[%c0_15, %c0_16] : memref<128x8xbf16, #tpu.memory_space<vmem>>, vector<128x8xbf16>
    %cst_17 = arith.constant dense<0.000000e+00> : vector<128x8xf32>
    %24 = tpu.matmul %22, %23, %cst_17 {dimension_numbers = #tpu.dot_dimension_numbers<[1], [0], [0], [1], [0, 0, 1, 1], [], []>} : vector<128x128xbf16>, vector<128x8xbf16>, vector<128x8xf32> -> vector<128x8xf32>
    %25 = vector.extract_strided_slice %24 {offsets = [0, 0], sizes = [8, 8], strides = [1, 1]} : vector<128x8xf32> to vector<8x8xf32>
    %26 = vector.extract_strided_slice %24 {offsets = [8, 0], sizes = [8, 8], strides = [1, 1]} : vector<128x8xf32> to vector<8x8xf32>
    %27 = vector.extract_strided_slice %24 {offsets = [16, 0], sizes = [8, 8], strides = [1, 1]} : vector<128x8xf32> to vector<8x8xf32>
    %28 = vector.extract_strided_slice %24 {offsets = [24, 0], sizes = [8, 8], strides = [1, 1]} : vector<128x8xf32> to vector<8x8xf32>
    %29 = vector.extract_strided_slice %24 {offsets = [32, 0], sizes = [8, 8], strides = [1, 1]} : vector<128x8xf32> to vector<8x8xf32>
    %30 = vector.extract_strided_slice %24 {offsets = [40, 0], sizes = [8, 8], strides = [1, 1]} : vector<128x8xf32> to vector<8x8xf32>
    %31 = vector.extract_strided_slice %24 {offsets = [48, 0], sizes = [8, 8], strides = [1, 1]} : vector<128x8xf32> to vector<8x8xf32>
    %32 = vector.extract_strided_slice %24 {offsets = [56, 0], sizes = [8, 8], strides = [1, 1]} : vector<128x8xf32> to vector<8x8xf32>
    %33 = vector.extract_strided_slice %24 {offsets = [64, 0], sizes = [8, 8], strides = [1, 1]} : vector<128x8xf32> to vector<8x8xf32>
    %34 = vector.extract_strided_slice %24 {offsets = [72, 0], sizes = [8, 8], strides = [1, 1]} : vector<128x8xf32> to vector<8x8xf32>
    %35 = vector.extract_strided_slice %24 {offsets = [80, 0], sizes = [8, 8], strides = [1, 1]} : vector<128x8xf32> to vector<8x8xf32>
    %36 = vector.extract_strided_slice %24 {offsets = [88, 0], sizes = [8, 8], strides = [1, 1]} : vector<128x8xf32> to vector<8x8xf32>
    %37 = vector.extract_strided_slice %24 {offsets = [96, 0], sizes = [8, 8], strides = [1, 1]} : vector<128x8xf32> to vector<8x8xf32>
    %38 = vector.extract_strided_slice %24 {offsets = [104, 0], sizes = [8, 8], strides = [1, 1]} : vector<128x8xf32> to vector<8x8xf32>
    %39 = vector.extract_strided_slice %24 {offsets = [112, 0], sizes = [8, 8], strides = [1, 1]} : vector<128x8xf32> to vector<8x8xf32>
    %40 = vector.extract_strided_slice %24 {offsets = [120, 0], sizes = [8, 8], strides = [1, 1]} : vector<128x8xf32> to vector<8x8xf32>
    %41 = tpu.concatenate %25, %26, %27, %28, %29, %30, %31, %32, %33, %34, %35, %36, %37, %38, %39, %40 in 1 : vector<8x8xf32>, vector<8x8xf32>, vector<8x8xf32>, vector<8x8xf32>, vector<8x8xf32>, vector<8x8xf32>, vector<8x8xf32>, vector<8x8xf32>, vector<8x8xf32>, vector<8x8xf32>, vector<8x8xf32>, vector<8x8xf32>, vector<8x8xf32>, vector<8x8xf32>, vector<8x8xf32>, vector<8x8xf32> -> vector<8x128xf32>
    %c0_18 = arith.constant 0 : index
    %c0_19 = arith.constant 0 : index
    %42 = vector.load %arg8[%c0_18, %c0_19] : memref<1x128xf32, #tpu.memory_space<vmem>>, vector<1x128xf32>
    %43 = vector.broadcast %42 : vector<1x128xf32> to vector<8x128xf32>
    %44 = arith.addf %41, %43 : vector<8x128xf32>
    %45 = arith.negf %44 : vector<8x128xf32>
    %46 = math.exp %45 : vector<8x128xf32>
    %cst_20 = arith.constant 1.000000e+00 : f32
    %47 = vector.broadcast %cst_20 : f32 to vector<8x128xf32>
    %48 = arith.addf %47, %46 : vector<8x128xf32>
    %49 = arith.divf %47, %48 : vector<8x128xf32>
    %c0_21 = arith.constant 0 : index
    %c0_22 = arith.constant 0 : index
    %50 = vector.load %arg9[%c0_21, %c0_22] : memref<8x128xf32, #tpu.memory_space<vmem>>, vector<8x128xf32>
    tpu.vector_store %arg9[%c0_21, %c0_22], %49 {strides = array<i32>} : memref<8x128xf32, #tpu.memory_space<vmem>>, vector<8x128xf32>,
    return
  }
  func.func @transform_0(%arg0: i32) -> (i32, i32) {
    %c0_i32 = arith.constant 0 : i32
    %c0_i32_0 = arith.constant 0 : i32
    return %arg0, %c0_i32 : i32, i32
  }
  func.func @transform_1(%arg0: i32) -> (i32, i32) {
    %c0_i32 = arith.constant 0 : i32
    %c0_i32_0 = arith.constant 0 : i32
    %c0_i32_1 = arith.constant 0 : i32
    return %c0_i32, %c0_i32_0 : i32, i32
  }
  func.func @transform_2(%arg0: i32) -> (i32, i32) {
    %c0_i32 = arith.constant 0 : i32
    %c0_i32_0 = arith.constant 0 : i32
    %c0_i32_1 = arith.constant 0 : i32
    return %c0_i32, %c0_i32_0 : i32, i32
  }
  func.func @transform_3(%arg0: i32) -> (i32, i32) {
    %c0_i32 = arith.constant 0 : i32
    %c0_i32_0 = arith.constant 0 : i32
    %c0_i32_1 = arith.constant 0 : i32
    return %c0_i32, %c0_i32_0 : i32, i32
  }
  func.func @transform_4(%arg0: i32) -> (i32, i32) {
    %c0_i32 = arith.constant 0 : i32
    %c0_i32_0 = arith.constant 0 : i32
    %c0_i32_1 = arith.constant 0 : i32
    return %c0_i32, %c0_i32_0 : i32, i32
  }
  func.func @transform_5(%arg0: i32) -> (i32, i32) {
    %c0_i32 = arith.constant 0 : i32
    %c0_i32_0 = arith.constant 0 : i32
    %c0_i32_1 = arith.constant 0 : i32
    return %c0_i32, %c0_i32_0 : i32, i32
  }
  func.func @transform_6(%arg0: i32) -> (i32, i32) {
    %c0_i32 = arith.constant 0 : i32
    %c0_i32_0 = arith.constant 0 : i32
    %c0_i32_1 = arith.constant 0 : i32
    return %c0_i32, %c0_i32_0 : i32, i32
  }
  func.func @transform_7(%arg0: i32) -> (i32, i32) {
    %c0_i32 = arith.constant 0 : i32
    %c0_i32_0 = arith.constant 0 : i32
    %c0_i32_1 = arith.constant 0 : i32
    return %c0_i32, %c0_i32_0 : i32, i32
  }
  func.func @transform_8(%arg0: i32) -> (i32, i32) {
    %c0_i32 = arith.constant 0 : i32
    %c0_i32_0 = arith.constant 0 : i32
    return %arg0, %c0_i32 : i32, i32
  }
}

</mosaic_0001>

<bundles_post_ra>
// kernel: a_call__.1
= control target key start
LH: loop header
LB: loop body
LE: loop exit
PB: predicated region body
PF: predicated region fallthrough
CT: control target
= control target key end

     0   :  { %s4678_s27 = smov 0   ;;  %s6746_s0 = inlined_call_operand.vmem [shape: f32[256,8], index: 0, kind: input, shape index: {}]   ;;  %s6747_s1 = inlined_call_operand.vmem [shape: f32[8,84], index: 1, kind: input, shape index: {}]   ;;  %s6748_s2 = inlined_call_operand.vmem [shape: bf16[92,128], index: 2, kind: input, shape index: {}]   ;;  %s6749_s3 = inlined_call_operand.vmem [shape: f32[1,128], index: 3, kind: input, shape index: {}]   ;;  %s6750_s4 = inlined_call_operand.vmem [shape: bf16[128,128], index: 4, kind: input, shape index: {}]   ;;  %s6751_s5 = inlined_call_operand.vmem [shape: f32[1,128], index: 5, kind: input, shape index: {}]   ;;  %s6752_s6 = inlined_call_operand.vmem [shape: bf16[128,8], index: 6, kind: input, shape index: {}]   ;;  %s6753_s7 = inlined_call_operand.vmem [shape: f32[1,128], index: 7, kind: input, shape index: {}]   ;;  %s6754_s8 = inlined_call_operand.vmem [shape: f32[16,128], index: 8, kind: output, shape index: {}]  }
   0x1 LB: > { %s4684_s28 = sadd.s32 4294967295, %s4610_s27   ;;  %p3902_p0 = scmp.ge.s32.totalorder %s4610_s27, 1  ;;  %s4610_s27 = sphi %s4678_s27, %s18_s27  }
   0x2   : > { %p263_p1 = scmp.lt.s32.totalorder %s4610_s27, 3 }
   0x4   : > { %p264_p2 = pnand %p3902_p0, %p263_p1 }
   0x6   : > { %267 = sbr.rel (%p264_p2) target bundleno = 1615 (0x64f), region = 52 }
   0xb   : > { %v323_v0 = vld [vmem:[%s6747_s1] sm:$0xff]  ;;  %s3903_s9 = sshll.u32 %s4684_s28, 4  ;;  %vm6806_vm0 = vcmask 64512   ;;  %s4618_s14 = smov 8  }
   0xc   : > { %v4692_v1 = vand.u32 4294901760, %v323_v0  ;;  %p297_p3 = scmp.lt.s32.totalorder %s3903_s9, 31  ;;  %s4619_s25 = smov 16  }
   0xd   : > { %s4620_s26 = smov 24   ;;  %s4621_s29 = smov 48  }
   0xe   : > { %4402 = vmatprep.subr.mxu1 %v4692_v1  ;;  %s7017_s9 = smov (!%p297_p3, %s3903_s9), 31  ;;  %v4696_v2 = vsub.f32 %v323_v0, %v4692_v1  ;;  %4154 = vmatprep.subr.mxu0 %v4692_v1  ;;  %s4622_s30 = smov 32  }
   0xf   : > { %4403 = vmatpush3.msra.mxu1 %v4692_v1  ;;  %4155 = vmatpush3.msra.mxu0 %v4692_v1  ;;  %s3904_s10 = sshll.u32 %s7017_s9, 3  ;;  %s4623_s9 = smov 56  }
  0x10   : > { %v4702_v3 = vand.u32 4294901760, %v4696_v2  ;;  %4206 = vmatprep.subr.mxu0 %v4696_v2  ;;  %s4708_s13 = scalar_lea.vmem %s6746_s0, %s3904_s10  ;;  %s4624_s10 = smov 40  }
  0x11   : > { %v315_v4 = vld [vmem:[%s4708_s13 + $0x40] sm:$0xff]  ;;  %v316_v6 = vld [vmem:[%s4708_s13 + $0x48] sm:$0xff]  ;;  %v317_v12 = vld [vmem:[%s4708_s13 + $0x50] sm:$0xff]  ;;  %s4625_s11 = smov 80   ;;  %s4626_s12 = smov 64  }
  0x12   : > { %v633_v5 = vsub.f32 %v4696_v2, %v4702_v3  ;;  %v307_v7 = vld [vmem:[%s4708_s13] sm:$0xff]  ;;  %v350_v8 = vsel %vm6806_vm0, %v315_v4, 0  ;;  %v353_v9 = vsel %vm6806_vm0, %v316_v6, 0  ;;  %v308_v11 = vld [vmem:[%s4708_s13 + $0x8] sm:$0xff]  ;;  %v318_v13 = vld [vmem:[%s4708_s13 + $0x58] sm:$0xff]  ;;  %v356_v21 = vsel %vm6806_vm0, %v317_v12, 0 }
  0x13   : > { %v326_v10 = vsel %vm6806_vm0, %v307_v7, 0  ;;  %v4721_v14 = vand.u32 4294901760, %v350_v8  ;;  %v4723_v16 = vand.u32 4294901760, %v353_v9  ;;  %v309_v18 = vld [vmem:[%s4708_s13 + $0x10] sm:$0xff]  ;;  %v310_v19 = vld [vmem:[%s4708_s13 + $0x18] sm:$0xff]  ;;  %v329_v20 = vsel %vm6806_vm0, %v308_v11, 0 }
  0x14   : > { %v634_v15 = vand.u32 4294901760, %v633_v5  ;;  %v4725_v17 = vand.u32 4294901760, %v326_v10  ;;  %v359_v22 = vsel %vm6806_vm0, %v318_v13, 0  ;;  %v332_v23 = vsel %vm6806_vm0, %v309_v18, 0  ;;  %v319_v40 = vld [vmem:[%s4708_s13 + $0x60] sm:$0xff]  ;;  %v320_v41 = vld [vmem:[%s4708_s13 + $0x68] sm:$0xff] }
  0x15   : > { %v4734_v24 = vsub.f32 %v350_v8, %v4721_v14  ;;  %v4737_v25 = vsub.f32 %v353_v9, %v4723_v16  ;;  %v4742_v27 = vand.u32 4294901760, %v329_v20  ;;  %v4744_v28 = vand.u32 4294901760, %v356_v21  ;;  %v311_v46 = vld [vmem:[%s4708_s13 + $0x20] sm:$0xff]  ;;  %v312_v51 = vld [vmem:[%s4708_s13 + $0x28] sm:$0xff]  ;;  %v321_v56 = vld [vmem:[%s4708_s13 + $0x70] sm:$0xff]  ;;  %s4628_s15 = smov 72  }
  0x16   : > { %4180 = vmatprep.subr.mxu1 %v634_v15  ;;  %v4740_v26 = vsub.f32 %v326_v10, %v4725_v17  ;;  %v4746_v29 = vand.u32 4294901760, %v359_v22  ;;  %v4748_v30 = vand.u32 4294901760, %v332_v23  ;;  %v335_v31 = vsel %vm6806_vm0, %v310_v19, 0  ;;  %v322_v61 = vld [vmem:[%s4708_s13 + $0x78] sm:$0xff]  ;;  %v313_v5 = vld [vmem:[%s4708_s13 + $0x30] sm:$0xff]  ;;  %s4629_s16 = smov 96  }
  0x17   : > { %v521_v32 = vand.u32 4294901760, %v4734_v24  ;;  %v531_v33 = vand.u32 4294901760, %v4737_v25  ;;  %v4755_v35 = vsub.f32 %v329_v20, %v4742_v27  ;;  %v4758_v36 = vsub.f32 %v356_v21, %v4744_v28  ;;  %v314_v10 = vld [vmem:[%s4708_s13 + $0x38] sm:$0xff]  ;;  %s4630_s17 = smov 112   ;;  %s4631_s18 = smov 104  }
  0x18   : > { %v441_v34 = vand.u32 4294901760, %v4740_v26  ;;  %v4761_v37 = vsub.f32 %v359_v22, %v4746_v29  ;;  %v4764_v38 = vsub.f32 %v332_v23, %v4748_v30  ;;  %v4766_v39 = vand.u32 4294901760, %v335_v31  ;;  %s4632_s19 = smov 120   ;;  %p302_p4 = scmp.lt.s32.totalorder %s4684_s28, 1 }
  0x19   : > { %v522_v42 = vsub.f32 %v4734_v24, %v521_v32  ;;  %v532_v43 = vsub.f32 %v4737_v25, %v531_v33  ;;  %v451_v45 = vand.u32 4294901760, %v4755_v35  ;;  %v541_v47 = vand.u32 4294901760, %v4758_v36 }
  0x1a   : > { %v442_v44 = vsub.f32 %v4740_v26, %v441_v34  ;;  %v551_v48 = vand.u32 4294901760, %v4761_v37  ;;  %v461_v49 = vand.u32 4294901760, %v4764_v38  ;;  %v4785_v50 = vsub.f32 %v335_v31, %v4766_v39  ;;  %s7019_s28 = smov (!%p302_p4, %s4684_s28), 1 }
  0x1b   : > { %v523_v52 = vand.u32 4294901760, %v522_v42  ;;  %v533_v53 = vand.u32 4294901760, %v532_v43  ;;  %v452_v55 = vsub.f32 %v4755_v35, %v451_v45  ;;  %v542_v57 = vsub.f32 %v4758_v36, %v541_v47  ;;  %s3905_s22 = sshll.u32 %s7019_s28, 3 }
  0x1c   : > { %v443_v54 = vand.u32 4294901760, %v442_v44  ;;  %v552_v58 = vsub.f32 %v4761_v37, %v551_v48  ;;  %v462_v59 = vsub.f32 %v4764_v38, %v461_v49  ;;  %v471_v60 = vand.u32 4294901760, %v4785_v50  ;;  %s305_s24 = scalar_lea.vmem %s6754_s8, %s3905_s22 }
  0x1d   : > { %4168 = vmatprep.mubr.f32.mxu1 %v523_v52  ;;  %v453_v62 = vand.u32 4294901760, %v452_v55  ;;  %v362_v63 = vsel %vm6806_vm0, %v319_v40, 0  ;;  %v365_v0 = vsel %vm6806_vm0, %v320_v41, 0  ;;  %v338_v4 = vsel %vm6806_vm0, %v311_v46, 0 }
  0x1e   : > { %4156 = vmatprep.mubr.f32.mxu0 %v443_v54  ;;  %4169 = vmatmul.mubr.f32.vlgmr.msra.gmra.mxu1 %v533_v53  ;;  %v543_v6 = vand.u32 4294901760, %v542_v57  ;;  %v553_v7 = vand.u32 4294901760, %v552_v58  ;;  %v463_v8 = vand.u32 4294901760, %v462_v59  ;;  %v472_v9 = vsub.f32 %v4785_v50, %v471_v60 }
  0x1f   : > { %4181 = vmatpush3.msra.mxu1 %v634_v15  ;;  %4157 = vmatmul.mubr.f32.vlgmr.msra.gmra.mxu0 %v453_v62  ;;  %v4811_v11 = vand.u32 4294901760, %v362_v63  ;;  %v4813_v12 = vand.u32 4294901760, %v365_v0  ;;  %v4815_v13 = vand.u32 4294901760, %v338_v4  ;;  %v341_v18 = vsel %vm6806_vm0, %v312_v51, 0 }
  0x20   : > { %4171 = vmatprep.mubr.f32.mxu1 %v543_v6  ;;  %4159 = vmatprep.mubr.f32.mxu0 %v463_v8  ;;  %v473_v19 = vand.u32 4294901760, %v472_v9  ;;  %v4818_v20 = vand.u32 4294901760, %v341_v18  ;;  %v368_v21 = vsel %vm6806_vm0, %v321_v56, 0  ;;  %v371_v22 = vsel %vm6806_vm0, %v322_v61, 0 }
  0x21   : > { %v4823_v15 = vsub.f32 %v362_v63, %v4811_v11  ;;  %v4826_v23 = vsub.f32 %v365_v0, %v4813_v12  ;;  %v4829_v31 = vsub.f32 %v338_v4, %v4815_v13  ;;  %v4831_v40 = vand.u32 4294901760, %v368_v21  ;;  %4232 = vmatprep.subr.mxu1 %v4692_v1  ;;  %4207 = vmatpush3.msra.mxu0 %v4696_v2 }
  0x22   : > { %4172 = vmatmul.mubr.f32.gmra.mxu1 %v553_v7  ;;  %v4836_v41 = vsub.f32 %v341_v18, %v4818_v20  ;;  %v4838_v42 = vand.u32 4294901760, %v371_v22  ;;  %v344_v43 = vsel %vm6806_vm0, %v313_v5, 0  ;;  %v347_v44 = vsel %vm6806_vm0, %v314_v10, 0  ;;  %4258 = vmatprep.subr.mxu0 %v4702_v3 }
  0x23   : > { %4160 = vmatmul.mubr.f32.gmra.mxu0 %v473_v19  ;;  %v561_v46 = vand.u32 4294901760, %v4823_v15  ;;  %v571_v51 = vand.u32 4294901760, %v4826_v23  ;;  %v481_v52 = vand.u32 4294901760, %v4829_v31  ;;  %v4847_v2 = vsub.f32 %v368_v21, %v4831_v40 }
  0x24   : > { %v491_v53 = vand.u32 4294901760, %v4836_v41  ;;  %v4851_v54 = vsub.f32 %v371_v22, %v4838_v42  ;;  %v4853_v55 = vand.u32 4294901760, %v344_v43  ;;  %v4855_v56 = vand.u32 4294901760, %v347_v44 }
  0x25   : > { %v562_v57 = vsub.f32 %v4823_v15, %v561_v46  ;;  %v572_v58 = vsub.f32 %v4826_v23, %v571_v51  ;;  %v482_v59 = vsub.f32 %v4829_v31, %v481_v52  ;;  %v581_v61 = vand.u32 4294901760, %v4847_v2 }
  0x26   : > { %v492_v62 = vsub.f32 %v4836_v41, %v491_v53  ;;  %v591_v63 = vand.u32 4294901760, %v4851_v54  ;;  %v4872_v0 = vsub.f32 %v344_v43, %v4853_v55  ;;  %v4875_v4 = vsub.f32 %v347_v44, %v4855_v56 }
  0x27   : > { %v563_v5 = vand.u32 4294901760, %v562_v57  ;;  %v573_v6 = vand.u32 4294901760, %v572_v58  ;;  %v483_v7 = vand.u32 4294901760, %v482_v59  ;;  %v582_v8 = vsub.f32 %v4847_v2, %v581_v61 }
  0x28   : > { %v493_v9 = vand.u32 4294901760, %v492_v62  ;;  %v592_v10 = vsub.f32 %v4851_v54, %v591_v63  ;;  %v501_v18 = vand.u32 4294901760, %v4872_v0  ;;  %v511_v19 = vand.u32 4294901760, %v4875_v4 }
  0x29   : > { %4174 = vmatprep.mubr.f32.mxu1 %v563_v5  ;;  %4162 = vmatprep.mubr.f32.mxu0 %v483_v7  ;;  %v583_v21 = vand.u32 4294901760, %v582_v8 }
  0x2a   : > { %4175 = vmatmul.mubr.f32.gmra.mxu1 %v573_v6  ;;  %4163 = vmatmul.mubr.f32.gmra.mxu0 %v493_v9  ;;  %v593_v22 = vand.u32 4294901760, %v592_v10  ;;  %v502_v43 = vsub.f32 %v4872_v0, %v501_v18  ;;  %v512_v44 = vsub.f32 %v4875_v4, %v511_v19 }
  0x2b   : > { %4177 = vmatprep.mubr.f32.mxu1 %v583_v21 }
  0x2c   : > { %v503_v57 = vand.u32 4294901760, %v502_v43  ;;  %v513_v58 = vand.u32 4294901760, %v512_v44 }
  0x2e   : > { %4178 = vmatmul.mubr.f32.gmra.mxu1 %v593_v22  ;;  %4165 = vmatprep.mubr.f32.mxu0 %v503_v57 }
  0x2f   : > { %4166 = vmatmul.mubr.f32.gmra.mxu0 %v513_v58  ;;  %4182 = vmatprep.mubr.f32.mxu1 %v4725_v17 }
  0x30   : > { %4208 = vmatprep.mubr.f32.mxu0 %v4740_v26 }
  0x32   : > { %4183 = vmatmul.mubr.f32.vlgmr.msra.gmra.mxu1 %v4742_v27 }
  0x33   : > { %4233 = vmatpush3.msra.mxu1 %v4692_v1  ;;  %4209 = vmatmul.mubr.f32.vlgmr.msra.gmra.mxu0 %v4755_v35 }
  0x34   : > { %4185 = vmatprep.mubr.f32.mxu1 %v4748_v30  ;;  %4211 = vmatprep.mubr.f32.mxu0 %v4764_v38 }
  0x35   : > { %4259 = vmatpush3.msra.mxu0 %v4702_v3  ;;  %4284 = vmatprep.subr.mxu1 %v4692_v1 }
  0x36   : > { %4186 = vmatmul.mubr.f32.gmra.mxu1 %v4766_v39 }
  0x37   : > { %4212 = vmatmul.mubr.f32.gmra.mxu0 %v4785_v50  ;;  %4188 = vmatprep.mubr.f32.mxu1 %v4815_v13 }
  0x38   : > { %4214 = vmatprep.mubr.f32.mxu0 %v4829_v31 }
  0x3a   : > { %4189 = vmatmul.mubr.f32.gmra.mxu1 %v4818_v20 }
  0x3b   : > { %4215 = vmatmul.mubr.f32.gmra.mxu0 %v4836_v41  ;;  %4191 = vmatprep.mubr.f32.mxu1 %v4853_v55 }
  0x3c   : > { %4217 = vmatprep.mubr.f32.mxu0 %v4872_v0 }
  0x3e   : > { %4192 = vmatmul.mubr.f32.gmra.mxu1 %v4855_v56 }
  0x3f   : > { %4218 = vmatmul.mubr.f32.gmra.mxu0 %v4875_v4  ;;  %4194 = vmatprep.mubr.f32.mxu1 %v4721_v14 }
  0x40   : > { %4220 = vmatprep.mubr.f32.mxu0 %v4734_v24 }
  0x42   : > { %4195 = vmatmul.mubr.f32.gmra.mxu1 %v4723_v16 }
  0x43   : > { %4221 = vmatmul.mubr.f32.gmra.mxu0 %v4737_v25  ;;  %4197 = vmatprep.mubr.f32.mxu1 %v4744_v28 }
  0x44   : > { %4223 = vmatprep.mubr.f32.mxu0 %v4758_v36 }
  0x46   : > { %4198 = vmatmul.mubr.f32.gmra.mxu1 %v4746_v29 }
  0x47   : > { %4224 = vmatmul.mubr.f32.gmra.mxu0 %v4761_v37  ;;  %4200 = vmatprep.mubr.f32.mxu1 %v4811_v11 }
  0x48   : > { %4226 = vmatprep.mubr.f32.mxu0 %v4823_v15 }
  0x4a   : > { %4201 = vmatmul.mubr.f32.gmra.mxu1 %v4813_v12 }
  0x4b   : > { %4227 = vmatmul.mubr.f32.gmra.mxu0 %v4826_v23  ;;  %4203 = vmatprep.mubr.f32.mxu1 %v4831_v40 }
  0x4c   : > { %4229 = vmatprep.mubr.f32.mxu0 %v4847_v2 }
  0x4e   : > { %4204 = vmatmul.mubr.f32.gmra.mxu1 %v4838_v42 }
  0x4f   : > { %4230 = vmatmul.mubr.f32.gmra.mxu0 %v4851_v54  ;;  %4234 = vmatprep.mubr.f32.mxu1 %v441_v34 }
  0x50   : > { %4260 = vmatprep.mubr.f32.mxu0 %v4725_v17 }
  0x52   : > { %4235 = vmatmul.mubr.f32.vlgmr.msra.gmra.mxu1 %v451_v45 }
  0x53   : > { %4285 = vmatpush3.msra.mxu1 %v4692_v1  ;;  %4261 = vmatmul.mubr.f32.vlgmr.msra.gmra.mxu0 %v4742_v27 }
  0x54   : > { %4237 = vmatprep.mubr.f32.mxu1 %v461_v49  ;;  %4263 = vmatprep.mubr.f32.mxu0 %v4748_v30 }
  0x56   : > { %4238 = vmatmul.mubr.f32.gmra.mxu1 %v471_v60 }
  0x57   : > { %4264 = vmatmul.mubr.f32.gmra.mxu0 %v4766_v39  ;;  %4240 = vmatprep.mubr.f32.mxu1 %v481_v52 }
  0x58   : > { %4266 = vmatprep.mubr.f32.mxu0 %v4815_v13 }
  0x5a   : > { %4241 = vmatmul.mubr.f32.gmra.mxu1 %v491_v53 }
  0x5b   : > { %4267 = vmatmul.mubr.f32.gmra.mxu0 %v4818_v20  ;;  %4243 = vmatprep.mubr.f32.mxu1 %v501_v18 }
  0x5c   : > { %4269 = vmatprep.mubr.f32.mxu0 %v4853_v55 }
  0x5e   : > { %4244 = vmatmul.mubr.f32.gmra.mxu1 %v511_v19 }
  0x5f   : > { %4270 = vmatmul.mubr.f32.gmra.mxu0 %v4855_v56  ;;  %4246 = vmatprep.mubr.f32.mxu1 %v521_v32 }
  0x60   : > { %4272 = vmatprep.mubr.f32.mxu0 %v4721_v14 }
  0x62   : > { %4247 = vmatmul.mubr.f32.gmra.mxu1 %v531_v33 }
  0x63   : > { %4273 = vmatmul.mubr.f32.gmra.mxu0 %v4723_v16  ;;  %4249 = vmatprep.mubr.f32.mxu1 %v541_v47 }
  0x64   : > { %4275 = vmatprep.mubr.f32.mxu0 %v4744_v28 }
  0x66   : > { %4250 = vmatmul.mubr.f32.gmra.mxu1 %v551_v48 }
  0x67   : > { %4276 = vmatmul.mubr.f32.gmra.mxu0 %v4746_v29  ;;  %4252 = vmatprep.mubr.f32.mxu1 %v561_v46 }
  0x68   : > { %4278 = vmatprep.mubr.f32.mxu0 %v4811_v11 }
  0x6a   : > { %4253 = vmatmul.mubr.f32.gmra.mxu1 %v571_v51 }
  0x6b   : > { %4279 = vmatmul.mubr.f32.gmra.mxu0 %v4813_v12  ;;  %4255 = vmatprep.mubr.f32.mxu1 %v581_v61 }
  0x6c   : > { %4281 = vmatprep.mubr.f32.mxu0 %v4831_v40 }
  0x6e   : > { %4256 = vmatmul.mubr.f32.gmra.mxu1 %v591_v63 }
  0x6f   : > { %4282 = vmatmul.mubr.f32.gmra.mxu0 %v4838_v42  ;;  %4286 = vmatprep.mubr.f32.mxu1 %v4725_v17 }
  0x72   : > { %4287 = vmatmul.mubr.f32.vlgmr.msra.gmra.mxu1 %v4742_v27 }
  0x73   : > { %4289 = vmatprep.mubr.f32.mxu1 %v4748_v30 }
  0x76   : > { %4290 = vmatmul.mubr.f32.gmra.mxu1 %v4766_v39 }
  0x77   : > { %4292 = vmatprep.mubr.f32.mxu1 %v4815_v13 }
  0x7a   : > { %4293 = vmatmul.mubr.f32.gmra.mxu1 %v4818_v20 }
  0x7b   : > { %4295 = vmatprep.mubr.f32.mxu1 %v4853_v55 }
  0x7e   : > { %4296 = vmatmul.mubr.f32.gmra.mxu1 %v4855_v56 }
  0x7f   : > { %4298 = vmatprep.mubr.f32.mxu1 %v4721_v14 }
  0x82   : > { %4299 = vmatmul.mubr.f32.gmra.mxu1 %v4723_v16 }
  0x83   : > { %4301 = vmatprep.mubr.f32.mxu1 %v4744_v28 }
  0x86   : > { %4302 = vmatmul.mubr.f32.gmra.mxu1 %v4746_v29 }
  0x87   : > { %4304 = vmatprep.mubr.f32.mxu1 %v4811_v11 }
  0x8a   : > { %4305 = vmatmul.mubr.f32.gmra.mxu1 %v4813_v12 }
  0x8b   : > { %4307 = vmatprep.mubr.f32.mxu1 %v4831_v40 }
  0x8e   : > { %4308 = vmatmul.mubr.f32.gmra.mxu1 %v4838_v42 }
  0xde   : > { %v4170_v1 = vpop.f32.mrf.mxu1 }
  0xdf   : > { %v4991_v3 = vpop.f32.mrf.mxu0 }
  0xe0   : > { %v525_v17 = vpop.f32.mrf.mxu1 }
  0xe1   : > { %v4993_v24 = vpop.f32.mrf.mxu0 }
  0xe2   : > { %v4173_v14 = vpop.f32.mrf.mxu1 }
  0xe3   : > { %v4995_v16 = vpop.f32.mrf.mxu0 }
  0xe4   : > { %v545_v25 = vpop.f32.mrf.mxu1 }
  0xe5   : > { %v4997_v26 = vpop.f32.mrf.mxu0 }
  0xea   : > { %v4176_v27 = vpop.f32.mrf.mxu1  ;;  %v4999_v28 = vpop.f32.mrf.mxu0 }
  0xec   : > { %v565_v29 = vpop.f32.mrf.mxu1  ;;  %v5001_v30 = vpop.f32.mrf.mxu0 }
  0xee   : > { %v4179_v32 = vpop.f32.mrf.mxu1 }
  0xef   : > { %v5003_v33 = vpop.f32.mrf.mxu0 }
  0xf0   : > { %v585_v34 = vpop.f32.mrf.mxu1 }
  0xf1   : > { %v5005_v35 = vpop.f32.mrf.mxu0 }
  0xf2   : > { %v4184_v36 = vpop.f32.mrf.mxu1 }
  0xf3   : > { %v4210_v37 = vpop.f32.mrf.mxu0 }
  0xf4   : > { %v671_v38 = vpop.f32.mrf.mxu1 }
  0xf5   : > { %v835_v39 = vpop.f32.mrf.mxu0 }
  0xf6   : > { %v4187_v45 = vpop.f32.mrf.mxu1 }
  0xf7   : > { %v4213_v47 = vpop.f32.mrf.mxu0 }
  0xf8   : > { %v683_v48 = vpop.f32.mrf.mxu1 }
  0xf9   : > { %v5007_v49 = vpop.f32.mrf.mxu0 }
  0xfa   : > { %v4190_v50 = vpop.f32.mrf.mxu1 }
  0xfb   : > { %v5009_v60 = vpop.f32.mrf.mxu0 }
  0xfc   : > { %v695_v11 = vpop.f32.mrf.mxu1 }
  0xfd   : > { %v5011_v12 = vpop.f32.mrf.mxu0 }
  0xfe   : > { %v4193_v13 = vpop.f32.mrf.mxu1 }
  0xff   : > { %v5013_v20 = vpop.f32.mrf.mxu0 }
 0x100   : > { %v707_v15 = vpop.f32.mrf.mxu1 }
 0x101   : > { %v5017_v40 = vpop.f32.mrf.mxu0 }
 0x102   : > { %v4196_v23 = vpop.f32.mrf.mxu1 }
 0x103   : > { %v5015_v31 = vadd.f32 %v4196_v23, %v4170_v1  ;;  %v5021_v51 = vpop.f32.mrf.mxu0 }
 0x104   : > { %v719_v41 = vpop.f32.mrf.mxu1 }
 0x105   : > { %v5019_v42 = vadd.f32 %v719_v41, %v525_v17  ;;  %v5027_v55 = vpop.f32.mrf.mxu0 }
 0x106   : > { %v4199_v46 = vpop.f32.mrf.mxu1 }
 0x107   : > { %v5023_v52 = vadd.f32 %v4199_v46, %v4173_v14  ;;  %v4225_v63 = vpop.f32.mrf.mxu0  ;;  %v690_v46 = vadd.f32 %v4187_v45, %v4995_v16  ;;  %v714_v16 = vadd.f32 %v4193_v13, %v5003_v33  ;;  %v708_v45 = vadd.f32 %v707_v15, %v5005_v35 }
 0x108   : > { %v731_v2 = vpop.f32.mrf.mxu1  ;;  %v5084_v13 = vadd.f32 %v5021_v51, %v5015_v31 }
 0x109   : > { %v5025_v53 = vadd.f32 %v731_v2, %v545_v25  ;;  %v905_v7 = vpop.f32.mrf.mxu0  ;;  %v678_v25 = vadd.f32 %v4184_v36, %v4991_v3  ;;  %v684_v3 = vadd.f32 %v683_v48, %v4997_v26  ;;  %v857_v36 = vadd.f32 %v4213_v47, %v690_v46 }
 0x10a   : > { %v4202_v54 = vpop.f32.mrf.mxu1  ;;  %v885_v35 = vadd.f32 %v5013_v20, %v714_v16 }
 0x10b   : > { %v5029_v56 = vadd.f32 %v4202_v54, %v4176_v27  ;;  %v5037_v10 = vpop.f32.mrf.mxu0  ;;  %v843_v23 = vadd.f32 %v4210_v37, %v678_v25  ;;  %v696_v37 = vadd.f32 %v695_v11, %v5001_v30  ;;  %v850_v26 = vadd.f32 %v5007_v49, %v684_v3 }
 0x10c   : > { %v743_v59 = vpop.f32.mrf.mxu1  ;;  %v878_v11 = vadd.f32 %v5017_v40, %v708_v45  ;;  %v5095_v20 = vadd.f32 %v905_v7, %v5025_v53 }
 0x10d   : > { %v5031_v61 = vadd.f32 %v743_v59, %v565_v29  ;;  %v5039_v21 = vpop.f32.mrf.mxu0  ;;  %v864_v48 = vadd.f32 %v5011_v12, %v696_v37  ;;  %v5091_v12 = vadd.f32 %v4225_v63, %v5023_v52  ;;  %v5106_v63 = vadd.f32 %v5037_v10, %v5029_v56 }
 0x10e   : > { %v4205_v62 = vpop.f32.mrf.mxu1 }
 0x10f   : > { %v5033_v0 = vadd.f32 %v4205_v62, %v4179_v32  ;;  %v5043_v44 = vpop.f32.mrf.mxu0  ;;  %v672_v32 = vadd.f32 %v671_v38, %v4993_v24 }
 0x110   : > { %v755_v4 = vpop.f32.mrf.mxu1 }
 0x111   : > { %v5035_v5 = vadd.f32 %v755_v4, %v585_v34  ;;  %v933_v1 = vpop.f32.mrf.mxu0  ;;  %v836_v54 = vadd.f32 %v835_v39, %v672_v32 }
 0x112   : > { %v4236_v6 = vpop.f32.mrf.mxu1 }
 0x113   : > { %v4262_v27 = vpop.f32.mrf.mxu0  ;;  %v1023_v59 = vadd.f32 %v4236_v6, %v843_v23 }
 0x114   : > { %v1014_v8 = vpop.f32.mrf.mxu1 }
 0x115   : > { %v1208_v41 = vpop.f32.mrf.mxu0  ;;  %v1015_v4 = vadd.f32 %v1014_v8, %v836_v54  ;;  %v1215_v38 = vadd.f32 %v4262_v27, %v1023_v59 }
 0x116   : > { %v4239_v9 = vpop.f32.mrf.mxu1 }
 0x117   : > { %v1039_v39 = vadd.f32 %v4239_v9, %v857_v36  ;;  %v1209_v25 = vadd.f32 %v1208_v41, %v1015_v4  ;;  %v5111_v41 = vadd.f32 %v5039_v21, %v5031_v61 }
 0x118   : > { %v1030_v18 = vpop.f32.mrf.mxu1 }
 0x11a   : > { %v4242_v19 = vpop.f32.mrf.mxu1 }
 0x11c   : > { %v1046_v22 = vpop.f32.mrf.mxu1 }
 0x11d   : > { %v1047_v23 = vadd.f32 %v1046_v22, %v864_v48 }
 0x11e   : > { %v5041_v43 = vpop.f32.mrf.mxu1 }
 0x11f   : > { %v5123_v61 = vadd.f32 %v5041_v43, %v885_v35 }
 0x120   : > { %v5045_v57 = vpop.f32.mrf.mxu1 }
 0x122   : > { %v5047_v58 = vpop.f32.mrf.mxu1 }
 0x124   : > { %v5049_v17 = vpop.f32.mrf.mxu1 }
 0x126   : > { %v5051_v14 = vpop.f32.mrf.mxu1 }
 0x127   : > { %6848 = vst [vmem:[#allocation2_spill] sm:$0xff] %v5051_v14  ;;  %v4265_v14 = vpop.f32.mrf.mxu0 }
 0x128   : > { %v5054_v29 = vpop.f32.mrf.mxu1  ;;  %v1227_v49 = vadd.f32 %v4265_v14, %v1039_v39  ;;  %v1031_v14 = vadd.f32 %v1030_v18, %v850_v26  ;;  %v5115_v18 = vadd.f32 %v5043_v44, %v5033_v0  ;;  %v6768_v26 = vmov 2475754826  }
 0x129   : > { %6849 = vst [vmem:[#allocation3_spill] sm:$0xff] %v5054_v29  ;;  %v702_v29 = vadd.f32 %v4190_v50, %v4999_v28  ;;  %v1220_v32 = vpop.f32.mrf.mxu0 }
 0x12a   : > { %v5057_v34 = vpop.f32.mrf.mxu1  ;;  %v1221_v3 = vadd.f32 %v1220_v32, %v1031_v14  ;;  %v6764_v14 = vmov 1326507024  }
 0x12b   : > { %v871_v47 = vadd.f32 %v5009_v60, %v702_v29  ;;  %v5088_v60 = vadd.f32 %v5027_v55, %v5019_v42  ;;  %v4268_v9 = vpop.f32.mrf.mxu0 }
 0x12c   : > { %v5060_v2 = vpop.f32.mrf.mxu1 }
 0x12d   : > { %v1055_v42 = vadd.f32 %v4242_v19, %v871_v47  ;;  %v5118_v19 = vadd.f32 %v933_v1, %v5035_v5  ;;  %v1232_v46 = vpop.f32.mrf.mxu0  ;;  %v5128_v1 = vadd.f32 %v5045_v57, %v878_v11  ;;  %v6766_v11 = vmov 920167782  }
 0x12e   : > { %v5062_v62 = vpop.f32.mrf.mxu1  ;;  %v5125_v21 = vadd.f32 %v1232_v46, %v1047_v23 }
 0x12f   : > { %v5120_v36 = vadd.f32 %v4268_v9, %v1055_v42 }
 0x130   : > { %v5066_v24 = vpop.f32.mrf.mxu1 }
 0x132   : > { %v4288_v6 = vpop.f32.mrf.mxu1 }
 0x133   : > { %v5071_v8 = vadd.f32 %v4288_v6, %v1215_v38 }
 0x134   : > { %v1370_v28 = vpop.f32.mrf.mxu1 }
 0x135   : > { %v6755_v30 = vand.u32 2147483647, %v5071_v8  ;;  %v1571_v50 = vand.u32 2139095040, %v5071_v8  ;;  %v5078_v33 = vadd.f32 %v1370_v28, %v1209_v25  ;;  %v6771_v25 = vmov 683565275  }
 0x136   : > { %v4291_v15 = vpop.f32.mrf.mxu1  ;;  %v6760_v28 = vmov 2131351028  }
 0x137   : > { %v1572_v27 = vshrl.u32 %v1571_v50, 23  ;;  %v6756_v29 = vand.u32 2147483647, %v5078_v33  ;;  %v1575_v31 = vand.u32 8388607, %v6755_v30  ;;  %v1467_v40 = vand.u32 2139095040, %v5078_v33 }
 0x138   : > { %v5100_v51 = vadd.f32 %v4291_v15, %v1227_v49  ;;  %v1382_v4 = vpop.f32.mrf.mxu1  ;;  %v6758_v50 = vmov 2102212464  }
 0x139   : > { %v3910_v55 = vadd.s32 4294967169, %v1572_v27  ;;  %v1471_v52 = vand.u32 8388607, %v6756_v29  ;;  %v1468_v53 = vshrl.u32 %v1467_v40, 23  ;;  %v1576_v59 = vor.u32 8388608, %v1575_v31 }
 0x13a   : > { %6850 = vst [vmem:[#allocation4_spill] sm:$0xff] %v5100_v51  ;;  %v1779_v7 = vand.u32 2139095040, %v5100_v51  ;;  %v5130_v16 = vadd.f32 %v1382_v4, %v1221_v3  ;;  %v6757_v43 = vand.u32 2147483647, %v5100_v51 }
 0x13b   : > { %v1578_v54 = vadd.s32 1, %v3910_v55  ;;  %v3906_v56 = vadd.s32 4294967169, %v1468_v53  ;;  %v1472_v10 = vor.u32 8388608, %v1471_v52  ;;  %v5132_v45 = vshll.u32 %v1576_v59, 8 }
 0x13c   : > { %v1780_v22 = vshrl.u32 %v1779_v7, 23 }
 0x13d   : > { %vm1579_vm1 = vcmp.gt.s32.totalorder %v1578_v54, 0  ;;  %v1474_v44 = vadd.s32 1, %v3906_v56  ;;  %v5134_v39 = vshll.u32 %v1472_v10, 8 }
 0x13e   : > { %v1580_v0 = vsel %vm1579_vm1, %v1578_v54, 0  ;;  %v3918_v5 = vadd.s32 4294967169, %v1780_v22 }
 0x13f   : > { %v1581_v37 = vshrl.u32 %v1580_v0, 5  ;;  %v1582_v38 = vand.u32 31, %v1580_v0  ;;  %vm1475_vm2 = vcmp.gt.s32.totalorder %v1474_v44, 0 }
 0x140   : > { %v5139_v57 = vadd.s32 1, %v3918_v5  ;;  %v1476_v53 = vsel %vm1475_vm2, %v1474_v44, 0 }
 0x141   : > { %v1583_v6 = vsub.s32 32, %v1582_v38  ;;  %v1585_v32 = vshll.u32 %v6771_v25, %v1582_v38  ;;  %v1588_v47 = vshll.u32 %v6768_v26, %v1582_v38  ;;  %v1591_v48 = vshll.u32 %v6760_v28, %v1582_v38 }
 0x142   : > { %v1594_v35 = vshll.u32 %v6758_v50, %v1582_v38  ;;  %v1597_v49 = vshll.u32 %v6766_v11, %v1582_v38  ;;  %vm1600_vm3 = vcmp.lt.s32.totalorder %v1581_v37, 1  ;;  %vm1601_vm4 = vcmp.lt.s32.totalorder %v1581_v37, 2  ;;  %v5155_v38 = vpop.f32.mrf.mxu0 }
 0x143   : > { %v1586_v15 = vshrl.u32 %v6768_v26, %v1583_v6  ;;  %v1589_v9 = vshrl.u32 %v6760_v28, %v1583_v6  ;;  %v1592_v27 = vshrl.u32 %v6758_v50, %v1583_v6  ;;  %v1584_v31 = vshrl.u32 %v6771_v25, %v1583_v6 }
 0x144   : > { %v1595_v40 = vshrl.u32 %v6766_v11, %v1583_v6  ;;  %v1598_v42 = vshrl.u32 %v6764_v14, %v1583_v6  ;;  %vm1602_vm5 = vcmp.lt.s32.totalorder %v1581_v37, 3  ;;  %vm1603_vm6 = vcmp.lt.s32.totalorder %v1581_v37, 4 }
 0x145   : > { %v1587_v55 = vor.u32 %v1586_v15, %v1585_v32  ;;  %v1590_v52 = vor.u32 %v1589_v9, %v1588_v47  ;;  %v1593_v23 = vor.u32 %v1592_v27, %v1591_v48  ;;  %v1478_v54 = vand.u32 31, %v1476_v53 }
 0x146   : > { %v1596_v7 = vor.u32 %v1595_v40, %v1594_v35  ;;  %v1599_v46 = vor.u32 %v1598_v42, %v1597_v49  ;;  %v1477_v47 = vshrl.u32 %v1476_v53, 5  ;;  %vm1787_vm12 = vcmp.gt.s32.totalorder %v5139_v57, 0 }
 0x147   : > { %v1604_v59 = vsel %vm1600_vm3, %v1584_v31, %v1587_v55  ;;  %v1605_v56 = vsel %vm1603_vm6, %v1593_v23, 2102212464  ;;  %v1608_v10 = vsel %vm1600_vm3, %v1587_v55, %v1590_v52  ;;  %v1612_v22 = vsel %vm1600_vm3, %v1590_v52, %v1593_v23 }
 0x148   : > { %v1606_v4 = vsel %vm1602_vm5, %v1590_v52, %v1605_v56  ;;  %v1609_v3 = vsel %vm1603_vm6, %v1596_v7, 920167782  ;;  %v1613_v0 = vsel %vm1603_vm6, %v1599_v46, 1326507024  ;;  %v1479_v5 = vsub.s32 32, %v1478_v54 }
 0x149   : > { %v1607_v44 = vsel %vm1601_vm4, %v1604_v59, %v1606_v4  ;;  %v1610_v6 = vsel %vm1602_vm5, %v1593_v23, %v1609_v3  ;;  %v1614_v32 = vsel %vm1602_vm5, %v1596_v7, %v1613_v0  ;;  %v1481_v15 = vshll.u32 %v6771_v25, %v1478_v54  ;;  %v5177_v23 = vpop.f32.mrf.mxu0 }
 0x14a   : > { %v1611_v48 = vsel %vm1601_vm4, %v1608_v10, %v1610_v6  ;;  %v1615_v35 = vsel %vm1601_vm4, %v1612_v22, %v1614_v32  ;;  %v1623_v49 = vmul.u32 %v5132_v45, %v1607_v44  ;;  %v1480_v42 = vshrl.u32 %v6771_v25, %v1479_v5 }
 0x14b   : > { %v5165_v9 = vmul.u32.u64.low %v5132_v45, %v1615_v35  ;;  %v5166_v27 = vmul.u32.u64.high %v5132_v45, %v1615_v35, %v5165_v9  ;;  %v5169_v31 = vmul.u32.u64.low %v5132_v45, %v1611_v48  ;;  %v5170_v40 = vmul.u32.u64.high %v5132_v45, %v1611_v48, %v5169_v31  ;;  %v5188_v6 = vpop.f32.mrf.mxu0 }
 0x14c   : > { %v1482_v55 = vshrl.u32 %v6768_v26, %v1479_v5  ;;  %v1484_v37 = vshll.u32 %v6768_v26, %v1478_v54  ;;  %v1485_v52 = vshrl.u32 %v6760_v28, %v1479_v5  ;;  %v1487_v53 = vshll.u32 %v6760_v28, %v1478_v54 }
 0x14d   : > { %v1488_v7 = vshrl.u32 %v6758_v50, %v1479_v5  ;;  %v1490_v46 = vshll.u32 %v6758_v50, %v1478_v54  ;;  %v1491_v45 = vshrl.u32 %v6766_v11, %v1479_v5  ;;  %v1493_v10 = vshll.u32 %v6766_v11, %v1478_v54 }
 0x14e   : > { %v1483_v59 = vor.u32 %v1482_v55, %v1481_v15  ;;  %v1486_v56 = vor.u32 %v1485_v52, %v1484_v37  ;;  %v1494_v22 = vshrl.u32 %v6764_v14, %v1479_v5  ;;  %vm1625_vm7 = vc.u32 %v5166_v27, %v5169_v31 }
 0x14f   : > { %v1626_v4 = vadd.s32 1, %v5170_v40  ;;  %v1489_v3 = vor.u32 %v1488_v7, %v1487_v53  ;;  %vm1496_vm8 = vcmp.lt.s32.totalorder %v1477_v47, 1  ;;  %v1492_v0 = vor.u32 %v1491_v45, %v1490_v46 }
 0x150   : > { %v1495_v44 = vor.u32 %v1494_v22, %v1493_v10  ;;  %vm1497_vm9 = vcmp.lt.s32.totalorder %v1477_v47, 2  ;;  %vm1498_vm10 = vcmp.lt.s32.totalorder %v1477_v47, 3  ;;  %vm1499_vm11 = vcmp.lt.s32.totalorder %v1477_v47, 4 }
 0x151   : > { %v1627_v32 = vsel %vm1625_vm7, %v1626_v4, %v5170_v40  ;;  %v1500_v48 = vsel %vm1496_vm8, %v1480_v42, %v1483_v59  ;;  %v1504_v54 = vsel %vm1496_vm8, %v1483_v59, %v1486_v56  ;;  %v1501_v5 = vsel %vm1499_vm11, %v1489_v3, 2102212464  ;;  %v5198_v42 = vpop.f32.mrf.mxu0 }
 0x152   : > { %v1628_v35 = vadd.s32 %v1627_v32, %v1623_v49  ;;  %v1505_v15 = vsel %vm1499_vm11, %v1492_v0, 920167782  ;;  %v1508_v9 = vsel %vm1496_vm8, %v1486_v56, %v1489_v3  ;;  %v1502_v55 = vsel %vm1498_vm10, %v1486_v56, %v1501_v5 }
 0x153   : > { %v1506_v37 = vsel %vm1498_vm10, %v1489_v3, %v1505_v15  ;;  %v1509_v52 = vsel %vm1499_vm11, %v1495_v44, 1326507024  ;;  %v1783_v40 = vand.u32 8388607, %v6757_v43  ;;  %v1503_v49 = vsel %vm1497_vm9, %v1500_v48, %v1502_v55  ;;  %v6852_v44 = vld [vmem:[#allocation2_spill] sm:$0xff] }
 0x154   : > { %v1629_v53 = vadd.s32 536870912, %v1628_v35  ;;  %v1507_v7 = vsel %vm1497_vm9, %v1504_v54, %v1506_v37  ;;  %v1510_v46 = vsel %vm1498_vm10, %v1492_v0, %v1509_v52  ;;  %v1788_v3 = vsel %vm1787_vm12, %v5139_v57, 0 }
 0x155   : > { %v1511_v45 = vsel %vm1497_vm9, %v1508_v9, %v1510_v46  ;;  %v5203_v59 = vmul.u32.u64.low %v5134_v39, %v1507_v7  ;;  %v5204_v56 = vmul.u32.u64.high %v5134_v39, %v1507_v7, %v5203_v59  ;;  %v5216_v0 = vadd.f32 %v5047_v58, %v5084_v13  ;;  %v5229_v9 = vpop.f32.mrf.mxu0 }
 0x156   : > { %v5207_v10 = vshrl.u32 %v1629_v53, 30  ;;  %v5210_v22 = vmul.u32.u64.low %v5134_v39, %v1511_v45  ;;  %v5211_v4 = vmul.u32.u64.high %v5134_v39, %v1511_v45, %v5210_v22  ;;  %v5220_v47 = vadd.f32 %v5049_v17, %v5088_v60 }
 0x157   : > { %v5224_v32 = vadd.f32 %v6852_v44, %v5091_v12  ;;  %v1790_v48 = vand.u32 31, %v1788_v3  ;;  %v1784_v5 = vor.u32 8388608, %v1783_v40  ;;  %v6763_v15 = vand.u32 2147483647, %v5130_v16  ;;  %v5248_v45 = vpop.f32.mrf.mxu0 }
 0x158   : > { %6851 = vst [vmem:[#allocation5_spill] sm:$0xff] %v5207_v10  ;;  %v1631_v54 = vshll.u32 %v5207_v10, 30  ;;  %v1675_v57 = vand.u32 2139095040, %v5130_v16  ;;  %v1519_v58 = vmul.u32 %v5134_v39, %v1503_v49  ;;  %v1522_v13 = vadd.s32 1, %v5204_v56 }
 0x159   : > { %v5233_v17 = vshrl.u32 %v1788_v3, 5  ;;  %v1791_v60 = vsub.s32 32, %v1790_v48  ;;  %vm1521_vm13 = vc.u32 %v5211_v4, %v5203_v59  ;;  %v1793_v12 = vshll.u32 %v6771_v25, %v1790_v48 }
 0x15a   : > { %v5235_v55 = vsub.s32 %v1628_v35, %v1631_v54  ;;  %v1796_v37 = vshll.u32 %v6768_v26, %v1790_v48  ;;  %v1523_v52 = vsel %vm1521_vm13, %v1522_v13, %v5204_v56  ;;  %v1799_v7 = vshll.u32 %v6760_v28, %v1790_v48 }
 0x15b   : > { %v1794_v53 = vshrl.u32 %v6768_v26, %v1791_v60  ;;  %v1797_v39 = vshrl.u32 %v6760_v28, %v1791_v60  ;;  %v1524_v40 = vadd.s32 %v1523_v52, %v1519_v58  ;;  %v1800_v35 = vshrl.u32 %v6758_v50, %v1791_v60 }
 0x15c   : > { %v1634_v46 = vsub.s32 0, %v5235_v55  ;;  %v1802_v49 = vshll.u32 %v6758_v50, %v1790_v48  ;;  %v1803_v44 = vshrl.u32 %v6766_v11, %v1791_v60  ;;  %v1805_v56 = vshll.u32 %v6766_v11, %v1790_v48 }
 0x15d   : > { %v1795_v22 = vor.u32 %v1794_v53, %v1793_v12  ;;  %v1798_v3 = vor.u32 %v1797_v39, %v1796_v37  ;;  %v1525_v13 = vadd.s32 536870912, %v1524_v40  ;;  %v1801_v30 = vor.u32 %v1800_v35, %v1799_v7  ;;  %v4280_v37 = vpop.f32.mrf.mxu0 }
 0x15e   : > { %v3911_v54 = vmin.u32 %v1634_v46, %v5235_v55  ;;  %v1806_v29 = vshrl.u32 %v6764_v14, %v1791_v60  ;;  %v1792_v58 = vshrl.u32 %v6771_v25, %v1791_v60  ;;  %v1804_v52 = vor.u32 %v1803_v44, %v1802_v49  ;;  %v4294_v60 = vpop.f32.mrf.mxu1 }
 0x15f   : > { %vm1808_vm14 = vcmp.lt.s32.totalorder %v5233_v17, 1  ;;  %v1824_v43 = vshll.u32 %v1784_v5, 8  ;;  %v5256_v28 = vshrl.u32 %v1525_v13, 30  ;;  %vm1811_vm15 = vcmp.lt.s32.totalorder %v5233_v17, 4  ;;  %v1280_v13 = vpop.f32.mrf.mxu0 }
 0x160   : > { %v1636_v50 = vclz %v3911_v54  ;;  %v1807_v12 = vor.u32 %v1806_v29, %v1805_v56  ;;  %vm1809_vm1 = vcmp.lt.s32.totalorder %v5233_v17, 2  ;;  %vm1810_vm2 = vcmp.lt.s32.totalorder %v5233_v17, 3 }
 0x161   : > { %6853 = vst [vmem:[#allocation2_spill] sm:$0xff] %v5256_v28  ;;  %v1816_v48 = vsel %vm1808_vm14, %v1795_v22, %v1798_v3  ;;  %v1817_v53 = vsel %vm1811_vm15, %v1804_v52, 920167782  ;;  %v1527_v7 = vshll.u32 %v5256_v28, 30  ;;  %v1813_v5 = vsel %vm1811_vm15, %v1801_v30, 2102212464 }
 0x162   : > { %v3912_v39 = vadd.s32 4294967294, %v1636_v50  ;;  %v1818_v46 = vsel %vm1810_vm2, %v1801_v30, %v1817_v53  ;;  %v1820_v35 = vsel %vm1808_vm14, %v1798_v3, %v1801_v30  ;;  %v1821_v49 = vsel %vm1811_vm15, %v1807_v12, 1326507024 }
 0x163   : > { %v1819_v29 = vsel %vm1809_vm1, %v1816_v48, %v1818_v46  ;;  %v1676_v44 = vshrl.u32 %v1675_v57, 23  ;;  %v1812_v56 = vsel %vm1808_vm14, %v1792_v58, %v1795_v22  ;;  %v1822_v50 = vsel %vm1810_vm2, %v1804_v52, %v1821_v49 }
 0x164   : > { %vm3913_vm3 = vcmp.lt.s32.totalorder %v3912_v39, 0  ;;  %v5275_v54 = vadd.f32 %v4294_v60, %v5120_v36  ;;  %v1814_v53 = vsel %vm1810_vm2, %v1798_v3, %v1813_v5  ;;  %v1823_v48 = vsel %vm1809_vm1, %v1820_v35, %v1822_v50 }
 0x165   : > { %v5281_v30 = vmul.u32.u64.low %v1824_v43, %v1819_v29  ;;  %v5282_v12 = vmul.u32.u64.high %v1824_v43, %v1819_v29, %v5281_v30  ;;  %v5287_v57 = vadd.f32 %v5155_v38, %v5123_v61  ;;  %v5291_v22 = vadd.f32 %v5177_v23, %v5128_v1  ;;  %v6854_v61 = vld [vmem:[#allocation3_spill] sm:$0xff] }
 0x166   : > { %v5295_v36 = vadd.f32 %v5188_v6, %v5216_v0  ;;  %v5297_v3 = vsub.s32 %v1524_v40, %v1527_v7  ;;  %v1639_v58 = vsel %vm3913_vm3, 0, %v3912_v39  ;;  %v3914_v5 = vadd.s32 4294967169, %v1676_v44  ;;  %v4283_v0 = vpop.f32.mrf.mxu0 }
 0x167   : > { %v5299_v52 = vmul.u32.u64.low %v1824_v43, %v1823_v48  ;;  %v5300_v60 = vmul.u32.u64.high %v1824_v43, %v1823_v48, %v5299_v52  ;;  %v5304_v46 = vadd.f32 %v5198_v42, %v5220_v47  ;;  %v1095_v38 = vadd.f32 %v6854_v61, %v5095_v20 }
 0x168   : > { %v1815_v1 = vsel %vm1809_vm1, %v1812_v56, %v1814_v53  ;;  %v1987_v23 = vand.u32 2139095040, %v5275_v54  ;;  %v5313_v6 = vadd.f32 %v5229_v9, %v5224_v32  ;;  %v1834_v40 = vadd.s32 1, %v5282_v12 }
 0x169   : > { %v1679_v39 = vand.u32 8388607, %v6763_v15  ;;  %v1682_v42 = vadd.s32 1, %v3914_v5  ;;  %v1119_v47 = vadd.f32 %v5057_v34, %v5106_v63  ;;  %v1111_v20 = vadd.f32 %v5060_v2, %v5111_v41  ;;  %v1292_v41 = vpop.f32.mrf.mxu0 }
 0x16a   : > { %v1640_v17 = vsub.s32 32, %v1639_v58  ;;  %v1530_v7 = vsub.s32 0, %v5297_v3  ;;  %v1135_v32 = vadd.f32 %v5062_v62, %v5115_v18  ;;  %v1831_v9 = vmul.u32 %v1824_v43, %v1815_v1 }
 0x16b   : > { %vm1833_vm4 = vc.u32 %v5300_v60, %v5281_v30  ;;  %vm1683_vm5 = vcmp.gt.s32.totalorder %v1682_v42, 0  ;;  %v1127_v29 = vadd.f32 %v5066_v24, %v5118_v19  ;;  %v1624_v34 = vadd.s32 %v5169_v31, %v5166_v27 }
 0x16c   : > { %v1835_v63 = vsel %vm1833_vm4, %v1834_v40, %v5282_v12  ;;  %v1988_v2 = vshrl.u32 %v1987_v23, 23  ;;  %v1644_v35 = vsub.s32 4294967266, %v1639_v58  ;;  %v1680_v44 = vor.u32 8388608, %v1679_v39 }
 0x16d   : > { %v1836_v49 = vadd.s32 %v1835_v63, %v1831_v9  ;;  %v1684_v56 = vsel %vm1683_vm5, %v1682_v42, 0  ;;  %v1642_v62 = vshrl.u32 %v1624_v34, %v1640_v17  ;;  %v3907_v18 = vmin.u32 %v1530_v7, %v5297_v3 }
 0x16e   : > { %v1686_v43 = vand.u32 31, %v1684_v56  ;;  %v6762_v50 = vand.u32 2147483647, %v5275_v54  ;;  %v5335_v53 = vadd.f32 %v5248_v45, %v1095_v38  ;;  %v5337_v24 = vadd.f32 %v4280_v37, %v1119_v47 }
 0x16f   : > { %v5339_v19 = vadd.f32 %v1280_v13, %v1111_v20  ;;  %v1837_v27 = vadd.s32 536870912, %v1836_v49  ;;  %v5341_v31 = vadd.f32 %v4283_v0, %v1135_v32  ;;  %v5343_v48 = vadd.f32 %v1292_v41, %v1127_v29 }
 0x170   : > { %v1641_v12 = vshll.u32 %v5235_v55, %v1639_v58  ;;  %v3926_v52 = vadd.s32 4294967169, %v1988_v2  ;;  %v1645_v5 = vadd.s32 127, %v1644_v35  ;;  %v5348_v61 = vadd.s32 %v5203_v59, %v5211_v4 }
 0x171   : > { %v5350_v1 = vshrl.u32 %v1837_v27, 30  ;;  %v1687_v45 = vsub.s32 32, %v1686_v43  ;;  %v1532_v13 = vclz %v3907_v18  ;;  %v5354_v38 = vshll.u32 %v1680_v44, 8 }
 0x172   : > { %v5352_v37 = vor.u32 %v1642_v62, %v1641_v12  ;;  %v1991_v23 = vand.u32 8388607, %v6762_v50  ;;  %v1689_v55 = vshll.u32 %v6771_v25, %v1686_v43  ;;  %v6856_v40 = vmov 2131351028  }
 0x173   : > { %6855 = vst [vmem:[#allocation3_spill] sm:$0xff] %v5350_v1  ;;  %v1839_v0 = vshll.u32 %v5350_v1, 30  ;;  %v1690_v58 = vshrl.u32 %v6768_v26, %v1687_v45  ;;  %v1693_v59 = vshrl.u32 %v6856_v40, %v1687_v45  ;;  %v1692_v4 = vshll.u32 %v6768_v26, %v1686_v43 }
 0x174   : > { %v1695_v39 = vshll.u32 %v6856_v40, %v1686_v43  ;;  %v6857_v42 = vmov 2102212464   ;;  %v1994_v20 = vadd.s32 1, %v3926_v52  ;;  %v1646_v17 = vshll.u32 %v1645_v5, 23 }
 0x175   : > { %v1696_v47 = vshrl.u32 %v6857_v42, %v1687_v45  ;;  %v5365_v7 = vsub.s32 %v1836_v49, %v1839_v0  ;;  %v1685_v32 = vshrl.u32 %v1684_v56, 5  ;;  %v1691_v9 = vor.u32 %v1690_v58, %v1689_v55 }
 0x176   : > { %v1694_v29 = vor.u32 %v1693_v59, %v1692_v4  ;;  %v1698_v63 = vshll.u32 %v6857_v42, %v1686_v43  ;;  %v1699_v2 = vshrl.u32 %v6766_v11, %v1687_v45  ;;  %v1701_v35 = vshll.u32 %v6766_v11, %v1686_v43  ;;  %v1394_v59 = vpop.f32.mrf.mxu1 }
 0x177   : > { %v1697_v34 = vor.u32 %v1696_v47, %v1695_v39  ;;  %v1842_v41 = vsub.s32 0, %v5365_v7  ;;  %v1702_v44 = vshrl.u32 %v6764_v14, %v1687_v45  ;;  %v1992_v62 = vor.u32 8388608, %v1991_v23 }
 0x178   : > { %v3908_v18 = vadd.s32 4294967294, %v1532_v13  ;;  %v1688_v27 = vshrl.u32 %v6771_v25, %v1687_v45  ;;  %v1700_v49 = vor.u32 %v1699_v2, %v1698_v63  ;;  %vm1995_vm6 = vcmp.gt.s32.totalorder %v1994_v20, 0 }
 0x179   : > { %v3919_v56 = vmin.u32 %v1842_v41, %v5365_v7  ;;  %v1703_v12 = vor.u32 %v1702_v44, %v1701_v35  ;;  %vm1704_vm7 = vcmp.lt.s32.totalorder %v1685_v32, 1  ;;  %vm1707_vm8 = vcmp.lt.s32.totalorder %v1685_v32, 4 }
 0x17a   : > { %vm1706_vm9 = vcmp.lt.s32.totalorder %v1685_v32, 3  ;;  %v1709_v52 = vsel %vm1707_vm8, %v1697_v34, 2102212464  ;;  %v1712_v5 = vsel %vm1704_vm7, %v1691_v9, %v1694_v29  ;;  %v1713_v0 = vsel %vm1707_vm8, %v1700_v49, 920167782 }
 0x17b   : > { %v1844_v55 = vclz %v3919_v56  ;;  %vm1705_vm10 = vcmp.lt.s32.totalorder %v1685_v32, 2  ;;  %v1714_v43 = vsel %vm1706_vm9, %v1697_v34, %v1713_v0  ;;  %v1716_v58 = vsel %vm1704_vm7, %v1694_v29, %v1697_v34 }
 0x17c   : > { %v1708_v23 = vsel %vm1704_vm7, %v1688_v27, %v1691_v9  ;;  %v1710_v13 = vsel %vm1706_vm9, %v1694_v29, %v1709_v52  ;;  %v1715_v45 = vsel %vm1705_vm10, %v1712_v5, %v1714_v43  ;;  %v1717_v4 = vsel %vm1707_vm8, %v1703_v12, 1326507024 }
 0x17d   : > { %v3920_v39 = vadd.s32 4294967294, %v1844_v55  ;;  %v1718_v47 = vsel %vm1706_vm9, %v1700_v49, %v1717_v4  ;;  %v5376_v63 = vmul.u32.u64.low %v5354_v38, %v1715_v45  ;;  %v5377_v2 = vmul.u32.u64.high %v5354_v38, %v1715_v45, %v5376_v63 }
 0x17e   : > { %v1647_v41 = vor.u32 4788187, %v1646_v17  ;;  %v1719_v35 = vsel %vm1705_vm10, %v1716_v58, %v1718_v47  ;;  %v1996_v44 = vsel %vm1995_vm6, %v1994_v20, 0  ;;  %v5383_v34 = vadd.f32 %v1394_v59, %v5125_v21 }
 0x17f   : > { %vm3909_vm11 = vcmp.lt.s32.totalorder %v3908_v18, 0  ;;  %vm3921_vm12 = vcmp.lt.s32.totalorder %v3920_v39, 0  ;;  %v5386_v9 = vmul.u32.u64.low %v5354_v38, %v1719_v35  ;;  %v5387_v29 = vmul.u32.u64.high %v5354_v38, %v1719_v35, %v5386_v9 }
 0x180   : > { %v1832_v27 = vadd.s32 %v5281_v30, %v5300_v60  ;;  %v5391_v49 = vsel %vm3921_vm12, 0, %v3920_v39  ;;  %v1711_v17 = vsel %vm1705_vm10, %v1708_v23, %v1710_v13  ;;  %v1998_v56 = vand.u32 31, %v1996_v44 }
 0x181   : > { %v1650_v12 = vcvt.s32.f32 %v5352_v37  ;;  %v1852_v20 = vsub.s32 4294967266, %v5391_v49  ;;  %v1730_v21 = vadd.s32 1, %v5377_v2  ;;  %v5397_v52 = vshll.u32 %v1992_v62, 8 }
 0x182   : > { %v1648_v5 = vand.u32 2147483647, %v1647_v41  ;;  %v5399_v0 = vsel %vm3909_vm11, 0, %v3908_v18  ;;  %v1999_v55 = vsub.s32 32, %v1998_v56  ;;  %v6770_v43 = vand.u32 2147483647, %v5383_v34 }
 0x183   : > { %v1727_v30 = vmul.u32 %v5354_v38, %v1711_v17  ;;  %vm1729_vm13 = vc.u32 %v5387_v29, %v5376_v63  ;;  %v1997_v60 = vshrl.u32 %v1996_v44, 5  ;;  %v2001_v37 = vshll.u32 %v6771_v25, %v1998_v56 }
 0x184   : > { %v1731_v32 = vsel %vm1729_vm13, %v1730_v21, %v5377_v2  ;;  %v2002_v58 = vshrl.u32 %v6768_v26, %v1999_v55  ;;  %v2004_v62 = vshll.u32 %v6768_v26, %v1998_v56  ;;  %v2005_v18 = vshrl.u32 %v6856_v40, %v1999_v55 }
 0x185   : > { %v1853_v59 = vadd.s32 127, %v1852_v20  ;;  %v1732_v23 = vadd.s32 %v1731_v32, %v1727_v30  ;;  %v2007_v13 = vshll.u32 %v6856_v40, %v1998_v56  ;;  %v2008_v38 = vshrl.u32 %v6857_v42, %v1999_v55 }
 0x186   : > { %v2003_v45 = vor.u32 %v2002_v58, %v2001_v37  ;;  %v2006_v4 = vor.u32 %v2005_v18, %v2004_v62  ;;  %v2010_v39 = vshll.u32 %v6857_v42, %v1998_v56  ;;  %v2011_v47 = vshrl.u32 %v6766_v11, %v1999_v55 }
 0x187   : > { %v5414_v41 = vmul.f32 %v1650_v12, %v1648_v5  ;;  %v1540_v2 = vsub.s32 4294967266, %v5399_v0  ;;  %v1733_v35 = vadd.s32 536870912, %v1732_v23  ;;  %v2009_v44 = vor.u32 %v2008_v38, %v2007_v13 }
 0x188   : > { %v2012_v9 = vor.u32 %v2011_v47, %v2010_v39  ;;  %v2013_v17 = vshll.u32 %v6766_v11, %v1998_v56  ;;  %v2014_v20 = vshrl.u32 %v6764_v14, %v1999_v55  ;;  %v1883_v21 = vand.u32 2139095040, %v5383_v34  ;;  %v4297_v14 = vpop.f32.mrf.mxu1 }
 0x189   : > { %v1848_v30 = vsub.s32 32, %v5391_v49  ;;  %v5421_v37 = vshrl.u32 %v1733_v35, 30  ;;  %v2000_v32 = vshrl.u32 %v6771_v25, %v1999_v55  ;;  %vm2016_vm14 = vcmp.lt.s32.totalorder %v1997_v60, 1 }
 0x18a   : > { %v1854_v12 = vshll.u32 %v1853_v59, 23  ;;  %v2015_v5 = vor.u32 %v2014_v20, %v2013_v17  ;;  %vm2019_vm15 = vcmp.lt.s32.totalorder %v1997_v60, 4  ;;  %v2024_v58 = vsel %vm2016_vm14, %v2003_v45, %v2006_v4 }
 0x18b   : > { %6858 = vst [vmem:[#allocation6_spill] sm:$0xff] %v5421_v37  ;;  %v1735_v62 = vshll.u32 %v5421_v37, 30  ;;  %vm2018_vm1 = vcmp.lt.s32.totalorder %v1997_v60, 3  ;;  %v2021_v18 = vsel %vm2019_vm15, %v2009_v44, 2102212464  ;;  %vm2017_vm2 = vcmp.lt.s32.totalorder %v1997_v60, 2 }
 0x18c   : > { %v2025_v56 = vsel %vm2019_vm15, %v2012_v9, 920167782  ;;  %v2028_v38 = vsel %vm2016_vm14, %v2006_v4, %v2009_v44  ;;  %v2029_v39 = vsel %vm2019_vm15, %v2015_v5, 1326507024  ;;  %v1850_v47 = vshrl.u32 %v1832_v27, %v1848_v30 }
 0x18d   : > { %v2026_v13 = vsel %vm2018_vm1, %v2009_v44, %v2025_v56  ;;  %v5425_v50 = vsub.s32 %v1732_v23, %v1735_v62  ;;  %v2020_v35 = vsel %vm2016_vm14, %v2000_v32, %v2003_v45  ;;  %v2022_v15 = vsel %vm2018_vm1, %v2006_v4, %v2021_v18 }
 0x18e   : > { %v2027_v55 = vsel %vm2017_vm2, %v2024_v58, %v2026_v13  ;;  %v2030_v59 = vsel %vm2018_vm1, %v2012_v9, %v2029_v39  ;;  %v1541_v11 = vadd.s32 127, %v1540_v2  ;;  %v1884_v5 = vshrl.u32 %v1883_v21, 23 }
 0x18f   : > { %v5429_v17 = vmul.u32.u64.low %v5397_v52, %v2027_v55  ;;  %v5430_v20 = vmul.u32.u64.high %v5397_v52, %v2027_v55, %v5429_v17  ;;  %v1738_v26 = vsub.s32 0, %v5425_v50  ;;  %v2031_v44 = vsel %vm2017_vm2, %v2028_v38, %v2030_v59 }
 0x190   : > { %v1849_v27 = vshll.u32 %v5365_v7, %v5391_v49  ;;  %v1855_v23 = vor.u32 4788187, %v1854_v12  ;;  %v5438_v45 = vmul.u32.u64.low %v5397_v52, %v2031_v44  ;;  %v5439_v4 = vmul.u32.u64.high %v5397_v52, %v2031_v44, %v5438_v45 }
 0x191   : > { %v3915_v9 = vmin.u32 %v1738_v26, %v5425_v50  ;;  %v2023_v30 = vsel %vm2017_vm2, %v2020_v35, %v2022_v15  ;;  %v3922_v32 = vadd.s32 4294967169, %v1884_v5  ;;  %v5444_v2 = vadd.f32 %v4297_v14, %v5287_v57 }
 0x192   : > { %v1536_v58 = vsub.s32 32, %v5399_v0  ;;  %v1851_v62 = vor.u32 %v1850_v47, %v1849_v27  ;;  %v2042_v21 = vadd.s32 1, %v5430_v20  ;;  %v1887_v7 = vand.u32 8388607, %v6770_v43 }
 0x193   : > { %6859 = vst [vmem:[#allocation7_spill] sm:$0xff] %v5444_v2  ;;  %v1542_v12 = vshll.u32 %v1541_v11, 23  ;;  %v1740_v18 = vclz %v3915_v9  ;;  %v1890_v26 = vadd.s32 1, %v3922_v32  ;;  %v1856_v60 = vand.u32 2147483647, %v1855_v23 }
 0x194   : > { %v2039_v14 = vmul.u32 %v5397_v52, %v2023_v30  ;;  %vm2041_vm3 = vc.u32 %v5439_v4, %v5429_v17  ;;  %v2195_v13 = vand.u32 2139095040, %v5444_v2  ;;  %v1858_v38 = vcvt.s32.f32 %v1851_v62 }
 0x195   : > { %v3916_v57 = vadd.s32 4294967294, %v1740_v18  ;;  %v2043_v56 = vsel %vm2041_vm3, %v2042_v21, %v5430_v20  ;;  %vm1891_vm4 = vcmp.gt.s32.totalorder %v1890_v26, 0  ;;  %v1888_v47 = vor.u32 8388608, %v1887_v7 }
 0x196   : > { %v2044_v39 = vadd.s32 %v2043_v56, %v2039_v14  ;;  %v1892_v11 = vsel %vm1891_vm4, %v1890_v26, 0  ;;  %v1538_v35 = vshrl.u32 %v5348_v61, %v1536_v58  ;;  %v5459_v55 = vor.u32 4788187, %v1542_v12 }
 0x197   : > { %vm3917_vm5 = vcmp.lt.s32.totalorder %v3916_v57, 0  ;;  %v1894_v59 = vand.u32 31, %v1892_v11  ;;  %v5461_v52 = vmul.f32 %v1858_v38, %v1856_v60  ;;  %v1728_v44 = vadd.s32 %v5376_v63, %v5387_v29 }
 0x198   : > { %v1743_v5 = vsel %vm3917_vm5, 0, %v3916_v57  ;;  %v2045_v20 = vadd.s32 536870912, %v2044_v39  ;;  %v2196_v9 = vshrl.u32 %v2195_v13, 23  ;;  %v1893_v61 = vshrl.u32 %v1892_v11, 5 }
 0x199   : > { %v1748_v27 = vsub.s32 4294967266, %v1743_v5  ;;  %v1895_v23 = vsub.s32 32, %v1894_v59  ;;  %v1744_v30 = vsub.s32 32, %v1743_v5  ;;  %v5468_v58 = vshll.u32 %v1888_v47, 8 }
 0x19a   : > { %v5466_v32 = vshrl.u32 %v2045_v20, 30  ;;  %v1897_v21 = vshll.u32 %v6771_v25, %v1894_v59  ;;  %v6861_v7 = vmov 2475754826   ;;  %v1903_v26 = vshll.u32 %v6856_v40, %v1894_v59 }
 0x19b   : > { %v1749_v62 = vadd.s32 127, %v1748_v27  ;;  %v1898_v12 = vshrl.u32 %v6861_v7, %v1895_v23  ;;  %v1900_v63 = vshll.u32 %v6861_v7, %v1894_v59  ;;  %v1901_v18 = vshrl.u32 %v6856_v40, %v1895_v23 }
 0x19c   : > { %6860 = vst [vmem:[#allocation8_spill] sm:$0xff] %v5466_v32  ;;  %v2047_v29 = vshll.u32 %v5466_v32, 30  ;;  %v1904_v60 = vshrl.u32 %v6857_v42, %v1895_v23  ;;  %v1906_v57 = vshll.u32 %v6857_v42, %v1894_v59  ;;  %v6862_v56 = vmov 920167782  }
 0x19d   : > { %v1750_v14 = vshll.u32 %v1749_v62, 23  ;;  %v1907_v13 = vshrl.u32 %v6862_v56, %v1895_v23  ;;  %v3934_v38 = vadd.s32 4294967169, %v2196_v9  ;;  %v1899_v11 = vor.u32 %v1898_v12, %v1897_v21 }
 0x19e   : > { %v5479_v47 = vsub.s32 %v2044_v39, %v2047_v29  ;;  %v1902_v20 = vor.u32 %v1901_v18, %v1900_v63  ;;  %v1905_v27 = vor.u32 %v1904_v60, %v1903_v26  ;;  %v1746_v43 = vshrl.u32 %v1728_v44, %v1744_v30 }
 0x19f   : > { %v1908_v15 = vor.u32 %v1907_v13, %v1906_v57  ;;  %v1909_v45 = vshll.u32 %v6862_v56, %v1894_v59  ;;  %v6863_v49 = vmov 1326507024   ;;  %v1745_v32 = vshll.u32 %v5425_v50, %v1743_v5 }
 0x1a0   : > { %v1910_v25 = vshrl.u32 %v6863_v49, %v1895_v23  ;;  %v1751_v1 = vor.u32 4788187, %v1750_v14  ;;  %v2050_v62 = vsub.s32 0, %v5479_v47  ;;  %v6864_v37 = vmov 683565275  }
 0x1a1   : > { %v1896_v10 = vshrl.u32 %v6864_v37, %v1895_v23  ;;  %vm1912_vm6 = vcmp.lt.s32.totalorder %v1893_v61, 1  ;;  %vm1914_vm7 = vcmp.lt.s32.totalorder %v1893_v61, 3  ;;  %vm1915_vm8 = vcmp.lt.s32.totalorder %v1893_v61, 4 }
 0x1a2   : > { %v1911_v28 = vor.u32 %v1910_v25, %v1909_v45  ;;  %v3927_v39 = vmin.u32 %v2050_v62, %v5479_v47  ;;  %v1917_v9 = vsel %vm1915_vm8, %v1905_v27, 2102212464  ;;  %v1920_v44 = vsel %vm1912_vm6, %v1899_v11, %v1902_v20 }
 0x1a3   : > { %v1921_v30 = vsel %vm1915_vm8, %v1908_v15, 920167782  ;;  %v1747_v21 = vor.u32 %v1746_v43, %v1745_v32  ;;  %vm1913_vm9 = vcmp.lt.s32.totalorder %v1893_v61, 2  ;;  %v1924_v12 = vsel %vm1912_vm6, %v1902_v20, %v1905_v27 }
 0x1a4   : > { %v1922_v59 = vsel %vm1914_vm7, %v1905_v27, %v1921_v30  ;;  %v2052_v63 = vclz %v3927_v39  ;;  %v1916_v50 = vsel %vm1912_vm6, %v1896_v10, %v1899_v11  ;;  %v1925_v29 = vsel %vm1915_vm8, %v1911_v28, 1326507024 }
 0x1a5   : > { %v1923_v5 = vsel %vm1913_vm9, %v1920_v44, %v1922_v59  ;;  %v1918_v18 = vsel %vm1914_vm7, %v1902_v20, %v1917_v9  ;;  %v1926_v23 = vsel %vm1914_vm7, %v1908_v15, %v1925_v29  ;;  %v6865_v26 = vshll.u32 %v5297_v3, %v5399_v0 }
 0x1a6   : > { %v5489_v25 = vmul.u32.u64.low %v5468_v58, %v1923_v5  ;;  %v5490_v45 = vmul.u32.u64.high %v5468_v58, %v1923_v5, %v5489_v25  ;;  %v1752_v43 = vand.u32 2147483647, %v1751_v1  ;;  %v1927_v32 = vsel %vm1913_vm9, %v1924_v12, %v1926_v23 }
 0x1a7   : > { %v1539_v60 = vor.u32 %v1538_v35, %v6865_v26  ;;  %v2202_v14 = vadd.s32 1, %v3934_v38  ;;  %v1544_v10 = vand.u32 2147483647, %v5459_v55  ;;  %v3928_v57 = vadd.s32 4294967294, %v2052_v63  ;;  %v1406_v55 = vpop.f32.mrf.mxu1 }
 0x1a8   : > { %v5499_v28 = vmul.u32.u64.low %v5468_v58, %v1927_v32  ;;  %v5500_v13 = vmul.u32.u64.high %v5468_v58, %v1927_v32, %v5499_v28  ;;  %v1860_v15 = vxor.u32 2147483648, %v5461_v52  ;;  %v1754_v11 = vcvt.s32.f32 %v1747_v21 }
 0x1a9   : > { %v1919_v20 = vsel %vm1913_vm9, %v1916_v50, %v1918_v18  ;;  %vm2203_vm10 = vcmp.gt.s32.totalorder %v2202_v14, 0  ;;  %vm6836_vm11 = vcmp.lt.s32.totalorder %v5071_v8, 0  ;;  %v1938_v3 = vadd.s32 1, %v5490_v45 }
 0x1aa   : > { %v6866_v1 = vand.u32 2147483647, %v5444_v2  ;;  %v2204_v35 = vsel %vm2203_vm10, %v2202_v14, 0  ;;  %v6867_v38 = vxor.u32 2147483648, %v5414_v41  ;;  %v1546_v62 = vcvt.s32.f32 %v1539_v60 }
 0x1ab   : > { %vm6818_vm12 = vcmp.lt.s32.totalorder %v5100_v51, 0  ;;  %v5516_v61 = vmul.f32 %v1754_v11, %v1752_v43  ;;  %vm3929_vm13 = vcmp.lt.s32.totalorder %v3928_v57, 0  ;;  %v1935_v39 = vmul.u32 %v5468_v58, %v1919_v20 }
 0x1ac   : > { %v2199_v0 = vand.u32 8388607, %v6866_v1  ;;  %v5513_v27 = vsel %vm6836_vm11, %v6867_v38, %v5414_v41  ;;  %vm1937_vm14 = vc.u32 %v5500_v13, %v5489_v25  ;;  %v2206_v9 = vand.u32 31, %v2204_v35 }
 0x1ad   : > { %v5521_v44 = vmul.f32 %v1546_v62, %v1544_v10  ;;  %v5526_v30 = vsel %vm6818_vm12, %v1860_v15, %v5461_v52  ;;  %v1939_v41 = vsel %vm1937_vm14, %v1938_v3, %v5490_v45  ;;  %v5530_v21 = vadd.f32 %v1406_v55, %v5291_v22 }
 0x1ae   : > { %v5534_v59 = vadd.s32 %v5429_v17, %v5439_v4  ;;  %v1940_v58 = vadd.s32 %v1939_v41, %v1935_v39  ;;  %v2200_v12 = vor.u32 8388608, %v2199_v0  ;;  %v2207_v63 = vsub.s32 32, %v2206_v9 }
 0x1af   : > { %v1756_v50 = vxor.u32 2147483648, %v5516_v61  ;;  %v5537_v5 = vsel %vm3929_vm13, 0, %v3928_v57  ;;  %v2205_v29 = vshrl.u32 %v2204_v35, 5  ;;  %v2209_v52 = vshll.u32 %v6864_v37, %v2206_v9 }
 0x1b0   : > { %v1941_v18 = vadd.s32 536870912, %v1940_v58  ;;  %v2210_v23 = vshrl.u32 %v6861_v7, %v2207_v63  ;;  %v2212_v22 = vshll.u32 %v6861_v7, %v2206_v9  ;;  %v2213_v45 = vshrl.u32 %v6856_v40, %v2207_v63 }
 0x1b1   : > { %v2215_v17 = vshll.u32 %v6856_v40, %v2206_v9  ;;  %v2216_v4 = vshrl.u32 %v6857_v42, %v2207_v63  ;;  %v2218_v26 = vshll.u32 %v6857_v42, %v2206_v9  ;;  %v2219_v60 = vshrl.u32 %v6862_v56, %v2207_v63 }
 0x1b2   : > { %vm6835_vm15 = vcmp.lt.s32.totalorder %v5130_v16, 0  ;;  %v2060_v43 = vsub.s32 4294967266, %v5537_v5  ;;  %v5549_v32 = vshrl.u32 %v1941_v18, 30  ;;  %v2211_v14 = vor.u32 %v2210_v23, %v2209_v52 }
 0x1b3   : > { %v2214_v10 = vor.u32 %v2213_v45, %v2212_v22  ;;  %v2217_v57 = vor.u32 %v2216_v4, %v2215_v17  ;;  %v2220_v28 = vor.u32 %v2219_v60, %v2218_v26  ;;  %v2221_v15 = vshll.u32 %v6862_v56, %v2206_v9  ;;  %v4300_v26 = vpop.f32.mrf.mxu1 }
 0x1b4   : > { %6868 = vst [vmem:[#allocation9_spill] sm:$0xff] %v5549_v32  ;;  %v2222_v11 = vshrl.u32 %v6863_v49, %v2207_v63  ;;  %v6869_v20 = vand.u32 2147483647, %v5100_v51  ;;  %v6870_v3 = vmov 0  ;;  %v2056_v1 = vsub.s32 32, %v5537_v5 }
 0x1b5   : > { %v1943_v0 = vshll.u32 %v5549_v32, 30  ;;  %v2208_v35 = vshrl.u32 %v6864_v37, %v2207_v63  ;;  %v2240_v55 = vshll.u32 %v2200_v12, 8  ;;  %v6873_v38 = vand.u32 2147483647, %v5130_v16 }
 0x1b6   : > { %vm5555_vm1 = vcmp.le.f32.partialorder %v6869_v20, 0.7853982  ;;  %v2223_v39 = vor.u32 %v2222_v11, %v2221_v15  ;;  %vm2224_vm3 = vcmp.lt.s32.totalorder %v2205_v29, 1  ;;  %vm2226_vm4 = vcmp.lt.s32.totalorder %v2205_v29, 3 }
 0x1b7   : > { %v6871_v3 = vsel %vm5555_vm1, 4294967295, %v6870_v3  ;;  %vm5564_vm2 = vcmp.le.f32.partialorder %v6873_v38, 0.7853982  ;;  %vm2227_vm5 = vcmp.lt.s32.totalorder %v2205_v29, 4  ;;  %v5568_v9 = vsub.s32 %v1940_v58, %v1943_v0 }
 0x1b8   : > { %6872 = vst [vmem:[#allocation10_spill] sm:$0xff] %v6871_v3  ;;  %v2229_v41 = vsel %vm2227_vm5, %v2217_v57, 2102212464  ;;  %v2232_v52 = vsel %vm2224_vm3, %v2211_v14, %v2214_v10  ;;  %v2233_v18 = vsel %vm2227_vm5, %v2220_v28, 920167782  ;;  %v2061_v23 = vadd.s32 127, %v2060_v43 }
 0x1b9   : > { %vm2225_vm6 = vcmp.lt.s32.totalorder %v2205_v29, 2  ;;  %v2234_v63 = vsel %vm2226_vm4, %v2217_v57, %v2233_v18  ;;  %v2236_v12 = vsel %vm2224_vm3, %v2214_v10, %v2217_v57  ;;  %v1946_v22 = vsub.s32 0, %v5568_v9 }
 0x1ba   : > { %v2228_v45 = vsel %vm2224_vm3, %v2208_v35, %v2211_v14  ;;  %v2235_v17 = vsel %vm2225_vm6, %v2232_v52, %v2234_v63  ;;  %v2237_v4 = vsel %vm2227_vm5, %v2223_v39, 1326507024  ;;  %vm1466_vm7 = vcmp.lt.s32.totalorder %v5078_v33, 0 }
 0x1bb   : > { %v2230_v58 = vsel %vm2226_vm4, %v2214_v10, %v2229_v41  ;;  %v2238_v60 = vsel %vm2226_vm4, %v2220_v28, %v2237_v4  ;;  %v5576_v15 = vmul.u32.u64.low %v2240_v55, %v2235_v17  ;;  %v5577_v11 = vmul.u32.u64.high %v2240_v55, %v2235_v17, %v5576_v15 }
 0x1bc   : > { %v3923_v43 = vmin.u32 %v1946_v22, %v5568_v9  ;;  %v2239_v57 = vsel %vm2225_vm6, %v2236_v12, %v2238_v60  ;;  %v6783_v20 = vand.u32 2147483647, %v5530_v21  ;;  %v2091_v14 = vand.u32 2139095040, %v5530_v21  ;;  %v1418_v22 = vpop.f32.mrf.mxu1 }
 0x1bd   : > { %v1757_v0 = vsel %vm6835_vm15, %v1756_v50, %v5516_v61  ;;  %v5586_v35 = vmul.u32.u64.low %v2240_v55, %v2239_v57  ;;  %v5587_v38 = vmul.u32.u64.high %v2240_v55, %v2239_v57, %v5586_v35  ;;  %v5590_v10 = vadd.f32 %v4300_v26, %v5295_v36 }
 0x1be   : > { %v2062_v28 = vshll.u32 %v2061_v23, 23  ;;  %v1948_v39 = vclz %v3923_v43  ;;  %v2231_v41 = vsel %vm2225_vm6, %v2228_v45, %v2230_v58  ;;  %v2092_v52 = vshrl.u32 %v2091_v14, 23 }
 0x1bf   : > { %6876 = vst [vmem:[#allocation11_spill] sm:$0xff] %v5590_v10  ;;  %v1548_v18 = vxor.u32 2147483648, %v5521_v44  ;;  %v1864_v63 = vsel %vm5555_vm1, %v5100_v51, %v5526_v30  ;;  %v2058_v61 = vshrl.u32 %v5534_v59, %v2056_v1  ;;  %v2250_v50 = vadd.s32 1, %v5577_v11 }
 0x1c0   : > { %v1760_v36 = vsel %vm5564_vm2, %v5130_v16, %v1757_v0  ;;  %v2057_v29 = vshll.u32 %v5479_v47, %v5537_v5  ;;  %v3930_v23 = vadd.s32 4294967169, %v2092_v52  ;;  %v2095_v12 = vand.u32 8388607, %v6783_v20 }
 0x1c1   : > { %v3924_v45 = vadd.s32 4294967294, %v1948_v39  ;;  %v2247_v17 = vmul.u32 %v2240_v55, %v2231_v41  ;;  %vm2249_vm8 = vc.u32 %v5587_v38, %v5576_v15  ;;  %v2403_v30 = vand.u32 2139095040, %v5590_v10 }
 0x1c2   : > { %4520 = vcosq.f32 %v1864_v63  ;;  %v5609_v59 = vor.u32 4788187, %v2062_v28  ;;  %v2251_v1 = vsel %vm2249_vm8, %v2250_v50, %v5577_v11  ;;  %v2098_v4 = vadd.s32 1, %v3930_v23 }
 0x1c3   : > { %4522 = vsinq.f32 %v1864_v63  ;;  %v5612_v26 = vor.u32 %v2058_v61, %v2057_v29  ;;  %v2252_v47 = vadd.s32 %v2251_v1, %v2247_v17  ;;  %v5615_v5 = vadd.f32 %v1418_v22, %v5304_v46 }
 0x1c4   : > { %v5620_v55 = vsel %vm1466_vm7, %v1548_v18, %v5521_v44  ;;  %4524 = vcosq.f32 %v1760_v36  ;;  %v2096_v58 = vor.u32 8388608, %v2095_v12  ;;  %vm2099_vm9 = vcmp.gt.s32.totalorder %v2098_v4, 0 }
 0x1c5   : > { %vm3925_vm10 = vcmp.lt.s32.totalorder %v3924_v45, 0  ;;  %v2253_v60 = vadd.s32 536870912, %v2252_v47  ;;  %v2100_v43 = vsel %vm2099_vm9, %v2098_v4, 0  ;;  %v2404_v11 = vshrl.u32 %v2403_v30, 23 }
 0x1c6   : > { %4526 = vsinq.f32 %v1760_v36  ;;  %v5625_v14 = vadd.s32 %v5489_v25, %v5500_v13  ;;  %v2102_v46 = vand.u32 31, %v2100_v43  ;;  %v6784_v44 = vand.u32 2147483647, %v5590_v10 }
 0x1c7   : > { %v5628_v35 = vshrl.u32 %v2253_v60, 30  ;;  %v5632_v39 = vsel %vm3925_vm10, 0, %v3924_v45  ;;  %v5635_v41 = vadd.s32 %v5576_v15, %v5587_v38  ;;  %v5637_v18 = vshll.u32 %v2096_v58, 8 }
 0x1c8   : > { %v2103_v52 = vsub.s32 32, %v2102_v46  ;;  %v2101_v13 = vshrl.u32 %v2100_v43, 5  ;;  %v2105_v63 = vshll.u32 %v6864_v37, %v2102_v46  ;;  %v3942_v61 = vadd.s32 4294967169, %v2404_v11 }
 0x1c9   : > { %6877 = vst [vmem:[#allocation12_spill] sm:$0xff] %v5628_v35  ;;  %v2255_v25 = vshll.u32 %v5628_v35, 30  ;;  %v2108_v36 = vshll.u32 %v6861_v7, %v2102_v46  ;;  %v2111_v29 = vshll.u32 %v6856_v40, %v2102_v46  ;;  %v2114_v23 = vshll.u32 %v6857_v42, %v2102_v46 }
 0x1ca   : > { %v2106_v50 = vshrl.u32 %v6861_v7, %v2103_v52  ;;  %v2109_v15 = vshrl.u32 %v6856_v40, %v2103_v52  ;;  %v2112_v38 = vshrl.u32 %v6857_v42, %v2103_v52  ;;  %v2115_v22 = vshrl.u32 %v6862_v56, %v2103_v52 }
 0x1cb   : > { %v5645_v12 = vsub.s32 %v2252_v47, %v2255_v25  ;;  %v2104_v45 = vshrl.u32 %v6864_v37, %v2103_v52  ;;  %v2117_v30 = vshll.u32 %v6862_v56, %v2102_v46  ;;  %v2118_v1 = vshrl.u32 %v6863_v49, %v2103_v52 }
 0x1cc   : > { %v2107_v17 = vor.u32 %v2106_v50, %v2105_v63  ;;  %v2110_v58 = vor.u32 %v2109_v15, %v2108_v36  ;;  %v2113_v60 = vor.u32 %v2112_v38, %v2111_v29  ;;  %v2116_v43 = vor.u32 %v2115_v22, %v2114_v23 }
 0x1cd   : > { %v2258_v4 = vsub.s32 0, %v5645_v12  ;;  %v2119_v47 = vor.u32 %v2118_v1, %v2117_v30  ;;  %vm2120_vm13 = vcmp.lt.s32.totalorder %v2101_v13, 1  ;;  %v5656_v11 = vand.u32 8388607, %v6784_v44 }
 0x1ce   : > { %v2410_v25 = vadd.s32 1, %v3942_v61  ;;  %vm2121_vm14 = vcmp.lt.s32.totalorder %v2101_v13, 2  ;;  %vm2123_vm3 = vcmp.lt.s32.totalorder %v2101_v13, 4  ;;  %v2124_v46 = vsel %vm2120_vm13, %v2104_v45, %v2107_v17 }
 0x1cf   : > { %v5658_v20 = vpop.eup %4520  ;;  %v3935_v63 = vmin.u32 %v2258_v4, %v5645_v12  ;;  %vm2122_vm4 = vcmp.lt.s32.totalorder %v2101_v13, 3  ;;  %v2125_v50 = vsel %vm2123_vm3, %v2113_v60, 2102212464  ;;  %v2128_v36 = vsel %vm2120_vm13, %v2107_v17, %v2110_v58 }
 0x1d0   : > { %6878 = vst [vmem:[#allocation13_spill] sm:$0xff] %v5658_v20  ;;  %v5662_v52 = vpop.eup %4522  ;;  %v2129_v29 = vsel %vm2123_vm3, %v2116_v43, 920167782  ;;  %v2126_v38 = vsel %vm2122_vm4, %v2110_v58, %v2125_v50  ;;  %v2132_v22 = vsel %vm2120_vm13, %v2110_v58, %v2113_v60  ;;  %v1956_v30 = vsub.s32 4294967266, %v5632_v39 }
 0x1d1   : > { %6879 = vst [vmem:[#allocation14_spill] sm:$0xff] %v5662_v52  ;;  %v5665_v23 = vpop.eup %4524  ;;  %v2260_v15 = vclz %v3935_v63  ;;  %v2130_v61 = vsel %vm2122_vm4, %v2113_v60, %v2129_v29  ;;  %v2127_v1 = vsel %vm2121_vm14, %v2124_v46, %v2126_v38  ;;  %v2133_v4 = vsel %vm2123_vm3, %v2119_v47, 1326507024 }
 0x1d2   : > { %v2131_v45 = vsel %vm2121_vm14, %v2128_v36, %v2130_v61  ;;  %v2134_v57 = vsel %vm2122_vm4, %v2116_v43, %v2133_v4  ;;  %v2408_v60 = vor.u32 8388608, %v5656_v11  ;;  %vm2411_vm5 = vcmp.gt.s32.totalorder %v2410_v25, 0 }
 0x1d3   : > { %v5671_v44 = vpop.eup %4526  ;;  %v3936_v0 = vadd.s32 4294967294, %v2260_v15  ;;  %v5674_v17 = vmul.u32.u64.low %v5637_v18, %v2131_v45  ;;  %v5675_v28 = vmul.u32.u64.high %v5637_v18, %v2131_v45, %v5674_v17  ;;  %v2135_v58 = vsel %vm2121_vm14, %v2132_v22, %v2134_v57 }
 0x1d4   : > { %v5682_v46 = vmul.u32.u64.low %v5637_v18, %v2135_v58  ;;  %v5683_v47 = vmul.u32.u64.high %v5637_v18, %v2135_v58, %v5682_v46  ;;  %v2412_v50 = vsel %vm2411_vm5, %v2410_v25, 0  ;;  %v5685_v36 = vadd.s32 127, %v1956_v30 }
 0x1d5   : > { %vm3937_vm6 = vcmp.lt.s32.totalorder %v3936_v0, 0  ;;  %v2143_v29 = vmul.u32 %v5637_v18, %v2127_v1  ;;  %v2414_v15 = vand.u32 31, %v2412_v50  ;;  %v2146_v13 = vadd.s32 1, %v5675_v28 }
 0x1d6   : > { %v2263_v43 = vsel %vm3937_vm6, 0, %v3936_v0  ;;  %v2299_v57 = vand.u32 2139095040, %v5615_v5  ;;  %v5691_v22 = vshrl.u32 %v2412_v50, 5  ;;  %vm2145_vm8 = vc.u32 %v5683_v47, %v5674_v17 }
 0x1d7   : > { %v2264_v38 = vsub.s32 32, %v2263_v43  ;;  %v2268_v61 = vsub.s32 4294967266, %v2263_v43  ;;  %v2265_v11 = vshll.u32 %v5645_v12, %v2263_v43  ;;  %v2415_v45 = vsub.s32 32, %v2414_v15 }
 0x1d8   : > { %v2417_v4 = vshll.u32 %v6864_v37, %v2414_v15  ;;  %v2420_v0 = vshll.u32 %v6861_v7, %v2414_v15  ;;  %v2147_v18 = vsel %vm2145_vm8, %v2146_v13, %v5675_v28  ;;  %v2423_v12 = vshll.u32 %v6856_v40, %v2414_v15 }
 0x1d9   : > { %v2266_v25 = vshrl.u32 %v5635_v41, %v2264_v38  ;;  %v2269_v30 = vadd.s32 127, %v2268_v61  ;;  %v2418_v1 = vshrl.u32 %v6861_v7, %v2415_v45  ;;  %v2421_v58 = vshrl.u32 %v6856_v40, %v2415_v45 }
 0x1da   : > { %v2148_v43 = vadd.s32 %v2147_v18, %v2143_v29  ;;  %v2424_v63 = vshrl.u32 %v6857_v42, %v2415_v45  ;;  %v2426_v61 = vshll.u32 %v6857_v42, %v2414_v15  ;;  %v2427_v35 = vshrl.u32 %v6862_v56, %v2415_v45 }
 0x1db   : > { %v2267_v46 = vor.u32 %v2266_v25, %v2265_v11  ;;  %v2270_v50 = vshll.u32 %v2269_v30, 23  ;;  %v2419_v41 = vor.u32 %v2418_v1, %v2417_v4  ;;  %v2422_v38 = vor.u32 %v2421_v58, %v2420_v0 }
 0x1dc   : > { %v2149_v32 = vadd.s32 536870912, %v2148_v43  ;;  %v2425_v28 = vor.u32 %v2424_v63, %v2423_v12  ;;  %v2448_v13 = vshll.u32 %v2408_v60, 8  ;;  %v2428_v52 = vor.u32 %v2427_v35, %v2426_v61 }
 0x1dd   : > { %v2271_v20 = vor.u32 4788187, %v2270_v50  ;;  %v2429_v3 = vshll.u32 %v6862_v56, %v2414_v15  ;;  %v2430_v51 = vshrl.u32 %v6863_v49, %v2415_v45  ;;  %v2300_v11 = vshrl.u32 %v2299_v57, 23 }
 0x1de   : > { %v5707_v29 = vshrl.u32 %v2149_v32, 30  ;;  %v2416_v4 = vshrl.u32 %v6864_v37, %v2415_v45  ;;  %vm2432_vm9 = vcmp.lt.s32.totalorder %v5691_v22, 1  ;;  %v2274_v30 = vcvt.s32.f32 %v2267_v46 }
 0x1df   : > { %v2272_v25 = vand.u32 2147483647, %v2271_v20  ;;  %v2431_v0 = vor.u32 %v2430_v51, %v2429_v3  ;;  %vm2435_vm10 = vcmp.lt.s32.totalorder %v5691_v22, 4  ;;  %v2440_v63 = vsel %vm2432_vm9, %v2419_v41, %v2422_v38 }
 0x1e0   : > { %6880 = vst [vmem:[#allocation15_spill] sm:$0xff] %v5707_v29  ;;  %v2151_v35 = vshll.u32 %v5707_v29, 30  ;;  %vm2434_vm13 = vcmp.lt.s32.totalorder %v5691_v22, 3  ;;  %v2437_v60 = vsel %vm2435_vm10, %v2425_v28, 2102212464  ;;  %vm2433_vm14 = vcmp.lt.s32.totalorder %v5691_v22, 2 }
 0x1e1   : > { %v2441_v15 = vsel %vm2435_vm10, %v2428_v52, 920167782  ;;  %v2444_v20 = vsel %vm2432_vm9, %v2422_v38, %v2425_v28  ;;  %v2445_v57 = vsel %vm2435_vm10, %v2431_v0, 1326507024  ;;  %vm6807_vm3 = vcmp.lt.s32.totalorder %v5444_v2, 0 }
 0x1e2   : > { %v2442_v32 = vsel %vm2434_vm13, %v2425_v28, %v2441_v15  ;;  %v2275_v51 = vmul.f32 %v2274_v30, %v2272_v25  ;;  %v5720_v3 = vsub.s32 %v2148_v43, %v2151_v35  ;;  %v2436_v45 = vsel %vm2432_vm9, %v2416_v4, %v2419_v41  ;;  %v4303_v41 = vpop.f32.mrf.mxu1 }
 0x1e3   : > { %v2443_v18 = vsel %vm2433_vm14, %v2440_v63, %v2442_v32  ;;  %v2438_v1 = vsel %vm2434_vm13, %v2422_v38, %v2437_v60  ;;  %v2446_v58 = vsel %vm2434_vm13, %v2428_v52, %v2445_v57  ;;  %v6881_v50 = vsub.s32 32, %v5632_v39 }
 0x1e4   : > { %v5726_v12 = vmul.u32.u64.low %v2448_v13, %v2443_v18  ;;  %v5727_v46 = vmul.u32.u64.high %v2448_v13, %v2443_v18, %v5726_v12  ;;  %v2154_v28 = vsub.s32 0, %v5720_v3  ;;  %v2447_v43 = vsel %vm2433_vm14, %v2444_v20, %v2446_v58 }
 0x1e5   : > { %v1954_v61 = vshrl.u32 %v5625_v14, %v6881_v50  ;;  %v3938_v25 = vadd.s32 4294967169, %v2300_v11  ;;  %v1958_v4 = vshll.u32 %v5685_v36, 23  ;;  %v6882_v52 = vand.u32 2147483647, %v5615_v5 }
 0x1e6   : > { %v5737_v30 = vmul.u32.u64.low %v2448_v13, %v2447_v43  ;;  %v5738_v38 = vmul.u32.u64.high %v2448_v13, %v2447_v43, %v5737_v30  ;;  %v1953_v63 = vshll.u32 %v5568_v9, %v5632_v39  ;;  %v3931_v14 = vmin.u32 %v2154_v28, %v5720_v3 }
 0x1e7   : > { %v2303_v0 = vand.u32 8388607, %v6882_v52  ;;  %v2439_v35 = vsel %vm2433_vm14, %v2436_v45, %v2438_v1  ;;  %v2306_v60 = vadd.s32 1, %v3938_v25  ;;  %v2276_v15 = vxor.u32 2147483648, %v2275_v51 }
 0x1e8   : > { %v2458_v11 = vadd.s32 1, %v5727_v46  ;;  %v5749_v36 = vadd.f32 %v4303_v41, %v5313_v6  ;;  %v6884_v20 = vand.u32 2147483647, %v5609_v59  ;;  %v6885_v57 = vcvt.s32.f32 %v5612_v26 }
 0x1e9   : > { %v2304_v32 = vor.u32 8388608, %v2303_v0  ;;  %v5757_v9 = vor.u32 %v1954_v61, %v1953_v63  ;;  %v2156_v39 = vclz %v3931_v14  ;;  %vm2307_vm4 = vcmp.gt.s32.totalorder %v2306_v60, 0 }
 0x1ea   : > { %6883 = vst [vmem:[#allocation16_spill] sm:$0xff] %v5749_v36  ;;  %v5755_v18 = vmul.f32 %v6885_v57, %v6884_v20  ;;  %v5759_v22 = vor.u32 4788187, %v1958_v4  ;;  %v2455_v45 = vmul.u32 %v2448_v13, %v2439_v35  ;;  %vm2457_vm5 = vc.u32 %v5738_v38, %v5726_v12  ;;  %v1430_v57 = vpop.f32.mrf.mxu1 }
 0x1eb   : > { %v2308_v1 = vsel %vm2307_vm4, %v2306_v60, 0  ;;  %v2144_v6 = vadd.s32 %v5674_v17, %v5683_v47  ;;  %v3932_v58 = vadd.s32 4294967294, %v2156_v39  ;;  %v2459_v59 = vsel %vm2457_vm5, %v2458_v11, %v5727_v46 }
 0x1ec   : > { %v2310_v26 = vand.u32 31, %v2308_v1  ;;  %v5768_v50 = vsel %vm6807_vm3, %v2276_v15, %v2275_v51  ;;  %v2460_v61 = vadd.s32 %v2459_v59, %v2455_v45  ;;  %v5770_v28 = vshll.u32 %v2304_v32, 8 }
 0x1ed   : > { %v2611_v13 = vand.u32 2139095040, %v5749_v36  ;;  %vm3933_vm6 = vcmp.lt.s32.totalorder %v3932_v58, 0  ;;  %v5773_v43 = vshrl.u32 %v2308_v1, 5  ;;  %vm6808_vm4 = vcmp.lt.s32.totalorder %v5530_v21, 0 }
 0x1ee   : > { %v2311_v25 = vsub.s32 32, %v2310_v26  ;;  %v2313_v41 = vshll.u32 %v6864_v37, %v2310_v26  ;;  %v2159_v17 = vsel %vm3933_vm6, 0, %v3932_v58  ;;  %v2461_v47 = vadd.s32 536870912, %v2460_v61 }
 0x1ef   : > { %v2316_v46 = vshll.u32 %v6861_v7, %v2310_v26  ;;  %v2319_v4 = vshll.u32 %v6856_v40, %v2310_v26  ;;  %v2160_v30 = vsub.s32 32, %v2159_v17  ;;  %v2161_v51 = vshll.u32 %v5720_v3, %v2159_v17 }
 0x1f0   : > { %v2164_v52 = vsub.s32 4294967266, %v2159_v17  ;;  %v2322_v0 = vshll.u32 %v6857_v42, %v2310_v26  ;;  %v5780_v63 = vshrl.u32 %v2461_v47, 30  ;;  %v2314_v14 = vshrl.u32 %v6861_v7, %v2311_v25 }
 0x1f1   : > { %v2317_v35 = vshrl.u32 %v6856_v40, %v2311_v25  ;;  %v2320_v60 = vshrl.u32 %v6857_v42, %v2311_v25  ;;  %v2162_v15 = vshrl.u32 %v2144_v6, %v2160_v30  ;;  %v2323_v32 = vshrl.u32 %v6862_v56, %v2311_v25 }
 0x1f2   : > { %6886 = vst [vmem:[#allocation17_spill] sm:$0xff] %v5780_v63  ;;  %v2165_v11 = vadd.s32 127, %v2164_v52  ;;  %v2325_v20 = vshll.u32 %v6862_v56, %v2310_v26  ;;  %v2463_v3 = vshll.u32 %v5780_v63, 30  ;;  %v2315_v39 = vor.u32 %v2314_v14, %v2313_v41 }
 0x1f3   : > { %v2318_v45 = vor.u32 %v2317_v35, %v2316_v46  ;;  %v2321_v1 = vor.u32 %v2320_v60, %v2319_v4  ;;  %v2163_v58 = vor.u32 %v2162_v15, %v2161_v51  ;;  %v2324_v17 = vor.u32 %v2323_v32, %v2322_v0 }
 0x1f4   : > { %v2166_v59 = vshll.u32 %v2165_v11, 23  ;;  %v2326_v47 = vshrl.u32 %v6863_v49, %v2311_v25  ;;  %v5789_v29 = vsub.s32 %v2460_v61, %v2463_v3  ;;  %v2312_v6 = vshrl.u32 %v6864_v37, %v2311_v25 }
 0x1f5   : > { %v2612_v30 = vshrl.u32 %v2611_v13, 23  ;;  %v5793_v52 = vadd.f32 %v1430_v57, %v5335_v53  ;;  %v6888_v26 = vand.u32 2147483647, %v5444_v2  ;;  %v6889_v63 = vmov 0 }
 0x1f6   : > { %v2167_v41 = vor.u32 4788187, %v2166_v59  ;;  %v2327_v46 = vor.u32 %v2326_v47, %v2325_v20  ;;  %vm2328_vm9 = vcmp.lt.s32.totalorder %v5773_v43, 1  ;;  %vm2331_vm10 = vcmp.lt.s32.totalorder %v5773_v43, 4 }
 0x1f7   : > { %6887 = vst [vmem:[#allocation18_spill] sm:$0xff] %v5793_v52  ;;  %vm5797_vm8 = vcmp.le.f32.partialorder %v6888_v26, 0.7853982  ;;  %v2466_v61 = vsub.s32 0, %v5789_v29  ;;  %vm2329_vm13 = vcmp.lt.s32.totalorder %v5773_v43, 2  ;;  %v2336_v25 = vsel %vm2328_vm9, %v2315_v39, %v2318_v45 }
 0x1f8   : > { %v6890_v63 = vsel %vm5797_vm8, 4294967295, %v6889_v63  ;;  %v2333_v13 = vsel %vm2331_vm10, %v2321_v1, 2102212464  ;;  %v2170_v53 = vcvt.s32.f32 %v2163_v58  ;;  %vm2330_vm14 = vcmp.lt.s32.totalorder %v5773_v43, 3 }
 0x1f9   : > { %6891 = vst [vmem:[#allocation19_spill] sm:$0xff] %v6890_v63  ;;  %v2337_v4 = vsel %vm2331_vm10, %v2324_v17, 920167782  ;;  %v2340_v51 = vsel %vm2328_vm9, %v2318_v45, %v2321_v1  ;;  %v2168_v0 = vand.u32 2147483647, %v2167_v41  ;;  %v3943_v14 = vmin.u32 %v2466_v61, %v5789_v29 }
 0x1fa   : > { %v2338_v35 = vsel %vm2330_vm14, %v2321_v1, %v2337_v4  ;;  %v2341_v60 = vsel %vm2331_vm10, %v2327_v46, 1326507024  ;;  %v2332_v15 = vsel %vm2328_vm9, %v2312_v6, %v2315_v39  ;;  %v2334_v11 = vsel %vm2330_vm14, %v2318_v45, %v2333_v13 }
 0x1fb   : > { %v2339_v32 = vsel %vm2329_vm13, %v2336_v25, %v2338_v35  ;;  %v2342_v20 = vsel %vm2330_vm14, %v2324_v17, %v2341_v60  ;;  %v2468_v57 = vclz %v3943_v14  ;;  %v6798_v39 = vand.u32 2147483647, %v5749_v36 }
 0x1fc   : > { %v2343_v3 = vsel %vm2329_vm13, %v2340_v51, %v2342_v20  ;;  %v5812_v58 = vmul.u32.u64.low %v5770_v28, %v2339_v32  ;;  %v5813_v59 = vmul.u32.u64.high %v5770_v28, %v2339_v32, %v5812_v58  ;;  %v3950_v45 = vadd.s32 4294967169, %v2612_v30 }
 0x1fd   : > { %v5817_v47 = vmul.u32.u64.low %v5770_v28, %v2343_v3  ;;  %v5818_v26 = vmul.u32.u64.high %v5770_v28, %v2343_v3, %v5817_v47  ;;  %v2171_v17 = vmul.f32 %v2170_v53, %v2168_v0  ;;  %v3944_v6 = vadd.s32 4294967294, %v2468_v57 }
 0x1fe   : > { %v2335_v46 = vsel %vm2329_vm13, %v2332_v15, %v2334_v11  ;;  %v2618_v61 = vadd.s32 1, %v3950_v45  ;;  %v2507_v13 = vand.u32 2139095040, %v5793_v52  ;;  %v5832_v30 = vsel %vm5797_vm8, %v5444_v2, %v5768_v50 }
 0x1ff   : > { %vm3945_vm5 = vcmp.lt.s32.totalorder %v3944_v6, 0  ;;  %v2354_v53 = vadd.s32 1, %v5813_v59  ;;  %v2456_v4 = vadd.s32 %v5726_v12, %v5738_v38  ;;  %vm2353_vm6 = vc.u32 %v5818_v26, %v5812_v58  ;;  %v4306_v12 = vpop.f32.mrf.mxu1 }
 0x200   : > { %v2471_v51 = vsel %vm3945_vm5, 0, %v3944_v6  ;;  %v5841_v43 = vand.u32 8388607, %v6798_v39  ;;  %v2172_v0 = vxor.u32 2147483648, %v2171_v17  ;;  %v2351_v50 = vmul.u32 %v5770_v28, %v2335_v46 }
 0x201   : > { %v2472_v14 = vsub.s32 32, %v2471_v51  ;;  %v2476_v35 = vsub.s32 4294967266, %v2471_v51  ;;  %4528 = vcosq.f32 %v5832_v30  ;;  %v2355_v60 = vsel %vm2353_vm6, %v2354_v53, %v5813_v59 }
 0x202   : > { %vm2619_vm9 = vcmp.gt.s32.totalorder %v2618_v61, 0  ;;  %v2508_v15 = vshrl.u32 %v2507_v13, 23  ;;  %v2356_v32 = vadd.s32 %v2355_v60, %v2351_v50  ;;  %v2473_v57 = vshll.u32 %v5789_v29, %v2471_v51 }
 0x203   : > { %v2474_v38 = vshrl.u32 %v2456_v4, %v2472_v14  ;;  %v2477_v11 = vadd.s32 127, %v2476_v35  ;;  %v2620_v20 = vsel %vm2619_vm9, %v2618_v61, 0  ;;  %v2616_v3 = vor.u32 8388608, %v5841_v43 }
 0x204   : > { %v2622_v47 = vand.u32 31, %v2620_v20  ;;  %v6801_v45 = vand.u32 2147483647, %v5793_v52  ;;  %v5851_v28 = vsel %vm6808_vm4, %v2172_v0, %v2171_v17  ;;  %v2357_v59 = vadd.s32 536870912, %v2356_v32 }
 0x205   : > { %v2478_v6 = vshll.u32 %v2477_v11, 23  ;;  %v5854_v46 = vadd.f32 %v4306_v12, %v5337_v24  ;;  %v2475_v13 = vor.u32 %v2474_v38, %v2473_v57  ;;  %v2621_v53 = vshrl.u32 %v2620_v20, 5 }
 0x206   : > { %v2623_v4 = vsub.s32 32, %v2622_v47  ;;  %v3946_v61 = vadd.s32 4294967169, %v2508_v15  ;;  %v5856_v14 = vshrl.u32 %v2357_v59, 30  ;;  %v2625_v29 = vshll.u32 %v6864_v37, %v2622_v47 }
 0x207   : > { %v2628_v51 = vshll.u32 %v6861_v7, %v2622_v47  ;;  %v2631_v43 = vshll.u32 %v6856_v40, %v2622_v47  ;;  %v2479_v35 = vor.u32 4788187, %v2478_v6  ;;  %v2634_v60 = vshll.u32 %v6857_v42, %v2622_v47 }
 0x208   : > { %6892 = vst [vmem:[#allocation20_spill] sm:$0xff] %v5856_v14  ;;  %v2626_v17 = vshrl.u32 %v6861_v7, %v2623_v4  ;;  %v2629_v0 = vshrl.u32 %v6856_v40, %v2623_v4  ;;  %v2632_v24 = vshrl.u32 %v6857_v42, %v2623_v4  ;;  %v2359_v50 = vshll.u32 %v5856_v14, 30 }
 0x209   : > { %v2635_v15 = vshrl.u32 %v6862_v56, %v2623_v4  ;;  %v2637_v12 = vshll.u32 %v6862_v56, %v2622_v47  ;;  %v2638_v57 = vshrl.u32 %v6863_v49, %v2623_v4  ;;  %v6893_v6 = vand.u32 2147483647, %v5530_v21 }
 0x20a   : > { %v2627_v38 = vor.u32 %v2626_v17, %v2625_v29  ;;  %v2630_v11 = vor.u32 %v2629_v0, %v2628_v51  ;;  %v2633_v20 = vor.u32 %v2632_v24, %v2631_v43  ;;  %v2482_v1 = vcvt.s32.f32 %v2475_v13 }
 0x20b   : > { %vm5871_vm10 = vcmp.le.f32.partialorder %v6893_v6, 0.7853982  ;;  %v5875_v39 = vsub.s32 %v2356_v32, %v2359_v50  ;;  %v2636_v41 = vor.u32 %v2635_v15, %v2634_v60  ;;  %v2511_v25 = vand.u32 8388607, %v6801_v45 }
 0x20c   : > { %v2480_v14 = vand.u32 2147483647, %v2479_v35  ;;  %v2624_v47 = vshrl.u32 %v6864_v37, %v2623_v4  ;;  %v2639_v29 = vor.u32 %v2638_v57, %v2637_v12  ;;  %vm2643_vm13 = vcmp.lt.s32.totalorder %v2621_v53, 4 }
 0x20d   : > { %v2362_v51 = vsub.s32 0, %v5875_v39  ;;  %vm2640_vm14 = vcmp.lt.s32.totalorder %v2621_v53, 1  ;;  %vm2642_vm5 = vcmp.lt.s32.totalorder %v2621_v53, 3  ;;  %v2645_v43 = vsel %vm2643_vm13, %v2633_v20, 2102212464 }
 0x20e   : > { %v2644_v17 = vsel %vm2640_vm14, %v2624_v47, %v2627_v38  ;;  %v2646_v0 = vsel %vm2642_vm5, %v2630_v11, %v2645_v43  ;;  %v2648_v13 = vsel %vm2640_vm14, %v2627_v38, %v2630_v11  ;;  %v2649_v32 = vsel %vm2643_vm13, %v2636_v41, 920167782  ;;  %v5882_v24 = vpop.eup %4528 }
 0x20f   : > { %6896 = vst [vmem:[#allocation21_spill] sm:$0xff] %v5882_v24  ;;  %v3939_v50 = vmin.u32 %v2362_v51, %v5875_v39  ;;  %vm2641_vm6 = vcmp.lt.s32.totalorder %v2621_v53, 2  ;;  %v2650_v35 = vsel %vm2642_vm5, %v2633_v20, %v2649_v32  ;;  %v2652_v4 = vsel %vm2640_vm14, %v2630_v11, %v2633_v20 }
 0x210   : > { %v2651_v60 = vsel %vm2641_vm6, %v2648_v13, %v2650_v35  ;;  %v2653_v15 = vsel %vm2643_vm13, %v2639_v29, 1326507024  ;;  %v2656_v12 = vshll.u32 %v2616_v3, 8  ;;  %v6810_v57 = vand.u32 2147483647, %v5854_v46 }
 0x211   : > { %v5887_v6 = vmul.f32 %v2482_v1, %v2480_v14  ;;  %v2364_v47 = vclz %v3939_v50  ;;  %v2647_v45 = vsel %vm2641_vm6, %v2644_v17, %v2646_v0  ;;  %v2654_v38 = vsel %vm2642_vm5, %v2636_v41, %v2653_v15 }
 0x212   : > { %v2655_v43 = vsel %vm2641_vm6, %v2652_v4, %v2654_v38  ;;  %v5890_v63 = vmul.u32.u64.low %v2656_v12, %v2651_v60  ;;  %v5891_v24 = vmul.u32.u64.high %v2656_v12, %v2651_v60, %v5890_v63  ;;  %v2512_v51 = vor.u32 8388608, %v2511_v25 }
 0x213   : > { %v3940_v2 = vadd.s32 4294967294, %v2364_v47  ;;  %v5894_v32 = vmul.u32.u64.low %v2656_v12, %v2655_v43  ;;  %v5895_v11 = vmul.u32.u64.high %v2656_v12, %v2655_v43, %v5894_v32  ;;  %v2514_v20 = vadd.s32 1, %v3946_v61 }
 0x214   : > { %v6897_v3 = vand.u32 2147483647, %v5759_v22  ;;  %v6898_v1 = vcvt.s32.f32 %v5757_v9  ;;  %4530 = vsinq.f32 %v5832_v30  ;;  %v5908_v41 = vsel %vm5871_vm10, %v5530_v21, %v5851_v28  ;;  %v1442_v9 = vpop.f32.mrf.mxu1 }
 0x215   : > { %v2819_v25 = vand.u32 2139095040, %v5854_v46  ;;  %v2484_v53 = vxor.u32 2147483648, %v5887_v6  ;;  %v2352_v61 = vadd.s32 %v5812_v58, %v5818_v26  ;;  %vm3941_vm9 = vcmp.lt.s32.totalorder %v3940_v2, 0 }
 0x216   : > { %v5901_v14 = vmul.f32 %v6898_v1, %v6897_v3  ;;  %vm2515_vm13 = vcmp.gt.s32.totalorder %v2514_v20, 0  ;;  %v2367_v22 = vsel %vm3941_vm9, 0, %v3940_v2  ;;  %v2663_v29 = vmul.u32 %v2656_v12, %v2647_v45 }
 0x217   : > { %v2666_v30 = vadd.s32 1, %v5891_v24  ;;  %v2516_v17 = vsel %vm2515_vm13, %v2514_v20, 0  ;;  %v2368_v0 = vsub.s32 32, %v2367_v22  ;;  %v2372_v13 = vsub.s32 4294967266, %v2367_v22 }
 0x218   : > { %v5915_v50 = vshll.u32 %v2512_v51, 8  ;;  %v5919_v28 = vand.u32 8388607, %v6810_v57  ;;  %vm2665_vm14 = vc.u32 %v5895_v11, %v5890_v63  ;;  %v2518_v58 = vand.u32 31, %v2516_v17 }
 0x219   : > { %v2820_v26 = vshrl.u32 %v2819_v25, 23  ;;  %v5924_v35 = vadd.f32 %v1442_v9, %v5339_v19  ;;  %v2369_v2 = vshll.u32 %v5875_v39, %v2367_v22  ;;  %v2370_v45 = vshrl.u32 %v2352_v61, %v2368_v0 }
 0x21a   : > { %v2373_v4 = vadd.s32 127, %v2372_v13  ;;  %v2667_v60 = vsel %vm2665_vm14, %v2666_v30, %v5891_v24  ;;  %v5928_v12 = vshrl.u32 %v2516_v17, 5  ;;  %v2519_v47 = vsub.s32 32, %v2518_v58 }
 0x21b   : > { %v2668_v15 = vadd.s32 %v2667_v60, %v2663_v29  ;;  %v2521_v38 = vshll.u32 %v6864_v37, %v2518_v58  ;;  %v2371_v43 = vor.u32 %v2370_v45, %v2369_v2  ;;  %v2524_v32 = vshll.u32 %v6861_v7, %v2518_v58 }
 0x21c   : > { %v2374_v51 = vshll.u32 %v2373_v4, 23  ;;  %v2527_v20 = vshll.u32 %v6856_v40, %v2518_v58  ;;  %v2522_v3 = vshrl.u32 %v6861_v7, %v2519_v47  ;;  %v2525_v39 = vshrl.u32 %v6856_v40, %v2519_v47 }
 0x21d   : > { %v2669_v19 = vadd.s32 536870912, %v2668_v15  ;;  %v2530_v1 = vshll.u32 %v6857_v42, %v2518_v58  ;;  %vm6816_vm5 = vcmp.lt.s32.totalorder %v5590_v10, 0  ;;  %v2378_v25 = vcvt.s32.f32 %v2371_v43 }
 0x21e   : > { %v2375_v24 = vor.u32 4788187, %v2374_v51  ;;  %v2528_v61 = vshrl.u32 %v6857_v42, %v2519_v47  ;;  %v2531_v9 = vshrl.u32 %v6862_v56, %v2519_v47  ;;  %vm6817_vm6 = vcmp.lt.s32.totalorder %v5615_v5, 0 }
 0x21f   : > { %v5940_v22 = vshrl.u32 %v2669_v19, 30  ;;  %v2523_v29 = vor.u32 %v2522_v3, %v2521_v38  ;;  %v2526_v30 = vor.u32 %v2525_v39, %v2524_v32  ;;  %v2533_v17 = vshll.u32 %v6862_v56, %v2518_v58 }
 0x220   : > { %v2376_v0 = vand.u32 2147483647, %v2375_v24  ;;  %v2529_v13 = vor.u32 %v2528_v61, %v2527_v20  ;;  %v2532_v2 = vor.u32 %v2531_v9, %v2530_v1  ;;  %v2534_v45 = vshrl.u32 %v6863_v49, %v2519_v47 }
 0x221   : > { %6899 = vst [vmem:[#allocation22_spill] sm:$0xff] %v5940_v22  ;;  %v6900_v4 = vand.u32 2147483647, %v5590_v10  ;;  %v6901_v60 = vmov 0  ;;  %v2671_v43 = vshll.u32 %v5940_v22, 30  ;;  %v2520_v51 = vshrl.u32 %v6864_v37, %v2519_v47  ;;  %v5953_v32 = vpop.eup %4530 }
 0x222   : > { %vm2536_vm13 = vcmp.lt.s32.totalorder %v5928_v12, 1  ;;  %v3958_v38 = vadd.s32 4294967169, %v2820_v26  ;;  %v6904_v58 = vand.u32 2147483647, %v5615_v5  ;;  %v2379_v19 = vmul.f32 %v2378_v25, %v2376_v0 }
 0x223   : > { %vm5946_vm9 = vcmp.le.f32.partialorder %v6900_v4, 0.7853982  ;;  %v2535_v3 = vor.u32 %v2534_v45, %v2533_v17  ;;  %vm2538_vm0 = vcmp.lt.s32.totalorder %v5928_v12, 3  ;;  %vm2539_vm3 = vcmp.lt.s32.totalorder %v5928_v12, 4 }
 0x224   : > { %v6902_v60 = vsel %vm5946_vm9, 4294967295, %v6901_v60  ;;  %vm5957_vm14 = vcmp.le.f32.partialorder %v6904_v58, 0.7853982  ;;  %v5963_v39 = vsub.s32 %v2668_v15, %v2671_v43  ;;  %v2541_v47 = vsel %vm2539_vm3, %v2529_v13, 2102212464 }
 0x225   : > { %6903 = vst [vmem:[#allocation23_spill] sm:$0xff] %v6902_v60  ;;  %v2544_v26 = vsel %vm2536_vm13, %v2523_v29, %v2526_v30  ;;  %v2545_v1 = vsel %vm2539_vm3, %v2532_v2, 920167782  ;;  %v2380_v24 = vxor.u32 2147483648, %v2379_v19  ;;  %vm2537_vm4 = vcmp.lt.s32.totalorder %v5928_v12, 2 }
 0x226   : > { %v2546_v61 = vsel %vm2538_vm0, %v2529_v13, %v2545_v1  ;;  %v2548_v9 = vsel %vm2536_vm13, %v2526_v30, %v2529_v13  ;;  %v2674_v25 = vsub.s32 0, %v5963_v39  ;;  %v2540_v17 = vsel %vm2536_vm13, %v2520_v51, %v2523_v29 }
 0x227   : > { %v2547_v15 = vsel %vm2537_vm4, %v2544_v26, %v2546_v61  ;;  %v2549_v0 = vsel %vm2539_vm3, %v2535_v3, 1326507024  ;;  %v2542_v45 = vsel %vm2538_vm0, %v2526_v30, %v2541_v47  ;;  %v2485_v13 = vsel %vm6816_vm5, %v2484_v53, %v5887_v6 }
 0x228   : > { %v2550_v4 = vsel %vm2538_vm0, %v2532_v2, %v2549_v0  ;;  %v5976_v43 = vmul.u32.u64.low %v5915_v50, %v2547_v15  ;;  %v5977_v58 = vmul.u32.u64.high %v5915_v50, %v2547_v15, %v5976_v43  ;;  %v3951_v1 = vmin.u32 %v2674_v25, %v5963_v39 }
 0x229   : > { %v2551_v29 = vsel %vm2537_vm4, %v2548_v9, %v2550_v4  ;;  %v2824_v51 = vor.u32 8388608, %v5919_v28  ;;  %v2381_v30 = vsel %vm6817_vm6, %v2380_v24, %v2379_v19  ;;  %v2826_v47 = vadd.s32 1, %v3958_v38 }
 0x22a   : > { %v5992_v2 = vmul.u32.u64.low %v5915_v50, %v2551_v29  ;;  %v5993_v3 = vmul.u32.u64.high %v5915_v50, %v2551_v29, %v5992_v2  ;;  %4532 = vcosq.f32 %v5908_v41  ;;  %v2676_v26 = vclz %v3951_v1 }
 0x22b   : > { %v2543_v6 = vsel %vm2537_vm4, %v2540_v17, %v2542_v45  ;;  %v6809_v53 = vand.u32 2147483647, %v5924_v35  ;;  %4534 = vsinq.f32 %v5908_v41  ;;  %v6003_v28 = vsel %vm5946_vm9, %v5590_v10, %v2485_v13 }
 0x22c   : > { %v2562_v19 = vadd.s32 1, %v5977_v58  ;;  %vm2827_vm0 = vcmp.gt.s32.totalorder %v2826_v47, 0  ;;  %v6009_v38 = vsel %vm5957_vm14, %v5615_v5, %v2381_v30  ;;  %v2664_v12 = vadd.s32 %v5890_v63, %v5895_v11 }
 0x22d   : > { %v3952_v24 = vadd.s32 4294967294, %v2676_v26  ;;  %v2828_v61 = vsel %vm2827_vm0, %v2826_v47, 0  ;;  %v2559_v41 = vmul.u32 %v5915_v50, %v2543_v6  ;;  %vm2561_vm3 = vc.u32 %v5993_v3, %v5976_v43 }
 0x22e   : > { %v2830_v9 = vand.u32 31, %v2828_v61  ;;  %v6016_v25 = vshll.u32 %v2824_v51, 8  ;;  %v2563_v17 = vsel %vm2561_vm3, %v2562_v19, %v5977_v58  ;;  %v2715_v15 = vand.u32 2139095040, %v5924_v35 }
 0x22f   : > { %vm3953_vm4 = vcmp.lt.s32.totalorder %v3952_v24, 0  ;;  %v6022_v0 = vand.u32 8388607, %v6809_v53  ;;  %v2564_v11 = vadd.s32 %v2563_v17, %v2559_v41  ;;  %v6024_v45 = vshrl.u32 %v2828_v61, 5 }
 0x230   : > { %v2679_v63 = vsel %vm3953_vm4, 0, %v3952_v24  ;;  %v2831_v50 = vsub.s32 32, %v2830_v9  ;;  %v2833_v29 = vshll.u32 %v6864_v37, %v2830_v9  ;;  %v2836_v30 = vshll.u32 %v6861_v7, %v2830_v9 }
 0x231   : > { %v2680_v4 = vsub.s32 32, %v2679_v63  ;;  %v2681_v13 = vshll.u32 %v5963_v39, %v2679_v63  ;;  %v2684_v1 = vsub.s32 4294967266, %v2679_v63  ;;  %v2565_v51 = vadd.s32 536870912, %v2564_v11 }
 0x232   : > { %v2834_v58 = vshrl.u32 %v6861_v7, %v2831_v50  ;;  %v2837_v2 = vshrl.u32 %v6856_v40, %v2831_v50  ;;  %v2839_v6 = vshll.u32 %v6856_v40, %v2830_v9  ;;  %v2840_v19 = vshrl.u32 %v6857_v42, %v2831_v50 }
 0x233   : > { %v2682_v47 = vshrl.u32 %v2664_v12, %v2680_v4  ;;  %v2685_v26 = vadd.s32 127, %v2684_v1  ;;  %v6033_v24 = vshrl.u32 %v2565_v51, 30  ;;  %v2842_v41 = vshll.u32 %v6857_v42, %v2830_v9 }
 0x234   : > { %v2835_v61 = vor.u32 %v2834_v58, %v2833_v29  ;;  %v2838_v39 = vor.u32 %v2837_v2, %v2836_v30  ;;  %v2841_v53 = vor.u32 %v2840_v19, %v2839_v6  ;;  %v2843_v57 = vshrl.u32 %v6862_v56, %v2831_v50 }
 0x235   : > { %6907 = vst [vmem:[#allocation24_spill] sm:$0xff] %v6033_v24  ;;  %v2683_v17 = vor.u32 %v2682_v47, %v2681_v13  ;;  %v2686_v63 = vshll.u32 %v2685_v26, 23  ;;  %v2567_v22 = vshll.u32 %v6033_v24, 30  ;;  %v2845_v12 = vshll.u32 %v6862_v56, %v2830_v9 }
 0x236   : > { %v2846_v4 = vshrl.u32 %v6863_v49, %v2831_v50  ;;  %v2716_v1 = vshrl.u32 %v2715_v15, 23  ;;  %v2832_v51 = vshrl.u32 %v6864_v37, %v2831_v50  ;;  %v2844_v10 = vor.u32 %v2843_v57, %v2842_v41 }
 0x237   : > { %v2687_v60 = vor.u32 4788187, %v2686_v63  ;;  %vm2848_vm13 = vcmp.lt.s32.totalorder %v6024_v45, 1  ;;  %v6042_v29 = vpop.eup %4532  ;;  %v2690_v13 = vcvt.s32.f32 %v2683_v17  ;;  %v6044_v58 = vsub.s32 %v2564_v11, %v2567_v22 }
 0x238   : > { %v2847_v30 = vor.u32 %v2846_v4, %v2845_v12  ;;  %vm2851_vm0 = vcmp.lt.s32.totalorder %v6024_v45, 4  ;;  %v6047_v2 = vpop.eup %4534  ;;  %vm2849_vm3 = vcmp.lt.s32.totalorder %v6024_v45, 2  ;;  %v2856_v50 = vsel %vm2848_vm13, %v2835_v61, %v2838_v39 }
 0x239   : > { %v2688_v9 = vand.u32 2147483647, %v2687_v60  ;;  %v2853_v15 = vsel %vm2851_vm0, %v2841_v53, 2102212464  ;;  %v2570_v57 = vsub.s32 0, %v6044_v58  ;;  %vm2850_vm4 = vcmp.lt.s32.totalorder %v6024_v45, 3 }
 0x23a   : > { %v2857_v47 = vsel %vm2851_vm0, %v2844_v10, 920167782  ;;  %v2860_v22 = vsel %vm2848_vm13, %v2838_v39, %v2841_v53  ;;  %v2852_v26 = vsel %vm2848_vm13, %v2832_v51, %v2835_v61  ;;  %v2861_v60 = vsel %vm2851_vm0, %v2847_v30, 1326507024 }
 0x23b   : > { %v2691_v11 = vmul.f32 %v2690_v13, %v2688_v9  ;;  %v2858_v6 = vsel %vm2850_vm4, %v2841_v53, %v2857_v47  ;;  %vm6823_vm5 = vcmp.lt.s32.totalorder %v5275_v54, 0  ;;  %vm6824_vm6 = vcmp.lt.s32.totalorder %v5383_v34, 0 }
 0x23c   : > { %v3947_v19 = vmin.u32 %v2570_v57, %v6044_v58  ;;  %v2854_v41 = vsel %vm2850_vm4, %v2838_v39, %v2853_v15  ;;  %v2859_v17 = vsel %vm2849_vm3, %v2856_v50, %v2858_v6  ;;  %v2862_v63 = vsel %vm2850_vm4, %v2844_v10, %v2861_v60 }
 0x23d   : > { %v2692_v12 = vxor.u32 2147483648, %v2691_v11  ;;  %v2863_v4 = vsel %vm2849_vm3, %v2860_v22, %v2862_v63  ;;  %v6066_v13 = vmul.u32.u64.low %v6016_v25, %v2859_v17  ;;  %v6067_v61 = vmul.u32.u64.high %v6016_v25, %v2859_v17, %v6066_v13 }
 0x23e   : > { %v2572_v53 = vclz %v3947_v19  ;;  %v6071_v51 = vmul.u32.u64.low %v6016_v25, %v2863_v4  ;;  %v6072_v30 = vmul.u32.u64.high %v6016_v25, %v2863_v4, %v6071_v51  ;;  %v3954_v9 = vadd.s32 4294967169, %v2716_v1  ;;  %v4309_v1 = vpop.f32.mrf.mxu1 }
 0x23f   : > { %v1964_v39 = vxor.u32 2147483648, %v5901_v14  ;;  %4536 = vcosq.f32 %v6003_v28  ;;  %vm6822_vm13 = vcmp.lt.s32.totalorder %v5749_v36, 0  ;;  %v2855_v10 = vsel %vm2849_vm3, %v2852_v26, %v2854_v41 }
 0x240   : > { %4538 = vsinq.f32 %v6003_v28  ;;  %v6908_v15 = vand.u32 2147483647, %v5749_v36  ;;  %v6909_v50 = vmov 0  ;;  %v3948_v57 = vadd.s32 4294967294, %v2572_v53 }
 0x241   : > { %v2722_v47 = vadd.s32 1, %v3954_v9  ;;  %4540 = vcosq.f32 %v6009_v38  ;;  %v2693_v22 = vsel %vm6822_vm13, %v2692_v12, %v2691_v11  ;;  %v2560_v45 = vadd.s32 %v5976_v43, %v5993_v3 }
 0x242   : > { %vm6082_vm0 = vcmp.le.f32.partialorder %v6908_v15, 0.7853982  ;;  %v2874_v26 = vadd.s32 1, %v6067_v61  ;;  %vm3949_vm3 = vcmp.lt.s32.totalorder %v3948_v57, 0  ;;  %v2871_v28 = vmul.u32 %v6016_v25, %v2855_v10 }
 0x243   : > { %v6910_v50 = vsel %vm6082_vm0, 4294967295, %v6909_v50  ;;  %vm2873_vm4 = vc.u32 %v6072_v30, %v6066_v13  ;;  %v2720_v6 = vor.u32 8388608, %v6022_v0  ;;  %v2575_v60 = vsel %vm3949_vm3, 0, %v3948_v57 }
 0x244   : > { %6911 = vst [vmem:[#allocation25_spill] sm:$0xff] %v6910_v50  ;;  %v2875_v19 = vsel %vm2873_vm4, %v2874_v26, %v6067_v61  ;;  %vm2723_vm12 = vcmp.gt.s32.totalorder %v2722_v47, 0  ;;  %v6098_v41 = vadd.f32 %v4309_v1, %v5341_v31  ;;  %v2696_v43 = vsel %vm6082_vm0, %v5749_v36, %v2693_v22 }
 0x245   : > { %v2576_v3 = vsub.s32 32, %v2575_v60  ;;  %v2580_v11 = vsub.s32 4294967266, %v2575_v60  ;;  %v2876_v17 = vadd.s32 %v2875_v19, %v2871_v28  ;;  %v6912_v25 = vxor.u32 2147483648, %v5755_v18 }
 0x246   : > { %v6113_v63 = vsel %vm6824_vm6, %v1964_v39, %v5901_v14  ;;  %4542 = vsinq.f32 %v6009_v38  ;;  %v2724_v31 = vsel %vm2723_vm12, %v2722_v47, 0  ;;  %v2577_v12 = vshll.u32 %v6044_v58, %v2575_v60 }
 0x247   : > { %v6108_v0 = vsel %vm6823_vm5, %v6912_v25, %v5755_v18  ;;  %v2578_v4 = vshrl.u32 %v2560_v45, %v2576_v3  ;;  %v2581_v61 = vadd.s32 127, %v2580_v11  ;;  %v2877_v53 = vadd.s32 536870912, %v2876_v17  ;;  %v1454_v3 = vpop.f32.mrf.mxu1 }
 0x248   : > { %4544 = vcosq.f32 %v2696_v43  ;;  %v2726_v51 = vand.u32 31, %v2724_v31  ;;  %v6117_v9 = vshll.u32 %v2720_v6, 8  ;;  %v3027_v14 = vand.u32 2139095040, %v6098_v41 }
 0x249   : > { %v2579_v10 = vor.u32 %v2578_v4, %v2577_v12  ;;  %v2582_v15 = vshll.u32 %v2581_v61, 23  ;;  %v6120_v57 = vshrl.u32 %v2877_v53, 30  ;;  %v6123_v39 = vshrl.u32 %v2724_v31, 5 }
 0x24a   : > { %v2727_v38 = vsub.s32 32, %v2726_v51  ;;  %v2729_v58 = vshll.u32 %v6864_v37, %v2726_v51  ;;  %v2732_v47 = vshll.u32 %v6861_v7, %v2726_v51  ;;  %v2735_v26 = vshll.u32 %v6856_v40, %v2726_v51 }
 0x24b   : > { %6913 = vst [vmem:[#allocation26_spill] sm:$0xff] %v6120_v57  ;;  %v2583_v1 = vor.u32 4788187, %v2582_v15  ;;  %v2586_v22 = vcvt.s32.f32 %v2579_v10  ;;  %v2879_v45 = vshll.u32 %v6120_v57, 30  ;;  %v2738_v19 = vshll.u32 %v6857_v42, %v2726_v51 }
 0x24c   : > { %v2730_v28 = vshrl.u32 %v6861_v7, %v2727_v38  ;;  %v2733_v6 = vshrl.u32 %v6856_v40, %v2727_v38  ;;  %v2736_v60 = vshrl.u32 %v6857_v42, %v2727_v38  ;;  %v6133_v11 = vpop.eup %4536  ;;  %v2739_v12 = vshrl.u32 %v6862_v56, %v2727_v38 }
 0x24d   : > { %6914 = vst [vmem:[#allocation27_spill] sm:$0xff] %v6133_v11  ;;  %v2584_v25 = vand.u32 2147483647, %v2583_v1  ;;  %v6135_v31 = vsub.s32 %v2876_v17, %v2879_v45  ;;  %v2741_v4 = vshll.u32 %v6862_v56, %v2726_v51  ;;  %v6139_v61 = vpop.eup %4538  ;;  %v2742_v18 = vshrl.u32 %v6863_v49, %v2727_v38 }
 0x24e   : > { %6915 = vst [vmem:[#allocation28_spill] sm:$0xff] %v6139_v61  ;;  %v2731_v53 = vor.u32 %v2730_v28, %v2729_v58  ;;  %v2734_v10 = vor.u32 %v2733_v6, %v2732_v47  ;;  %v2737_v15 = vor.u32 %v2736_v60, %v2735_v26  ;;  %v6142_v57 = vpop.eup %4540  ;;  %4546 = vsinq.f32 %v2696_v43 }
 0x24f   : > { %6916 = vst [vmem:[#allocation29_spill] sm:$0xff] %v6142_v57  ;;  %vm6834_vm12 = vcmp.lt.s32.totalorder %v5793_v52, 0  ;;  %v2882_v1 = vsub.s32 0, %v6135_v31  ;;  %v2740_v17 = vor.u32 %v2739_v12, %v2738_v19  ;;  %v6147_v45 = vadd.f32 %v1454_v3, %v5343_v48 }
 0x250   : > { %v2587_v50 = vmul.f32 %v2586_v22, %v2584_v25  ;;  %v2743_v51 = vor.u32 %v2742_v18, %v2741_v4  ;;  %vm2744_vm3 = vcmp.lt.s32.totalorder %v6123_v39, 1  ;;  %v6917_v58 = vand.u32 2147483647, %v6098_v41 }
 0x251   : > { %v3959_v26 = vmin.u32 %v2882_v1, %v6135_v31  ;;  %vm2747_vm4 = vcmp.lt.s32.totalorder %v6123_v39, 4  ;;  %v2752_v43 = vsel %vm2744_vm3, %v2731_v53, %v2734_v10  ;;  %v3028_v28 = vshrl.u32 %v3027_v14, 23 }
 0x252   : > { %v3031_v47 = vand.u32 8388607, %v6917_v58  ;;  %vm2746_vm13 = vcmp.lt.s32.totalorder %v6123_v39, 3  ;;  %v2753_v6 = vsel %vm2747_vm4, %v2740_v17, 920167782  ;;  %v2756_v48 = vsel %vm2744_vm3, %v2734_v10, %v2737_v15 }
 0x253   : > { %v2757_v18 = vsel %vm2747_vm4, %v2743_v51, 1326507024  ;;  %v6159_v22 = vpop.eup %4542  ;;  %v6919_v60 = vand.u32 2147483647, %v5793_v52  ;;  %v6920_v19 = vmov 0  ;;  %v2884_v3 = vclz %v3959_v26 }
 0x254   : > { %6918 = vst [vmem:[#allocation30_spill] sm:$0xff] %v6159_v22  ;;  %vm2745_vm6 = vcmp.lt.s32.totalorder %v6123_v39, 2  ;;  %v2749_v25 = vsel %vm2747_vm4, %v2737_v15, 2102212464  ;;  %v2754_v14 = vsel %vm2746_vm13, %v2737_v15, %v2753_v6  ;;  %v2588_v12 = vxor.u32 2147483648, %v2587_v50 }
 0x255   : > { %vm6163_vm5 = vcmp.le.f32.partialorder %v6919_v60, 0.7853982  ;;  %v2728_v4 = vshrl.u32 %v6864_v37, %v2727_v38  ;;  %v2755_v1 = vsel %vm2745_vm6, %v2752_v43, %v2754_v14  ;;  %v2758_v51 = vsel %vm2746_vm13, %v2740_v17, %v2757_v18  ;;  %v6175_v58 = vpop.eup %4544 }
 0x256   : > { %v6921_v19 = vsel %vm6163_vm5, 4294967295, %v6920_v19  ;;  %6923 = vst [vmem:[#allocation32_spill] sm:$0xff] %v6175_v58  ;;  %v2872_v26 = vadd.s32 %v6066_v13, %v6072_v30  ;;  %v3960_v60 = vadd.s32 4294967294, %v2884_v3  ;;  %v2759_v36 = vsel %vm2745_vm6, %v2756_v48, %v2758_v51 }
 0x257   : > { %6922 = vst [vmem:[#allocation31_spill] sm:$0xff] %v6921_v19  ;;  %v3966_v11 = vadd.s32 4294967169, %v3028_v28  ;;  %v2748_v15 = vsel %vm2744_vm3, %v2728_v4, %v2731_v53  ;;  %v2750_v38 = vsel %vm2746_vm13, %v2734_v10, %v2749_v25  ;;  %v2589_v30 = vsel %vm6834_vm12, %v2588_v12, %v2587_v50 }
 0x258   : > { %v6186_v43 = vmul.u32.u64.low %v6117_v9, %v2759_v36  ;;  %v6187_v6 = vmul.u32.u64.high %v6117_v9, %v2759_v36, %v6186_v43  ;;  %vm3961_vm4 = vcmp.lt.s32.totalorder %v3960_v60, 0  ;;  %v3032_v48 = vor.u32 8388608, %v3031_v47 }
 0x259   : > { %v6190_v17 = vmul.u32.u64.low %v6117_v9, %v2755_v1  ;;  %v6191_v18 = vmul.u32.u64.high %v6117_v9, %v2755_v1, %v6190_v17  ;;  %v3034_v13 = vadd.s32 1, %v3966_v11  ;;  %v2887_v28 = vsel %vm3961_vm4, 0, %v3960_v60 }
 0x25a   : > { %v2923_v53 = vand.u32 2139095040, %v6147_v45  ;;  %v2888_v3 = vsub.s32 32, %v2887_v28  ;;  %v2892_v10 = vsub.s32 4294967266, %v2887_v28  ;;  %v2751_v36 = vsel %vm2745_vm6, %v2748_v15, %v2750_v38 }
 0x25b   : > { %vm3035_vm13 = vcmp.gt.s32.totalorder %v3034_v13, 0  ;;  %vm2769_vm3 = vc.u32 %v6187_v6, %v6190_v17  ;;  %v2889_v4 = vshll.u32 %v6135_v31, %v2887_v28  ;;  %v2770_v47 = vadd.s32 1, %v6191_v18  ;;  %v6204_v1 = vpop.eup %4546 }
 0x25c   : > { %v3036_v25 = vsel %vm3035_vm13, %v3034_v13, 0  ;;  %v2924_v11 = vshrl.u32 %v2923_v53, 23  ;;  %v2890_v50 = vshrl.u32 %v2872_v26, %v2888_v3  ;;  %v2893_v12 = vadd.s32 127, %v2892_v10  ;;  %6924 = vst [vmem:[#allocation33_spill] sm:$0xff] %v6204_v1 }
 0x25d   : > { %v2592_v39 = vsel %vm6163_vm5, %v5793_v52, %v2589_v30  ;;  %v2767_v51 = vmul.u32 %v6117_v9, %v2751_v36  ;;  %v3038_v60 = vand.u32 31, %v3036_v25  ;;  %v6210_v15 = vshll.u32 %v3032_v48, 8  ;;  %v6929_v52 = vld [vmem:[#allocation2_spill] sm:$0xff] }
 0x25e   : > { %v2891_v38 = vor.u32 %v2890_v50, %v2889_v4  ;;  %v2894_v43 = vshll.u32 %v2893_v12, 23  ;;  %v2771_v13 = vsel %vm2769_vm3, %v2770_v47, %v6191_v18  ;;  %v3037_v31 = vshrl.u32 %v3036_v25, 5 }
 0x25f   : > { %v2772_v26 = vadd.s32 %v2771_v13, %v2767_v51  ;;  %v3039_v28 = vsub.s32 32, %v3038_v60  ;;  %v3041_v53 = vshll.u32 %v6864_v37, %v3038_v60  ;;  %v3962_v3 = vadd.s32 4294967169, %v2924_v11 }
 0x260   : > { %v2895_v10 = vor.u32 4788187, %v2894_v43  ;;  %v2898_v14 = vcvt.s32.f32 %v2891_v38  ;;  %v3044_v58 = vshll.u32 %v6861_v7, %v3038_v60  ;;  %v3047_v30 = vshll.u32 %v6856_v40, %v3038_v60 }
 0x261   : > { %v2773_v9 = vadd.s32 536870912, %v2772_v26  ;;  %v3042_v48 = vshrl.u32 %v6861_v7, %v3039_v28  ;;  %v3045_v36 = vshrl.u32 %v6856_v40, %v3039_v28  ;;  %v3050_v4 = vshll.u32 %v6857_v42, %v3038_v60 }
 0x262   : > { %v2896_v18 = vand.u32 2147483647, %v2895_v10  ;;  %v3048_v25 = vshrl.u32 %v6857_v42, %v3039_v28  ;;  %v3051_v50 = vshrl.u32 %v6862_v56, %v3039_v28  ;;  %v3053_v11 = vshll.u32 %v6862_v56, %v3038_v60 }
 0x263   : > { %v6222_v12 = vshrl.u32 %v2773_v9, 30  ;;  %v3043_v47 = vor.u32 %v3042_v48, %v3041_v53  ;;  %v3046_v51 = vor.u32 %v3045_v36, %v3044_v58  ;;  %v3054_v38 = vshrl.u32 %v6863_v49, %v3039_v28 }
 0x264   : > { %vm6843_vm6 = vcmp.lt.s32.totalorder %v5854_v46, 0  ;;  %v2899_v43 = vmul.f32 %v2898_v14, %v2896_v18  ;;  %v3049_v13 = vor.u32 %v3048_v25, %v3047_v30  ;;  %v3052_v1 = vor.u32 %v3051_v50, %v3050_v4 }
 0x265   : > { %6925 = vst [vmem:[#allocation34_spill] sm:$0xff] %v6222_v12  ;;  %v6926_v19 = vand.u32 2147483647, %v5078_v33  ;;  %v1550_v61 = vsub.s32 4, %v6929_v52  ;;  %v2775_v60 = vshll.u32 %v6222_v12, 30  ;;  %v3055_v9 = vor.u32 %v3054_v38, %v3053_v11 }
 0x266   : > { %vm3056_vm13 = vcmp.lt.s32.totalorder %v3037_v31, 1  ;;  %vm3059_vm3 = vcmp.lt.s32.totalorder %v3037_v31, 4  ;;  %v3040_v58 = vshrl.u32 %v6864_v37, %v3039_v28  ;;  %vm3057_vm12 = vcmp.lt.s32.totalorder %v3037_v31, 2 }
 0x267   : > { %vm6228_vm4 = vcmp.le.f32.partialorder %v6926_v19, 0.7853982  ;;  %v3061_v53 = vsel %vm3059_vm3, %v3049_v13, 2102212464  ;;  %v3064_v14 = vsel %vm3056_vm13, %v3043_v47, %v3046_v51  ;;  %v6930_v30 = vand.u32 2147483647, %v5854_v46 }
 0x268   : > { %v6931_v48 = vmov 0  ;;  %v6241_v19 = vsub.s32 %v2772_v26, %v2775_v60  ;;  %vm3058_vm11 = vcmp.lt.s32.totalorder %v3037_v31, 3  ;;  %v3065_v36 = vsel %vm3059_vm3, %v3052_v1, 920167782 }
 0x269   : > { %vm6237_vm15 = vcmp.le.f32.partialorder %v6930_v30, 0.7853982  ;;  %v3068_v4 = vsel %vm3056_vm13, %v3046_v51, %v3049_v13  ;;  %v2900_v18 = vxor.u32 2147483648, %v2899_v43  ;;  %v3060_v25 = vsel %vm3056_vm13, %v3040_v58, %v3043_v47 }
 0x26a   : > { %v6932_v48 = vsel %vm6237_vm15, 4294967295, %v6931_v48  ;;  %v3066_v50 = vsel %vm3058_vm11, %v3049_v13, %v3065_v36  ;;  %v3069_v11 = vsel %vm3059_vm3, %v3055_v9, 1326507024  ;;  %v2778_v28 = vsub.s32 0, %v6241_v19 }
 0x26b   : > { %v3062_v38 = vsel %vm3058_vm11, %v3046_v51, %v3061_v53  ;;  %v3067_v12 = vsel %vm3057_vm12, %v3064_v14, %v3066_v50  ;;  %v3070_v24 = vsel %vm3058_vm11, %v3052_v1, %v3069_v11  ;;  %v6933_v26 = vand.u32 2147483647, %v6147_v45 }
 0x26c   : > { %v3071_v30 = vsel %vm3057_vm12, %v3068_v4, %v3070_v24  ;;  %v6247_v57 = vmul.u32.u64.low %v6210_v15, %v3067_v12  ;;  %v6248_v22 = vmul.u32.u64.high %v6210_v15, %v3067_v12, %v6247_v57  ;;  %4548 = vcosq.f32 %v2592_v39 }
 0x26d   : > { %v6253_v60 = vand.u32 8388607, %v6933_v26  ;;  %v3955_v47 = vmin.u32 %v2778_v28, %v6241_v19  ;;  %v6257_v13 = vmul.u32.u64.low %v6210_v15, %v3071_v30  ;;  %v6258_v51 = vmul.u32.u64.high %v6210_v15, %v3071_v30, %v6257_v13 }
 0x26e   : > { %4550 = vsinq.f32 %v2592_v39  ;;  %v3063_v1 = vsel %vm3057_vm12, %v3060_v25, %v3062_v38  ;;  %v2930_v24 = vadd.s32 1, %v3962_v3  ;;  %v1551_v12 = vsel %vm1466_vm7, %v1550_v61, %v6929_v52 }
 0x26f   : > { %v2901_v9 = vsel %vm6843_vm6, %v2900_v18, %v2899_v43  ;;  %v2768_v58 = vadd.s32 %v6190_v17, %v6187_v6  ;;  %v2780_v53 = vclz %v3955_v47  ;;  %v1552_v14 = vsel %vm6228_vm4, %v5078_v33, %v5620_v55 }
 0x270   : > { %v3082_v39 = vadd.s32 1, %v6248_v22  ;;  %v2928_v31 = vor.u32 8388608, %v6253_v60  ;;  %vm2931_vm11 = vcmp.gt.s32.totalorder %v2930_v24, 0  ;;  %v1553_v52 = vsel %vm6228_vm4, 0, %v1551_v12 }
 0x271   : > { %v3956_v61 = vadd.s32 4294967294, %v2780_v53  ;;  %v3079_v3 = vmul.u32 %v6210_v15, %v3063_v1  ;;  %vm3081_vm7 = vc.u32 %v6258_v51, %v6247_v57  ;;  %v2932_v6 = vsel %vm2931_vm11, %v2930_v24, 0 }
 0x272   : > { %v6282_v17 = vsel %vm6237_vm15, %v5854_v46, %v2901_v9  ;;  %v3083_v55 = vsel %vm3081_vm7, %v3082_v39, %v6248_v22  ;;  %v2934_v43 = vand.u32 31, %v2932_v6  ;;  %4552 = vcosq.f32 %v1552_v14 }
 0x273   : > { %vm3957_vm12 = vcmp.lt.s32.totalorder %v3956_v61, 0  ;;  %v3084_v36 = vadd.s32 %v3083_v55, %v3079_v3  ;;  %v6285_v10 = vshrl.u32 %v2932_v6, 5  ;;  %v1557_v4 = vadd.s32 3, %v1553_v52 }
 0x274   : > { %v2783_v18 = vsel %vm3957_vm12, 0, %v3956_v61  ;;  %v2935_v15 = vsub.s32 32, %v2934_v43  ;;  %v2937_v25 = vshll.u32 %v6864_v37, %v2934_v43  ;;  %4554 = vsinq.f32 %v1552_v14 }
 0x275   : > { %v2784_v50 = vsub.s32 32, %v2783_v18  ;;  %v2788_v11 = vsub.s32 4294967266, %v2783_v18  ;;  %v3085_v28 = vadd.s32 536870912, %v3084_v36  ;;  %v2940_v38 = vshll.u32 %v6861_v7, %v2934_v43 }
 0x276   : > { %v2785_v30 = vshll.u32 %v6241_v19, %v2783_v18  ;;  %v2938_v22 = vshrl.u32 %v6861_v7, %v2935_v15  ;;  %v2941_v26 = vshrl.u32 %v6856_v40, %v2935_v15  ;;  %v2943_v47 = vshll.u32 %v6856_v40, %v2934_v43 }
 0x277   : > { %v2786_v13 = vshrl.u32 %v2768_v58, %v2784_v50  ;;  %v2789_v1 = vadd.s32 127, %v2788_v11  ;;  %v6293_v24 = vshrl.u32 %v3085_v28, 30  ;;  %v2944_v12 = vshrl.u32 %v6857_v42, %v2935_v15 }
 0x278   : > { %v2939_v9 = vor.u32 %v2938_v22, %v2937_v25  ;;  %v2942_v53 = vor.u32 %v2941_v26, %v2940_v38  ;;  %v2946_v14 = vshll.u32 %v6857_v42, %v2934_v43  ;;  %v2947_v39 = vshrl.u32 %v6862_v56, %v2935_v15 }
 0x279   : > { %v2787_v52 = vor.u32 %v2786_v13, %v2785_v30  ;;  %v2790_v19 = vshll.u32 %v2789_v1, 23  ;;  %v3087_v7 = vshll.u32 %v6293_v24, 30  ;;  %v2945_v61 = vor.u32 %v2944_v12, %v2943_v47  ;;  %v6299_v3 = vpop.eup %4548 }
 0x27a   : > { %v2936_v40 = vshrl.u32 %v6864_v37, %v2935_v15  ;;  %v2948_v58 = vor.u32 %v2947_v39, %v2946_v14  ;;  %v2949_v6 = vshll.u32 %v6862_v56, %v2934_v43  ;;  %v2950_v55 = vshrl.u32 %v6863_v49, %v2935_v15 }
 0x27b   : > { %v6304_v18 = vpop.eup %4550  ;;  %v2791_v25 = vor.u32 4788187, %v2790_v19  ;;  %v2794_v42 = vcvt.s32.f32 %v2787_v52  ;;  %v6306_v50 = vsub.s32 %v3084_v36, %v3087_v7  ;;  %vm2952_vm4 = vcmp.lt.s32.totalorder %v6285_v10, 1 }
 0x27c   : > { %v2951_v11 = vor.u32 %v2950_v55, %v2949_v6  ;;  %vm2954_vm13 = vcmp.lt.s32.totalorder %v6285_v10, 3  ;;  %vm2955_vm3 = vcmp.lt.s32.totalorder %v6285_v10, 4  ;;  %v2956_v28 = vsel %vm2952_vm4, %v2936_v40, %v2939_v9 }
 0x27d   : > { %v2792_v37 = vand.u32 2147483647, %v2791_v25  ;;  %v3090_v38 = vsub.s32 0, %v6306_v50  ;;  %v2957_v56 = vsel %vm2955_vm3, %v2945_v61, 2102212464  ;;  %v2960_v43 = vsel %vm2952_vm4, %v2939_v9, %v2942_v53 }
 0x27e   : > { %v2958_v49 = vsel %vm2954_vm13, %v2942_v53, %v2957_v56  ;;  %v2961_v15 = vsel %vm2955_vm3, %v2948_v58, 920167782  ;;  %v2964_v30 = vsel %vm2952_vm4, %v2942_v53, %v2945_v61  ;;  %v2965_v36 = vsel %vm2955_vm3, %v2951_v11, 1326507024  ;;  %v6940_v11 = vld [vmem:[#allocation5_spill] sm:$0xff] }
 0x27f   : > { %v4553_v22 = vpop.eup %4552  ;;  %v2795_v26 = vmul.f32 %v2794_v42, %v2792_v37  ;;  %v3967_v47 = vmin.u32 %v3090_v38, %v6306_v50  ;;  %vm2953_vm11 = vcmp.lt.s32.totalorder %v6285_v10, 2  ;;  %v2962_v13 = vsel %vm2954_vm13, %v2945_v61, %v2961_v15  ;;  %v6944_v42 = vld [vmem:[#allocation3_spill] sm:$0xff] }
 0x280   : > { %v2963_v1 = vsel %vm2953_vm11, %v2960_v43, %v2962_v13  ;;  %v2966_v12 = vsel %vm2954_vm13, %v2948_v58, %v2965_v36  ;;  %v2968_v9 = vshll.u32 %v2928_v31, 8  ;;  %v1558_v14 = vand.u32 3, %v1557_v4 }
 0x281   : > { %v4555_v39 = vpop.eup %4554  ;;  %v2796_v53 = vxor.u32 2147483648, %v2795_v26  ;;  %v3092_v52 = vclz %v3967_v47  ;;  %v2959_v19 = vsel %vm2953_vm11, %v2956_v28, %v2958_v49  ;;  %v2967_v7 = vsel %vm2953_vm11, %v2964_v30, %v2966_v12  ;;  %v6942_v47 = vld [vmem:[#allocation6_spill] sm:$0xff] }
 0x282   : > { %v6322_v40 = vmul.u32.u64.low %v2968_v9, %v2967_v7  ;;  %v6323_v6 = vmul.u32.u64.high %v2968_v9, %v2967_v7, %v6322_v40  ;;  %v6325_v55 = vmul.u32.u64.low %v2968_v9, %v2963_v1  ;;  %v6326_v25 = vmul.u32.u64.high %v2968_v9, %v2963_v1, %v6325_v55 }
 0x283   : > { %4556 = vcosq.f32 %v6282_v17  ;;  %v6934_v10 = vand.u32 2147483647, %v5924_v35  ;;  %vm6845_vm12 = vcmp.lt.s32.totalorder %v5924_v35, 0  ;;  %v3968_v60 = vadd.s32 4294967294, %v3092_v52 }
 0x284   : > { %v3080_v31 = vadd.s32 %v6247_v57, %v6258_v51  ;;  %v1561_v4 = vxor.u32 2147483648, %v4555_v39  ;;  %v6937_v58 = vand.u32 2147483647, %v5071_v8  ;;  %v1654_v28 = vsub.s32 4, %v6940_v11 }
 0x285   : > { %vm6331_vm7 = vcmp.le.f32.partialorder %v6934_v10, 0.7853982  ;;  %vm3969_vm13 = vcmp.lt.s32.totalorder %v3968_v60, 0  ;;  %v2975_v37 = vmul.u32 %v2968_v9, %v2959_v19  ;;  %vm1560_vm3 = vcmp.eq.s32.totalorder %v1558_v14, 0 }
 0x286   : > { %vm6340_vm4 = vcmp.le.f32.partialorder %v6937_v58, 0.7853982  ;;  %v2797_v57 = vsel %vm6845_vm12, %v2796_v53, %v2795_v26  ;;  %v3095_v51 = vsel %vm3969_vm13, 0, %v3968_v60  ;;  %vm2977_vm11 = vc.u32 %v6323_v6, %v6325_v55 }
 0x287   : > { %v1656_v38 = vsel %vm6340_vm4, %v5071_v8, %v5513_v27  ;;  %v1564_v56 = vxor.u32 2147483648, %v4553_v22  ;;  %v3096_v43 = vsub.s32 32, %v3095_v51  ;;  %v3100_v49 = vsub.s32 4294967266, %v3095_v51 }
 0x288   : > { %v2978_v15 = vadd.s32 1, %v6326_v25  ;;  %vm1563_vm6 = vcmp.eq.s32.totalorder %v1558_v14, 2  ;;  %v1562_v30 = vsel %vm1560_vm3, %v4553_v22, %v1561_v4  ;;  %vm6941_vm15 = vcmp.lt.s32.totalorder %v5071_v8, 0 }
 0x289   : > { %v1655_v36 = vsel %vm6941_vm15, %v1654_v28, %v6940_v11  ;;  %4558 = vcosq.f32 %v1656_v38  ;;  %v1758_v27 = vsub.s32 4, %v6942_v47  ;;  %v3097_v13 = vshll.u32 %v6306_v50, %v3095_v51 }
 0x28a   : > { %v3098_v26 = vshrl.u32 %v3080_v31, %v3096_v43  ;;  %v3101_v1 = vadd.s32 127, %v3100_v49  ;;  %v2979_v12 = vsel %vm2977_vm11, %v2978_v15, %v6326_v25  ;;  %v1565_v53 = vsel %vm1563_vm6, %v1564_v56, %v4555_v39 }
 0x28b   : > { %v2980_v9 = vadd.s32 %v2979_v12, %v2975_v37  ;;  %v1657_v52 = vsel %vm6340_vm4, 0, %v1655_v36  ;;  %4560 = vsinq.f32 %v1656_v38  ;;  %vm6943_vm15 = vcmp.lt.s32.totalorder %v5130_v16, 0 }
 0x28c   : > { %v3099_v22 = vor.u32 %v3098_v26, %v3097_v13  ;;  %v3102_v19 = vshll.u32 %v3101_v1, 23  ;;  %v1661_v7 = vadd.s32 3, %v1657_v52  ;;  %v1759_v40 = vsel %vm6943_vm15, %v1758_v27, %v6942_v47  ;;  %v6948_v27 = vld [vmem:[#allocation14_spill] sm:$0xff]  ;;  %v6964_v26 = vld [vmem:[#allocation8_spill] sm:$0xff] }
 0x28d   : > { %4562 = vsinq.f32 %v6282_v17  ;;  %v2800_v50 = vsel %vm6331_vm7, %v5924_v35, %v2797_v57  ;;  %v2981_v25 = vadd.s32 536870912, %v2980_v9  ;;  %v1761_v39 = vsel %vm5564_vm2, 0, %v1759_v40 }
 0x28e   : > { %v3103_v10 = vor.u32 4788187, %v3102_v19  ;;  %vm1556_vm6 = vweird.f32 %v5078_v33  ;;  %vm1559_vm4 = vcmp.lt.s32.totalorder %v1558_v14, 2  ;;  %v1765_v60 = vadd.s32 3, %v1761_v39  ;;  %v6945_v14 = vld [vmem:[#allocation4_spill] sm:$0xff]  ;;  %v6953_v19 = vld [vmem:[#allocation13_spill] sm:$0xff] }
 0x28f   : > { %v6371_v31 = vshrl.u32 %v2981_v25, 30  ;;  %v1566_v4 = vsel %vm1559_vm4, %v1562_v30, %v1565_v53  ;;  %v1662_v58 = vand.u32 3, %v1661_v7  ;;  %v1862_v11 = vsub.s32 4, %v6944_v42 }
 0x290   : > { %4564 = vcosq.f32 %v2800_v50  ;;  %v3104_v17 = vand.u32 2147483647, %v3103_v10  ;;  %v3106_v28 = vcvt.s32.f32 %v3099_v22  ;;  %v1769_v37 = vxor.u32 2147483648, %v5671_v44  ;;  %v6375_v38 = vpop.eup %4556 }
 0x291   : > { %v2983_v62 = vshll.u32 %v6371_v31, 30  ;;  %v1766_v57 = vand.u32 3, %v1765_v60  ;;  %v1772_v51 = vxor.u32 2147483648, %v5665_v23  ;;  %vm6946_vm2 = vcmp.lt.s32.totalorder %v6945_v14, 0 }
 0x292   : > { %v1863_v56 = vsel %vm6946_vm2, %v1862_v11, %v6944_v42  ;;  %4566 = vsinq.f32 %v2800_v50  ;;  %vm6846_vm13 = vcmp.lt.s32.totalorder %v6098_v41, 0  ;;  %v6384_v43 = vadd.s32 %v6325_v55, %v6323_v6  ;;  %v4500_v50 = vld [vmem:[%s6748_s2 + $0x18] sm:$0xff]  }
 0x293   : > { %v6388_v49 = vsel %vm1556_vm6, nan, %v1566_v4  ;;  %v1865_v30 = vsel %vm5555_vm1, 0, %v1863_v56  ;;  %v3107_v36 = vmul.f32 %v3106_v28, %v3104_v17  ;;  %v6392_v47 = vsub.s32 %v2980_v9, %v2983_v62  ;;  %v6952_v9 = vld [vmem:[#allocation9_spill] sm:$0xff] }
 0x294   : > { %vm1768_vm15 = vcmp.eq.s32.totalorder %v1766_v57, 0  ;;  %v1873_v13 = vxor.u32 2147483648, %v6948_v27  ;;  %vm1771_vm2 = vcmp.eq.s32.totalorder %v1766_v57, 2  ;;  %v1869_v33 = vadd.s32 3, %v1865_v30 }
 0x295   : > { %v1770_v6 = vsel %vm1768_vm15, %v5665_v23, %v1769_v37  ;;  %v6949_v55 = vand.u32 2147483647, %v5383_v34  ;;  %v2986_v1 = vsub.s32 0, %v6392_v47  ;;  %v1773_v12 = vsel %vm1771_vm2, %v1772_v51, %v5671_v44 }
 0x296   : > { %v1966_v53 = vsub.s32 4, %v6952_v9  ;;  %v4559_v23 = vpop.eup %4558  ;;  %vm1767_vm1 = vcmp.lt.s32.totalorder %v1766_v57, 2  ;;  %v1870_v22 = vand.u32 3, %v1869_v33  ;;  %v1876_v7 = vxor.u32 2147483648, %v6953_v19 }
 0x297   : > { %vm6400_vm6 = vcmp.le.f32.partialorder %v6949_v55, 0.7853982  ;;  %v6954_v40 = vand.u32 2147483647, %v6098_v41  ;;  %v3108_v44 = vxor.u32 2147483648, %v3107_v36  ;;  %v3963_v25 = vmin.u32 %v2986_v1, %v6392_v47 }
 0x298   : > { %v1968_v52 = vsel %vm6400_vm6, %v5383_v34, %v6113_v63  ;;  %v1668_v39 = vxor.u32 2147483648, %v4559_v23  ;;  %vm6957_vm2 = vcmp.lt.s32.totalorder %v5383_v34, 0  ;;  %v4561_v10 = vpop.eup %4560  ;;  %vm1664_vm12 = vcmp.eq.s32.totalorder %v1662_v58, 0 }
 0x299   : > { %4568 = vcosq.f32 %v1968_v52  ;;  %vm6414_vm15 = vcmp.le.f32.partialorder %v6954_v40, 0.7853982  ;;  %v1967_v63 = vsel %vm6957_vm2, %v1966_v53, %v6952_v9  ;;  %vm1667_vm4 = vcmp.eq.s32.totalorder %v1662_v58, 2 }
 0x29a   : > { %v1774_v60 = vsel %vm1767_vm1, %v1770_v6, %v1773_v12  ;;  %vm1872_vm11 = vcmp.eq.s32.totalorder %v1870_v22, 0  ;;  %v2988_v4 = vclz %v3963_v25  ;;  %v1665_v42 = vxor.u32 2147483648, %v4561_v10  ;;  %v6422_v17 = vpop.eup %4562  ;;  %v6966_v25 = vld [vmem:[#allocation15_spill] sm:$0xff] }
 0x29b   : > { %v1669_v11 = vsel %vm1667_vm4, %v1668_v39, %v4561_v10  ;;  %vm1875_vm3 = vcmp.eq.s32.totalorder %v1870_v22, 2  ;;  %v1874_v28 = vsel %vm1872_vm11, %v6953_v19, %v1873_v13  ;;  %v1969_v62 = vsel %vm6400_vm6, 0, %v1967_v63 }
 0x29c   : > { %v1877_v37 = vsel %vm1875_vm3, %v1876_v7, %v6948_v27  ;;  %4570 = vsinq.f32 %v1968_v52  ;;  %v3109_v57 = vsel %vm6846_vm13, %v3108_v44, %v3107_v36  ;;  %v3964_v51 = vadd.s32 4294967294, %v2988_v4 }
 0x29d   : > { %v1666_v56 = vsel %vm1664_vm12, %v4559_v23, %v1665_v42  ;;  %vm1871_vm1 = vcmp.lt.s32.totalorder %v1870_v22, 2  ;;  %vm6958_vm2 = vcmp.lt.s32.totalorder %v1662_v58, 2  ;;  %vm6959_vm4 = vweird.f32 %v5130_v16  ;;  %v6433_v13 = vpop.eup %4564 }
 0x29e   : > { %v1670_v15 = vsel %vm6958_vm2, %v1666_v56, %v1669_v11  ;;  %v1775_v30 = vsel %vm6959_vm4, nan, %v1774_v60  ;;  %v1878_v6 = vsel %vm1871_vm1, %v1874_v28, %v1877_v37  ;;  %v1973_v33 = vadd.s32 3, %v1969_v62 }
 0x29f   : > { %vm3965_vm3 = vcmp.lt.s32.totalorder %v3964_v51, 0  ;;  %vm6960_vm11 = vweird.f32 %v5071_v8  ;;  %v6961_v55 = vand.u32 2147483647, %v5275_v54  ;;  %v2070_v58 = vsub.s32 4, %v6964_v26  ;;  %v6450_v8 = vpop.eup %4566 }
 0x2a0   : > { %v1671_v27 = vsel %vm6960_vm11, nan, %v1670_v15  ;;  %v2991_v1 = vsel %vm3965_vm3, 0, %v3964_v51  ;;  %vm1868_vm12 = vweird.f32 %v6945_v14  ;;  %vm6965_vm1 = vcmp.lt.s32.totalorder %v5275_v54, 0 }
 0x2a1   : > { %vm6439_vm6 = vcmp.le.f32.partialorder %v6961_v55, 0.7853982  ;;  %v3128_v16 = vpack.c.bf16 %v1671_v27, %v6388_v49  ;;  %v2992_v9 = vsub.s32 32, %v2991_v1  ;;  %v2996_v53 = vsub.s32 4294967266, %v2991_v1  ;;  %v6972_v27 = vld [vmem:[#allocation7_spill] sm:$0xff] }
 0x2a2   : > { %v2072_v12 = vsel %vm6439_vm6, %v5275_v54, %v6108_v0  ;;  %v1879_v52 = vsel %vm1868_vm12, nan, %v1878_v6  ;;  %v2071_v23 = vsel %vm6965_vm1, %v2070_v58, %v6964_v26  ;;  %v3112_v49 = vsel %vm6414_vm15, %v6098_v41, %v3109_v57  ;;  %v6985_v58 = vld [vmem:[#allocation11_spill] sm:$0xff] }
 0x2a3   : > { %3152 = vrot.lane.b32.xlu0 %v3128_v16, %s4618_s14  ;;  %v3129_v14 = vpack.c.bf16 %v1879_v52, %v1775_v30  ;;  %v1974_v22 = vand.u32 3, %v1973_v33  ;;  %v2073_v0 = vsel %vm6439_vm6, 0, %v2071_v23  ;;  %v2993_v19 = vshll.u32 %v6392_v47, %v2991_v1  ;;  %v6968_v47 = vld [vmem:[#allocation12_spill] sm:$0xff] }
 0x2a4   : > { %v2994_v7 = vshrl.u32 %v6384_v43, %v2992_v9  ;;  %v2997_v40 = vadd.s32 127, %v2996_v53  ;;  %4572 = vcosq.f32 %v2072_v12  ;;  %v2077_v44 = vadd.s32 3, %v2073_v0  ;;  %v6975_v53 = vld [vmem:[#allocation20_spill] sm:$0xff] }
 0x2a5   : > { %4574 = vsinq.f32 %v2072_v12  ;;  %v2174_v39 = vsub.s32 4, %v6966_v25  ;;  %vm6847_vm2 = vcmp.lt.s32.totalorder %v6147_v45, 0  ;;  %vm6967_vm4 = vcmp.lt.s32.totalorder %v5530_v21, 0 }
 0x2a6   : > { %v4569_v63 = vpop.eup %4568  ;;  %4576 = vcosq.f32 %v3112_v49  ;;  %v2995_v10 = vor.u32 %v2994_v7, %v2993_v19  ;;  %v2998_v60 = vshll.u32 %v2997_v40, 23  ;;  %v2278_v42 = vsub.s32 4, %v6968_v47 }
 0x2a7   : > { %4578 = vsinq.f32 %v3112_v49  ;;  %3154 = vrot.lane.b32.xlu0 %v3129_v14, %s4618_s14  ;;  %v1980_v4 = vxor.u32 2147483648, %v4569_v63  ;;  %v2175_v43 = vsel %vm6967_vm4, %v2174_v39, %v6966_v25  ;;  %v6969_v11 = vand.u32 2147483647, %v6147_v45  ;;  %v6976_v49 = vld [vmem:[#allocation21_spill] sm:$0xff] }
 0x2a8   : > { %v2999_v37 = vor.u32 4788187, %v2998_v60  ;;  %vm1975_vm6 = vcmp.lt.s32.totalorder %v1974_v22, 2  ;;  %vm1976_vm12 = vcmp.eq.s32.totalorder %v1974_v22, 0  ;;  %v2177_v62 = vsel %vm5871_vm10, 0, %v2175_v43 }
 0x2a9   : > { %vm6472_vm3 = vcmp.le.f32.partialorder %v6969_v11, 0.7853982  ;;  %vm1979_vm1 = vcmp.eq.s32.totalorder %v1974_v22, 2  ;;  %v6479_v57 = vand.u32 3, %v2077_v44  ;;  %v2181_v51 = vadd.s32 3, %v2177_v62  ;;  %v4571_v15 = vpop.eup %4570 }
 0x2aa   : > { %v2185_v56 = vxor.u32 2147483648, %v6047_v2  ;;  %v3000_v30 = vand.u32 2147483647, %v2999_v37  ;;  %v3002_v6 = vcvt.s32.f32 %v2995_v10  ;;  %v2188_v33 = vxor.u32 2147483648, %v6042_v29 }
 0x2ab   : > { %vm6973_vm13 = vcmp.lt.s32.totalorder %v6972_v27, 0  ;;  %v1977_v36 = vxor.u32 2147483648, %v4571_v15  ;;  %v1981_v59 = vsel %vm1979_vm1, %v1980_v4, %v4571_v15  ;;  %v2182_v26 = vand.u32 3, %v2181_v51 }
 0x2ac   : > { %v2279_v55 = vsel %vm6973_vm13, %v2278_v42, %v6968_v47  ;;  %v3003_v16 = vmul.f32 %v3002_v6, %v3000_v30  ;;  %v2289_v9 = vxor.u32 2147483648, %v5953_v32  ;;  %v2382_v52 = vsub.s32 4, %v6975_v53  ;;  %v6981_v30 = vld [vmem:[#allocation29_spill] sm:$0xff] }
 0x2ad   : > { %v2281_v1 = vsel %vm5797_vm8, 0, %v2279_v55  ;;  %v1978_v23 = vsel %vm1976_vm12, %v4569_v63, %v1977_v36  ;;  %vm2184_vm11 = vcmp.eq.s32.totalorder %v2182_v26, 0  ;;  %vm2187_vm13 = vcmp.eq.s32.totalorder %v2182_v26, 2 }
 0x2ae   : > { %v2285_v12 = vadd.s32 3, %v2281_v1  ;;  %v2292_v14 = vxor.u32 2147483648, %v6976_v49  ;;  %v3004_v0 = vxor.u32 2147483648, %v3003_v16  ;;  %v1982_v19 = vsel %vm1975_vm6, %v1978_v23, %v1981_v59 }
 0x2af   : > { %vm2076_vm8 = vweird.f32 %v5275_v54  ;;  %v2186_v7 = vsel %vm2184_vm11, %v6042_v29, %v2185_v56  ;;  %v2189_v40 = vsel %vm2187_vm13, %v2188_v33, %v6047_v2  ;;  %vm2080_vm1 = vcmp.eq.s32.totalorder %v6479_v57, 0  ;;  %v6980_v56 = vld [vmem:[#allocation30_spill] sm:$0xff]  ;;  %v6982_v33 = vld [vmem:[#allocation17_spill] sm:$0xff] }
 0x2b0   : > { %vm2183_vm10 = vcmp.lt.s32.totalorder %v2182_v26, 2  ;;  %v2286_v44 = vand.u32 3, %v2285_v12  ;;  %vm6977_vm12 = vcmp.lt.s32.totalorder %v5615_v5, 0  ;;  %v3005_v39 = vsel %vm6847_vm2, %v3004_v0, %v3003_v16  ;;  %v6989_v0 = vld [vmem:[#allocation28_spill] sm:$0xff] }
 0x2b1   : > { %v2383_v25 = vsel %vm6977_vm12, %v2382_v52, %v6975_v53  ;;  %vm2083_vm4 = vcmp.eq.s32.totalorder %v6479_v57, 2  ;;  %v2190_v22 = vsel %vm2183_vm10, %v2186_v7, %v2189_v40  ;;  %v4573_v29 = vpop.eup %4572  ;;  %v3008_v2 = vsel %vm6472_vm3, %v6147_v45, %v3005_v39  ;;  %v6990_v7 = vld [vmem:[#allocation27_spill] sm:$0xff] }
 0x2b2   : > { %v2385_v63 = vsel %vm5957_vm14, 0, %v2383_v25  ;;  %vm6978_vm11 = vweird.f32 %v5383_v34  ;;  %vm2288_vm6 = vcmp.eq.s32.totalorder %v2286_v44, 0  ;;  %vm2291_vm13 = vcmp.eq.s32.totalorder %v2286_v44, 2  ;;  %v4575_v60 = vpop.eup %4574 }
 0x2b3   : > { %v1983_v10 = vsel %vm6978_vm11, nan, %v1982_v19  ;;  %vm2388_vm12 = vweird.f32 %v5615_v5  ;;  %v2084_v4 = vxor.u32 2147483648, %v4573_v29  ;;  %vm2287_vm2 = vcmp.lt.s32.totalorder %v2286_v44, 2  ;;  %v6516_v47 = vpop.eup %4576  ;;  %v6991_v44 = vld [vmem:[#allocation22_spill] sm:$0xff]  ;;  %v6995_v5 = vld [vmem:[#allocation16_spill] sm:$0xff] }
 0x2b4   : > { %v2290_v43 = vsel %vm2288_vm6, %v6976_v49, %v2289_v9  ;;  %v2293_v20 = vsel %vm2291_vm13, %v2292_v14, %v5953_v32  ;;  %v2081_v42 = vxor.u32 2147483648, %v4575_v60  ;;  %vm6979_vm14 = vweird.f32 %v5530_v21  ;;  %v6520_v62 = vpop.eup %4578  ;;  %v6988_v49 = vld [vmem:[#allocation24_spill] sm:$0xff] }
 0x2b5   : > { %v2191_v11 = vsel %vm6979_vm14, nan, %v2190_v22  ;;  %v2294_v37 = vsel %vm2287_vm2, %v2290_v43, %v2293_v20  ;;  %v2389_v34 = vadd.s32 3, %v2385_v63  ;;  %v2085_v51 = vsel %vm2083_vm4, %v2084_v4, %v4575_v60  ;;  %v6992_v22 = vld [vmem:[#allocation18_spill] sm:$0xff]  ;;  %v6997_v43 = vld [vmem:[#allocation33_spill] sm:$0xff] }
 0x2b6   : > { %v2393_v15 = vxor.u32 2147483648, %v6980_v56  ;;  %v2396_v6 = vxor.u32 2147483648, %v6981_v30  ;;  %v2486_v55 = vsub.s32 4, %v6982_v33  ;;  %4580 = vcosq.f32 %v3008_v2 }
 0x2b7   : > { %v2082_v32 = vsel %vm2080_vm1, %v4573_v29, %v2081_v42  ;;  %vm6983_vm10 = vweird.f32 %v6972_v27  ;;  %v2390_v36 = vand.u32 3, %v2389_v34  ;;  %4582 = vsinq.f32 %v3008_v2  ;;  %v6998_v42 = vld [vmem:[#allocation34_spill] sm:$0xff] }
 0x2b8   : > { %v2295_v21 = vsel %vm6983_vm10, nan, %v2294_v37  ;;  %vm6984_vm2 = vcmp.lt.s32.totalorder %v6479_v57, 2  ;;  %vm6986_vm4 = vcmp.lt.s32.totalorder %v6985_v58, 0  ;;  %vm2492_vm1 = vweird.f32 %v6985_v58 }
 0x2b9   : > { %v2086_v59 = vsel %vm6984_vm2, %v2082_v32, %v2085_v51  ;;  %v3131_v26 = vpack.c.bf16 %v2295_v21, %v2191_v11  ;;  %v2487_v1 = vsel %vm6986_vm4, %v2486_v55, %v6982_v33  ;;  %vm2391_vm11 = vcmp.lt.s32.totalorder %v2390_v36, 2 }
 0x2ba   : > { %v2087_v16 = vsel %vm2076_vm8, nan, %v2086_v59  ;;  %vm2392_vm6 = vcmp.eq.s32.totalorder %v2390_v36, 0  ;;  %vm2395_vm13 = vcmp.eq.s32.totalorder %v2390_v36, 2  ;;  %v2489_v57 = vsel %vm5946_vm9, 0, %v2487_v1  ;;  %v7001_v36 = vld [vmem:[#allocation32_spill] sm:$0xff] }
 0x2bb   : > { %v3130_v12 = vpack.c.bf16 %v2087_v16, %v1983_v10  ;;  %v2394_v27 = vsel %vm2392_vm6, %v6981_v30, %v2393_v15  ;;  %v2397_v9 = vsel %vm2395_vm13, %v2396_v6, %v6980_v56  ;;  %v2493_v23 = vadd.s32 3, %v2489_v57 }
 0x2bc   : > { %v2398_v52 = vsel %vm2391_vm11, %v2394_v27, %v2397_v9  ;;  %v2590_v14 = vsub.s32 4, %v6988_v49  ;;  %v2497_v19 = vxor.u32 2147483648, %v6989_v0  ;;  %v2500_v40 = vxor.u32 2147483648, %v6990_v7 }
 0x2bd   : > { %3156 = vrot.lane.b32.xlu1 %v3130_v12, %s4618_s14  ;;  %v2399_v54 = vsel %vm2388_vm12, nan, %v2398_v52  ;;  %v2694_v25 = vsub.s32 4, %v6991_v44  ;;  %v2494_v39 = vand.u32 3, %v2493_v23  ;;  %vm6993_vm9 = vcmp.lt.s32.totalorder %v6992_v22, 0  ;;  %v7002_v23 = vld [vmem:[#allocation26_spill] sm:$0xff] }
 0x2be   : > { %v2591_v63 = vsel %vm6993_vm9, %v2590_v14, %v6988_v49  ;;  %v2601_v29 = vxor.u32 2147483648, %v6304_v18  ;;  %v2604_v2 = vxor.u32 2147483648, %v6299_v3  ;;  %vm6996_vm8 = vcmp.lt.s32.totalorder %v6995_v5, 0 }
 0x2bf   : > { %v2593_v60 = vsel %vm6163_vm5, 0, %v2591_v63  ;;  %v2695_v4 = vsel %vm6996_vm8, %v2694_v25, %v6991_v44  ;;  %v2705_v20 = vxor.u32 2147483648, %v6997_v43  ;;  %v2798_v11 = vsub.s32 4, %v6998_v42  ;;  %v4498_v63 = vld [vmem:[%s6748_s2 + $0x28] sm:$0x3f]  }
 0x2c0   : > { %vm2495_vm12 = vcmp.lt.s32.totalorder %v2494_v39, 2  ;;  %vm2496_vm14 = vcmp.eq.s32.totalorder %v2494_v39, 0  ;;  %vm2499_vm10 = vcmp.eq.s32.totalorder %v2494_v39, 2  ;;  %v2597_v37 = vadd.s32 3, %v2593_v60 }
 0x2c1   : > { %3158 = vrot.lane.b32.xlu1 %v3131_v26, %s4618_s14  ;;  %v2498_v34 = vsel %vm2496_vm14, %v6990_v7, %v2497_v19  ;;  %v2501_v51 = vsel %vm2499_vm10, %v2500_v40, %v6989_v0  ;;  %v2697_v15 = vsel %vm6082_vm0, 0, %v2695_v4  ;;  %vm7000_vm5 = vcmp.lt.s32.totalorder %v5924_v35, 0 }
 0x2c2   : > { %v2799_v30 = vsel %vm7000_vm5, %v2798_v11, %v6998_v42  ;;  %v2502_v6 = vsel %vm2495_vm12, %v2498_v34, %v2501_v51  ;;  %v2598_v33 = vand.u32 3, %v2597_v37  ;;  %v2701_v55 = vadd.s32 3, %v2697_v15  ;;  %v4504_v11 = vld [vmem:[%s6750_s4 + $0x38] sm:$0xff]  }
 0x2c3   : > { %v2801_v32 = vsel %vm6331_vm7, 0, %v2799_v30  ;;  %v2503_v21 = vsel %vm2492_vm1, nan, %v2502_v6  ;;  %v2708_v59 = vxor.u32 2147483648, %v7001_v36  ;;  %v2809_v1 = vxor.u32 2147483648, %v6450_v8  ;;  %v6576_v12 = vpop.eup %4580  ;;  %4338 = vmatprep.subr.bf16.mxu1 %v4504_v11 }
 0x2c4   : > { %v2805_v26 = vadd.s32 3, %v2801_v32  ;;  %v3132_v16 = vpack.c.bf16 %v2503_v21, %v2399_v54  ;;  %vm2599_vm0 = vcmp.lt.s32.totalorder %v2598_v33, 2  ;;  %vm2600_vm2 = vcmp.eq.s32.totalorder %v2598_v33, 0  ;;  %v6580_v57 = vpop.eup %4582  ;;  %4339 = vmatpush3.bf16.msra.mxu1 %v4504_v11  ;;  %v4506_v32 = vld [vmem:[%s6750_s4 + $0x28] sm:$0xff]   ;;  %v4602_v11 = vld [vmem:[%s4708_s13 + $0x70] sm:$0xff] }
 0x2c5   : > { %vm2603_vm4 = vcmp.eq.s32.totalorder %v2598_v33, 2  ;;  %v2602_v27 = vsel %vm2600_vm2, %v6299_v3, %v2601_v29  ;;  %v2702_v61 = vand.u32 3, %v2701_v55  ;;  %vm2596_vm7 = vweird.f32 %v6992_v22 }
 0x2c6   : > { %v2605_v9 = vsel %vm2603_vm4, %v2604_v2, %v6304_v18  ;;  %v2806_v53 = vand.u32 3, %v2805_v26  ;;  %3160 = vrot.lane.b32.xlu0 %v3132_v16, %s4618_s14  ;;  %v2812_v52 = vxor.u32 2147483648, %v6433_v13  ;;  %v2902_v49 = vsub.s32 4, %v7002_v23 }
 0x2c7   : > { %v2606_v58 = vsel %vm2599_vm0, %v2602_v27, %v2605_v9  ;;  %vm2700_vm11 = vweird.f32 %v6995_v5  ;;  %vm2704_vm6 = vcmp.eq.s32.totalorder %v2702_v61, 0  ;;  %vm2707_vm13 = vcmp.eq.s32.totalorder %v2702_v61, 2  ;;  %v4588_v9 = vld [vmem:[%s4708_s13] sm:$0xff] }
 0x2c8   : > { %v2607_v14 = vsel %vm2596_vm7, nan, %v2606_v58  ;;  %vm2703_vm1 = vcmp.lt.s32.totalorder %v2702_v61, 2  ;;  %v2706_v3 = vsel %vm2704_vm6, %v7001_v36, %v2705_v20  ;;  %v2709_v18 = vsel %vm2707_vm13, %v2708_v59, %v6997_v43  ;;  %v4589_v61 = vld [vmem:[%s4708_s13 + $0x8] sm:$0xff] }
 0x2c9   : > { %vm2808_vm9 = vcmp.eq.s32.totalorder %v2806_v53, 0  ;;  %v2710_v54 = vsel %vm2703_vm1, %v2706_v3, %v2709_v18  ;;  %vm2811_vm8 = vcmp.eq.s32.totalorder %v2806_v53, 2  ;;  %vm7003_vm12 = vcmp.lt.s32.totalorder %v5854_v46, 0  ;;  %v4592_v18 = vld [vmem:[%s4708_s13 + $0x20] sm:$0xff] }
 0x2ca   : > { %v2810_v0 = vsel %vm2808_vm9, %v6433_v13, %v2809_v1  ;;  %v2903_v19 = vsel %vm7003_vm12, %v2902_v49, %v7002_v23  ;;  %v2711_v7 = vsel %vm2700_vm11, nan, %v2710_v54  ;;  %vm2807_vm14 = vcmp.lt.s32.totalorder %v2806_v53, 2  ;;  %v4501_v1 = vld [vmem:[%s6748_s2 + $0x10] sm:$0xff]   ;;  %v4591_v23 = vld [vmem:[%s4708_s13 + $0x18] sm:$0xff]  ;;  %v4593_v54 = vld [vmem:[%s4708_s13 + $0x28] sm:$0xff] }
 0x2cb   : > { %v2813_v40 = vsel %vm2811_vm8, %v2812_v52, %v6450_v8  ;;  %vm7004_vm10 = vnez %v6932_v48  ;;  %v3133_v25 = vpack.c.bf16 %v2711_v7, %v2607_v14  ;;  %v2913_v13 = vxor.u32 2147483648, %v6422_v17  ;;  %v4590_v52 = vld [vmem:[%s4708_s13 + $0x10] sm:$0xff] }
 0x2cc   : > { %v2905_v44 = vsel %vm7004_vm10, 0, %v2903_v19  ;;  %v2814_v39 = vsel %vm2807_vm14, %v2810_v0, %v2813_v40  ;;  %v2916_v29 = vxor.u32 2147483648, %v6375_v38  ;;  %v3006_v2 = vsub.s32 4, %v6371_v31  ;;  %v4594_v40 = vld [vmem:[%s4708_s13 + $0x30] sm:$0xff] }
 0x2cd   : > { %v2909_v22 = vadd.s32 3, %v2905_v44  ;;  %3162 = vrot.lane.b32.xlu1 %v3133_v25, %s4618_s14  ;;  %vm2804_vm5 = vweird.f32 %v5924_v35  ;;  %vm2908_vm0 = vweird.f32 %v5854_v46  ;;  %v3110_v8 = vsub.s32 4, %v6293_v24  ;;  %v4499_v35 = vld [vmem:[%s6748_s2 + $0x20] sm:$0xff]   ;;  %v4595_v44 = vld [vmem:[%s4708_s13 + $0x38] sm:$0xff] }
 0x2ce   : > { %v2815_v10 = vsel %vm2804_vm5, nan, %v2814_v39  ;;  %vm7005_vm2 = vcmp.lt.s32.totalorder %v6147_v45, 0  ;;  %v3017_v5 = vxor.u32 2147483648, %v6580_v57  ;;  %vm3263_vm4 = vcmask 1045504  }
 0x2cf   : > { %v2910_v48 = vand.u32 3, %v2909_v22  ;;  %v3007_v60 = vsel %vm7005_vm2, %v3006_v2, %v6371_v31  ;;  %4404 = vmatprep.subr.msk.bf16.mxu0 %vm3263_vm4, %v4498_v63  ;;  %vm7006_vm13 = vcmp.lt.s32.totalorder %v6098_v41, 0  ;;  %v3020_v37 = vxor.u32 2147483648, %v6576_v12 }
 0x2d0   : > { %v3009_v4 = vsel %vm6472_vm3, 0, %v3007_v60  ;;  %v3111_v31 = vsel %vm7006_vm13, %v3110_v8, %v6293_v24  ;;  %v3265_v51 = vsel %vm3263_vm4, %v4498_v63, 0  ;;  %v4505_v24 = vld [vmem:[%s6750_s4 + $0x30] sm:$0xff]   ;;  %v3121_v30 = vxor.u32 2147483648, %v6520_v62  ;;  %v4596_v63 = vld [vmem:[%s4708_s13 + $0x40] sm:$0xff] }
 0x2d1   : > { %vm2911_vm7 = vcmp.lt.s32.totalorder %v2910_v48, 2  ;;  %vm2912_vm11 = vcmp.eq.s32.totalorder %v2910_v48, 0  ;;  %vm2915_vm6 = vcmp.eq.s32.totalorder %v2910_v48, 2  ;;  %v3013_v42 = vadd.s32 3, %v3009_v4  ;;  %4311 = vmatpush3.bf16.msra.mxu0 %v3265_v51  ;;  %4340 = vmatprep.subr.bf16.mxu1 %v4505_v24  ;;  %v4598_v8 = vld [vmem:[%s4708_s13 + $0x50] sm:$0xff] }
 0x2d2   : > { %v2914_v43 = vsel %vm2912_vm11, %v6375_v38, %v2913_v13  ;;  %v2917_v20 = vsel %vm2915_vm6, %v2916_v29, %v6422_v17  ;;  %v3113_v34 = vsel %vm6414_vm15, 0, %v3111_v31  ;;  %v3124_v6 = vxor.u32 2147483648, %v6516_v47  ;;  %4312 = vmatprep.subr.bf16.mxu0 %v4499_v35  ;;  %4341 = vmatpush3.bf16.msra.mxu1 %v4505_v24  ;;  %v4597_v13 = vld [vmem:[%s4708_s13 + $0x48] sm:$0xff]  ;;  %v4512_v24 = vld [vmem:[%s6752_s6 + $0x38] sm:$0xff]  }
 0x2d3   : > { %v2918_v28 = vsel %vm2911_vm7, %v2914_v43, %v2917_v20  ;;  %v3014_v17 = vand.u32 3, %v3013_v42  ;;  %v3117_v56 = vadd.s32 3, %v3113_v34  ;;  %vm3012_vm9 = vweird.f32 %v6147_v45  ;;  %4342 = vmatprep.subr.bf16.mxu1 %v4506_v32  ;;  %v4601_v43 = vld [vmem:[%s4708_s13 + $0x68] sm:$0xff] }
 0x2d4   : > { %v2919_v38 = vsel %vm2908_vm0, nan, %v2918_v28  ;;  %vm3116_vm10 = vweird.f32 %v6098_v41  ;;  %v4508_v41 = vld [vmem:[%s6750_s4 + $0x18] sm:$0xff]   ;;  %v3136_v53 = vpack.c.bf16 %v4589_v61, %v4588_v9  ;;  %vm3246_vm5 = vcmask 752640  }
 0x2d5   : > { %v3134_v15 = vpack.c.bf16 %v2919_v38, %v2815_v10  ;;  %vm3016_vm15 = vcmp.eq.s32.totalorder %v3014_v17, 0  ;;  %vm3019_vm3 = vcmp.eq.s32.totalorder %v3014_v17, 2  ;;  %v3118_v46 = vand.u32 3, %v3117_v56  ;;  %4313 = vmatpush3.bf16.msra.mxu0 %v4499_v35  ;;  %v4599_v10 = vld [vmem:[%s4708_s13 + $0x58] sm:$0xff]  ;;  %v4600_v35 = vld [vmem:[%s4708_s13 + $0x60] sm:$0xff]  ;;  %v4509_v38 = vld [vmem:[%s6750_s4 + $0x10] sm:$0xff]  }
 0x2d6   : > { %vm3015_vm1 = vcmp.lt.s32.totalorder %v3014_v17, 2  ;;  %v3018_v33 = vsel %vm3016_vm15, %v6576_v12, %v3017_v5  ;;  %v3021_v55 = vsel %vm3019_vm3, %v3020_v37, %v6580_v57  ;;  %4314 = vmatprep.subr.bf16.mxu0 %v4500_v50  ;;  %v4507_v12 = vld [vmem:[%s6750_s4 + $0x20] sm:$0xff]   ;;  %4343 = vmatpush3.bf16.msra.mxu1 %v4506_v32  ;;  %vm7007_vm0 = vcmask 64512   ;;  %v4603_v28 = vld [vmem:[%s4708_s13 + $0x78] sm:$0xff]  ;;  %v4510_v17 = vld [vmem:[%s6750_s4 + $0x8] sm:$0xff]  }
 0x2d7   : > { %3164 = vrot.lane.b32.xlu0 %v3134_v15, %s4618_s14  ;;  %v3022_v21 = vsel %vm3015_vm1, %v3018_v33, %v3021_v55  ;;  %vm3120_vm8 = vcmp.eq.s32.totalorder %v3118_v46, 0  ;;  %vm3123_vm12 = vcmp.eq.s32.totalorder %v3118_v46, 2  ;;  %vm3119_vm14 = vcmp.lt.s32.totalorder %v3118_v46, 2  ;;  %4344 = vmatprep.subr.bf16.mxu1 %v4507_v12  ;;  %vm7008_vm2 = vmmov %vm7007_vm0  ;;  %v4511_v56 = vld [vmem:[%s6750_s4] sm:$0xff]   ;;  %v4513_v15 = vld [vmem:[%s6752_s6 + $0x30] sm:$0xff]  }
 0x2d8   : > { %v3023_v36 = vsel %vm3012_vm9, nan, %v3022_v21  ;;  %v3122_v59 = vsel %vm3120_vm8, %v6516_v47, %v3121_v30  ;;  %v3125_v26 = vsel %vm3123_vm12, %v3124_v6, %v6520_v62  ;;  %v4502_v47 = vld [vmem:[%s6748_s2 + $0x8] sm:$0xff]   ;;  %v4503_v62 = vld [vmem:[%s6748_s2] sm:$0xff]   ;;  %v3137_v49 = vpack.c.bf16 %v4591_v23, %v4590_v52  ;;  %vm7009_vm4 = vmmov %vm7007_vm0 }
 0x2d9   : > { %v3126_v16 = vsel %vm3119_vm14, %v3122_v59, %v3125_v26  ;;  %4315 = vmatpush3.bf16.msra.mxu0 %v4500_v50  ;;  %v3138_v0 = vpack.c.bf16 %v4593_v54, %v4592_v18  ;;  %v3139_v25 = vpack.c.bf16 %v4595_v44, %v4594_v40  ;;  %vm7010_vm7 = vmmov %vm7007_vm0  ;;  %v3140_v29 = vpack.c.bf16 %v4597_v13, %v4596_v63  ;;  %v4514_v30 = vld [vmem:[%s6752_s6 + $0x28] sm:$0xff]   ;;  %v4515_v6 = vld [vmem:[%s6752_s6 + $0x20] sm:$0xff]  }
 0x2da   : > { %v3127_v45 = vsel %vm3116_vm10, nan, %v3126_v16  ;;  %4316 = vmatprep.subr.bf16.mxu0 %v4501_v1  ;;  %4345 = vmatpush3.bf16.msra.mxu1 %v4507_v12  ;;  %vm7011_vm11 = vmmov %vm7007_vm0  ;;  %v3141_v60 = vpack.c.bf16 %v4599_v10, %v4598_v8  ;;  %v3142_v20 = vpack.c.bf16 %v4601_v43, %v4600_v35  ;;  %v3143_v37 = vpack.c.bf16 %v4603_v28, %v4602_v11  ;;  %v4516_v50 = vld [vmem:[%s6752_s6 + $0x18] sm:$0xff]   ;;  %v3970_v55 = vld [vmem:[%s6749_s3] ss:$0 sm:$0xff] }
 0x2db   : > { %v3135_v27 = vpack.c.bf16 %v3127_v45, %v3023_v36  ;;  %4346 = vmatprep.subr.bf16.mxu1 %v4508_v41  ;;  %vm7012_vm6 = vmmov %vm7007_vm0  ;;  %vm3802_vm3 = vcmask 130048   ;;  %vm3804_vm9 = vcmask 195584   ;;  %vm3806_vm8 = vcmask 261120  }
 0x2dc   : > { %vm7013_vm13 = vmmov %vm7007_vm0  ;;  %vm3808_vm12 = vcmask 326656   ;;  %vm3810_vm14 = vcmask 392192   ;;  %vm3812_vm10 = vcmask 457728  }
 0x2dd   : > { %3166 = vrot.lane.b32.xlu1 %v3135_v27, %s4618_s14  ;;  %4317 = vmatpush3.bf16.msra.mxu0 %v4501_v1  ;;  %vm7014_vm15 = vmmov %vm7007_vm0 }
 0x2de   : > { %4318 = vmatprep.subr.bf16.mxu0 %v4502_v47  ;;  %4347 = vmatpush3.bf16.msra.mxu1 %v4508_v41  ;;  %vm7015_vm1 = vmmov %vm7007_vm0 }
 0x2df   : > { %4348 = vmatprep.subr.bf16.mxu1 %v4509_v38 }
 0x2e1   : > { %4319 = vmatpush3.bf16.msra.mxu0 %v4502_v47 }
 0x2e2   : > { %4320 = vmatprep.subr.bf16.mxu0 %v4503_v62  ;;  %4349 = vmatpush3.bf16.msra.mxu1 %v4509_v38 }
 0x2e3   : > { %4350 = vmatprep.subr.bf16.mxu1 %v4510_v17 }
 0x2e5   : > { %4321 = vmatpush3.bf16.msra.mxu0 %v4503_v62 }
 0x2e6   : > { %4351 = vmatpush3.bf16.msra.mxu1 %v4510_v17  ;;  %4370 = vmatprep.subr.bf16.mxu0 %v4512_v24  ;;  %v4517_v17 = vld [vmem:[%s6752_s6 + $0x10] sm:$0xff]  }
 0x2e7   : > { %4352 = vmatprep.subr.bf16.mxu1 %v4511_v56 }
 0x2ea   : > { %4353 = vmatpush3.bf16.msra.mxu1 %v4511_v56  ;;  %v4518_v56 = vld [vmem:[%s6752_s6 + $0x8] sm:$0xff]  }
 0x315   : > { %v3153_v57 = vpop.permute.xlu0 %3152 }
 0x316   : > { %v3170_v58 = vsel %vm7007_vm0, %v3136_v53, %v3153_v57  ;;  %vm3816_vm0 = vcmask 588800  }
 0x317   : > { %4322 = vmatprep.mubr.msk.bf16.mxu0 %vm3246_vm5, %v3170_v58 }
 0x319   : > { %v3155_v14 = vpop.permute.xlu0 %3154 }
 0x31a   : > { %v3173_v3 = vsel %vm7008_vm2, %v3137_v49, %v3155_v14  ;;  %vm3818_vm2 = vcmask 654336  }
 0x31b   : > { %4323 = vmatmul.mubr.msk.bf16.vlgmr.msra.gmra.mxu0 %vm3246_vm5, %v3173_v3 }
 0x31c   : > { %4371 = vmatpush3.bf16.msra.mxu0 %v4512_v24  ;;  %v4519_v24 = vld [vmem:[%s6752_s6] sm:$0xff]  }
 0x31d   : > { %4372 = vmatprep.subr.bf16.mxu0 %v4513_v15 }
 0x320   : > { %4373 = vmatpush3.bf16.msra.mxu0 %v4513_v15 }
 0x321   : > { %4374 = vmatprep.subr.bf16.mxu0 %v4514_v30 }
 0x324   : > { %4375 = vmatpush3.bf16.msra.mxu0 %v4514_v30 }
 0x325   : > { %4376 = vmatprep.subr.bf16.mxu0 %v4515_v6 }
 0x328   : > { %4377 = vmatpush3.bf16.msra.mxu0 %v4515_v6  ;;  %v3985_v6 = vld [vmem:[%s6751_s5] ss:$0 sm:$0xff] }
 0x329   : > { %4378 = vmatprep.subr.bf16.mxu0 %v4516_v50 }
 0x32c   : > { %4379 = vmatpush3.bf16.msra.mxu0 %v4516_v50 }
 0x32d   : > { %4380 = vmatprep.subr.bf16.mxu0 %v4517_v17 }
 0x32f   : > { %v3157_v19 = vpop.permute.xlu1 %3156 }
 0x330   : > { %v3176_v7 = vsel %vm7009_vm4, %v3138_v0, %v3157_v19  ;;  %4381 = vmatpush3.bf16.msra.mxu0 %v4517_v17  ;;  %vm3820_vm4 = vcmask 719872  }
 0x331   : > { %4326 = vmatprep.mubr.msk.bf16.mxu0 %vm3246_vm5, %v3176_v7  ;;  %4382 = vmatprep.subr.bf16.mxu0 %v4518_v56 }
 0x333   : > { %v3159_v39 = vpop.permute.xlu1 %3158 }
 0x334   : > { %v3179_v22 = vsel %vm7010_vm7, %v3139_v25, %v3159_v39  ;;  %4383 = vmatpush3.bf16.msra.mxu0 %v4518_v56  ;;  %vm3822_vm7 = vcmask 785408  }
 0x335   : > { %4327 = vmatmul.mubr.msk.bf16.gmra.mxu0 %vm3246_vm5, %v3179_v22  ;;  %4384 = vmatprep.subr.bf16.mxu0 %v4519_v24 }
 0x338   : > { %v3161_v2 = vpop.permute.xlu0 %3160  ;;  %4385 = vmatpush3.bf16.msra.mxu0 %v4519_v24 }
 0x339   : > { %v3182_v48 = vsel %vm7011_vm11, %v3140_v29, %v3161_v2  ;;  %vm3824_vm11 = vcmask 850944  }
 0x33a   : > { %4330 = vmatprep.mubr.msk.bf16.mxu0 %vm3246_vm5, %v3182_v48 }
 0x33f   : > { %v3163_v5 = vpop.permute.xlu1 %3162 }
 0x340   : > { %v3185_v4 = vsel %vm7012_vm6, %v3141_v60, %v3163_v5  ;;  %vm3826_vm6 = vcmask 916480  }
 0x341   : > { %4331 = vmatmul.mubr.msk.bf16.gmra.mxu0 %vm3246_vm5, %v3185_v4 }
 0x349   : > { %v3165_v42 = vpop.permute.xlu0 %3164 }
 0x34a   : > { %v3188_v31 = vsel %vm7013_vm13, %v3142_v20, %v3165_v42  ;;  %vm3828_vm13 = vcmask 982016  }
 0x34b   : > { %4334 = vmatprep.mubr.msk.bf16.mxu0 %vm3246_vm5, %v3188_v31 }
 0x34f   : > { %v3167_v34 = vpop.permute.xlu1 %3166 }
 0x350   : > { %v3191_v51 = vsel %vm7014_vm15, %v3143_v37, %v3167_v34 }
 0x351   : > { %4335 = vmatmul.mubr.msk.bf16.gmra.mxu0 %vm3246_vm5, %v3191_v51  ;;  %vm3814_vm5 = vcmask 523264  }
 0x3db   : > { %v4324_v46 = vpop.f32.mrf.mxu0 }
 0x3dc   : > { %v3310_v59 = vadd.f32 %v4324_v46, %v3970_v55 }
 0x3dd   : > { %v3301_v33 = vpop.f32.mrf.mxu0 }
 0x3de   : > { %v3302_v21 = vadd.f32 %v3970_v55, %v3301_v33  ;;  %v3366_v27 = vmax.f32 %v3310_v59, 0.0 }
 0x3df   : > { %v4325_v32 = vpop.f32.mrf.mxu0 }
 0x3e0   : > { %v3313_v36 = vadd.f32 %v4325_v32, %v3970_v55  ;;  %v3364_v45 = vmax.f32 %v3302_v21, 0.0 }
 0x3e1   : > { %v3304_v26 = vpop.f32.mrf.mxu0 }
 0x3e2   : > { %v3305_v1 = vadd.f32 %v3970_v55, %v3304_v26  ;;  %v3367_v16 = vmax.f32 %v3313_v36, 0.0 }
 0x3e4   : > { %v3365_v12 = vmax.f32 %v3305_v1, 0.0  ;;  %v3381_v41 = vpack.c.bf16 %v3367_v16, %v3366_v27 }
 0x3e6   : > { %v3380_v47 = vpack.c.bf16 %v3365_v12, %v3364_v45 }
 0x3e8   : > { %4354 = vmatprep.mubr.bf16.mxu1 %v3380_v47 }
 0x3e9   : > { %4355 = vmatmul.mubr.bf16.vlgmr.msra.gmra.mxu1 %v3381_v41 }
 0x3f5   : > { %v4328_v62 = vpop.f32.mrf.mxu0 }
 0x3f6   : > { %v3326_v58 = vadd.f32 %v4328_v62, %v3970_v55 }
 0x3f7   : > { %v3317_v9 = vpop.f32.mrf.mxu0 }
 0x3f8   : > { %v3318_v53 = vadd.f32 %v3970_v55, %v3317_v9  ;;  %v3370_v18 = vmax.f32 %v3326_v58, 0.0 }
 0x3f9   : > { %v4329_v61 = vpop.f32.mrf.mxu0 }
 0x3fa   : > { %v3329_v57 = vadd.f32 %v4329_v61, %v3970_v55  ;;  %v3368_v14 = vmax.f32 %v3318_v53, 0.0 }
 0x3fb   : > { %v3320_v52 = vpop.f32.mrf.mxu0 }
 0x3fc   : > { %v3321_v23 = vadd.f32 %v3970_v55, %v3320_v52  ;;  %v3371_v49 = vmax.f32 %v3329_v57, 0.0 }
 0x3fe   : > { %v3369_v3 = vmax.f32 %v3321_v23, 0.0  ;;  %v3383_v0 = vpack.c.bf16 %v3371_v49, %v3370_v18 }
 0x400   : > { %v3382_v54 = vpack.c.bf16 %v3369_v3, %v3368_v14 }
 0x401   : > { %v4332_v19 = vpop.f32.mrf.mxu0 }
 0x402   : > { %4358 = vmatprep.mubr.bf16.mxu1 %v3382_v54  ;;  %v3342_v39 = vadd.f32 %v4332_v19, %v3970_v55 }
 0x403   : > { %v3333_v7 = vpop.f32.mrf.mxu0  ;;  %4359 = vmatmul.mubr.bf16.gmra.mxu1 %v3383_v0 }
 0x404   : > { %v3334_v44 = vadd.f32 %v3970_v55, %v3333_v7  ;;  %v3374_v48 = vmax.f32 %v3342_v39, 0.0 }
 0x405   : > { %v4333_v40 = vpop.f32.mrf.mxu0 }
 0x406   : > { %v3345_v25 = vadd.f32 %v4333_v40, %v3970_v55  ;;  %v3372_v29 = vmax.f32 %v3334_v44, 0.0 }
 0x407   : > { %v3336_v22 = vpop.f32.mrf.mxu0 }
 0x408   : > { %v3337_v63 = vadd.f32 %v3970_v55, %v3336_v22  ;;  %v3375_v13 = vmax.f32 %v3345_v25, 0.0 }
 0x40a   : > { %v3373_v2 = vmax.f32 %v3337_v63, 0.0  ;;  %v3385_v10 = vpack.c.bf16 %v3375_v13, %v3374_v48 }
 0x40c   : > { %v3384_v8 = vpack.c.bf16 %v3373_v2, %v3372_v29 }
 0x40e   : > { %4362 = vmatprep.mubr.bf16.mxu1 %v3384_v8 }
 0x40f   : > { %4363 = vmatmul.mubr.bf16.gmra.mxu1 %v3385_v10 }
 0x411   : > { %v4336_v60 = vpop.f32.mrf.mxu0 }
 0x412   : > { %v3358_v20 = vadd.f32 %v4336_v60, %v3970_v55 }
 0x413   : > { %v3349_v5 = vpop.f32.mrf.mxu0 }
 0x414   : > { %v3350_v35 = vadd.f32 %v3970_v55, %v3349_v5  ;;  %v3378_v34 = vmax.f32 %v3358_v20, 0.0 }
 0x415   : > { %v4337_v4 = vpop.f32.mrf.mxu0 }
 0x416   : > { %v3361_v43 = vadd.f32 %v4337_v4, %v3970_v55  ;;  %v3376_v28 = vmax.f32 %v3350_v35, 0.0 }
 0x417   : > { %v3352_v42 = vpop.f32.mrf.mxu0 }
 0x418   : > { %v3353_v31 = vadd.f32 %v3970_v55, %v3352_v42  ;;  %v3379_v11 = vmax.f32 %v3361_v43, 0.0 }
 0x41a   : > { %v3377_v37 = vmax.f32 %v3353_v31, 0.0  ;;  %v3387_v38 = vpack.c.bf16 %v3379_v11, %v3378_v34 }
 0x41c   : > { %v3386_v51 = vpack.c.bf16 %v3377_v37, %v3376_v28 }
 0x41e   : > { %4366 = vmatprep.mubr.bf16.mxu1 %v3386_v51 }
 0x41f   : > { %4367 = vmatmul.mubr.bf16.gmra.mxu1 %v3387_v38 }
 0x4a9   : > { %v4356_v15 = vpop.f32.mrf.mxu1 }
 0x4aa   : > { %v3502_v55 = vadd.f32 %v4356_v15, %v3985_v6 }
 0x4ab   : > { %v3493_v30 = vpop.f32.mrf.mxu1 }
 0x4ac   : > { %v3494_v46 = vadd.f32 %v3985_v6, %v3493_v30  ;;  %v3558_v1 = vmax.f32 %v3502_v55, 0.0 }
 0x4ad   : > { %v4357_v50 = vpop.f32.mrf.mxu1 }
 0x4ae   : > { %v3505_v33 = vadd.f32 %v4357_v50, %v3985_v6  ;;  %v3556_v59 = vmax.f32 %v3494_v46, 0.0 }
 0x4af   : > { %v3496_v32 = vpop.f32.mrf.mxu1 }
 0x4b0   : > { %v3497_v21 = vadd.f32 %v3985_v6, %v3496_v32  ;;  %v3559_v36 = vmax.f32 %v3505_v33, 0.0 }
 0x4b2   : > { %v3557_v26 = vmax.f32 %v3497_v21, 0.0  ;;  %v3573_v45 = vpack.c.bf16 %v3559_v36, %v3558_v1 }
 0x4b4   : > { %v3572_v16 = vpack.c.bf16 %v3557_v26, %v3556_v59 }
 0x4b6   : > { %4386 = vmatprep.mubr.bf16.mxu0 %v3572_v16 }
 0x4b7   : > { %4387 = vmatmul.mubr.bf16.vlgmr.msra.gmra.mxu0 %v3573_v45 }
 0x4c3   : > { %v4360_v12 = vpop.f32.mrf.mxu1 }
 0x4c4   : > { %v3518_v9 = vadd.f32 %v4360_v12, %v3985_v6 }
 0x4c5   : > { %v3509_v27 = vpop.f32.mrf.mxu1 }
 0x4c6   : > { %v3510_v41 = vadd.f32 %v3985_v6, %v3509_v27  ;;  %v3562_v23 = vmax.f32 %v3518_v9, 0.0 }
 0x4c7   : > { %v4361_v47 = vpop.f32.mrf.mxu1 }
 0x4c8   : > { %v3521_v62 = vadd.f32 %v4361_v47, %v3985_v6  ;;  %v3560_v58 = vmax.f32 %v3510_v41, 0.0 }
 0x4c9   : > { %v3512_v61 = vpop.f32.mrf.mxu1 }
 0x4ca   : > { %v3513_v53 = vadd.f32 %v3985_v6, %v3512_v61  ;;  %v3563_v57 = vmax.f32 %v3521_v62, 0.0 }
 0x4cc   : > { %v3561_v52 = vmax.f32 %v3513_v53, 0.0  ;;  %v3575_v14 = vpack.c.bf16 %v3563_v57, %v3562_v23 }
 0x4ce   : > { %v3574_v49 = vpack.c.bf16 %v3561_v52, %v3560_v58 }
 0x4cf   : > { %v4364_v3 = vpop.f32.mrf.mxu1 }
 0x4d0   : > { %4390 = vmatprep.mubr.bf16.mxu0 %v3574_v49  ;;  %v3534_v7 = vadd.f32 %v4364_v3, %v3985_v6 }
 0x4d1   : > { %v3525_v18 = vpop.f32.mrf.mxu1  ;;  %4391 = vmatmul.mubr.bf16.gmra.mxu0 %v3575_v14 }
 0x4d2   : > { %v3526_v0 = vadd.f32 %v3985_v6, %v3525_v18  ;;  %v3566_v63 = vmax.f32 %v3534_v7, 0.0 }
 0x4d3   : > { %v4365_v54 = vpop.f32.mrf.mxu1 }
 0x4d4   : > { %v3537_v19 = vadd.f32 %v4365_v54, %v3985_v6  ;;  %v3564_v39 = vmax.f32 %v3526_v0, 0.0 }
 0x4d5   : > { %v3528_v40 = vpop.f32.mrf.mxu1 }
 0x4d6   : > { %v3529_v44 = vadd.f32 %v3985_v6, %v3528_v40  ;;  %v3567_v25 = vmax.f32 %v3537_v19, 0.0 }
 0x4d8   : > { %v3565_v22 = vmax.f32 %v3529_v44, 0.0  ;;  %v3577_v29 = vpack.c.bf16 %v3567_v25, %v3566_v63  ;;  %v4002_v44 = vld [vmem:[%s6753_s7] ss:$0 sm:$0xff] }
 0x4da   : > { %v3576_v13 = vpack.c.bf16 %v3565_v22, %v3564_v39 }
 0x4dc   : > { %4394 = vmatprep.mubr.bf16.mxu0 %v3576_v13 }
 0x4dd   : > { %4395 = vmatmul.mubr.bf16.gmra.mxu0 %v3577_v29 }
 0x4df   : > { %v4368_v2 = vpop.f32.mrf.mxu1 }
 0x4e0   : > { %v3550_v5 = vadd.f32 %v4368_v2, %v3985_v6 }
 0x4e1   : > { %v3541_v48 = vpop.f32.mrf.mxu1 }
 0x4e2   : > { %v3542_v10 = vadd.f32 %v3985_v6, %v3541_v48  ;;  %v3570_v31 = vmax.f32 %v3550_v5, 0.0 }
 0x4e3   : > { %v4369_v8 = vpop.f32.mrf.mxu1 }
 0x4e4   : > { %v3553_v60 = vadd.f32 %v4369_v8, %v3985_v6  ;;  %v3568_v20 = vmax.f32 %v3542_v10, 0.0 }
 0x4e5   : > { %v3544_v4 = vpop.f32.mrf.mxu1 }
 0x4e6   : > { %v3545_v35 = vadd.f32 %v3985_v6, %v3544_v4  ;;  %v3571_v43 = vmax.f32 %v3553_v60, 0.0 }
 0x4e8   : > { %v3569_v42 = vmax.f32 %v3545_v35, 0.0  ;;  %v3579_v28 = vpack.c.bf16 %v3571_v43, %v3570_v31 }
 0x4ea   : > { %v3578_v11 = vpack.c.bf16 %v3569_v42, %v3568_v20 }
 0x4ec   : > { %4398 = vmatprep.mubr.bf16.mxu0 %v3578_v11 }
 0x4ed   : > { %4399 = vmatmul.mubr.bf16.gmra.mxu0 %v3579_v28 }
 0x577   : > { %v4388_v37 = vpop.f32.mrf.mxu0 }
 0x578   : > { %3746 = vrot.lane.b32.xlu1 %v4388_v37, %s4619_s25 }
 0x579   : > { %v3678_v34 = vpop.f32.mrf.mxu0 }
 0x57b   : > { %v4389_v51 = vpop.f32.mrf.mxu0 }
 0x57c   : > { %3750 = vrot.lane.b32.xlu0 %v4389_v51, %s4620_s26 }
 0x57d   : > { %v3681_v38 = vpop.f32.mrf.mxu0 }
 0x580   : > { %3742 = vrot.lane.b32.xlu0 %v3681_v38, %s4618_s14  ;;  %s4627_s14 = smov 88  }
 0x591   : > { %v4392_v17 = vpop.f32.mrf.mxu0 }
 0x592   : > { %3762 = vrot.lane.b32.xlu1 %v4392_v17, %s4621_s29 }
 0x593   : > { %v3694_v56 = vpop.f32.mrf.mxu0 }
 0x595   : > { %v4393_v24 = vpop.f32.mrf.mxu0 }
 0x596   : > { %3754 = vrot.lane.b32.xlu1 %v3694_v56, %s4622_s30  ;;  %3766 = vrot.lane.b32.xlu0 %v4393_v24, %s4623_s9 }
 0x597   : > { %v3697_v15 = vpop.f32.mrf.mxu0 }
 0x59a   : > { %3758 = vrot.lane.b32.xlu0 %v3697_v15, %s4624_s10 }
 0x59d   : > { %v4396_v30 = vpop.f32.mrf.mxu0 }
 0x59e   : > { %3778 = vrot.lane.b32.xlu1 %v4396_v30, %s4625_s11 }
 0x59f   : > { %v3710_v6 = vpop.f32.mrf.mxu0 }
 0x5a1   : > { %v4397_v50 = vpop.f32.mrf.mxu0 }
 0x5a2   : > { %3770 = vrot.lane.b32.xlu1 %v3710_v6, %s4626_s12  ;;  %3782 = vrot.lane.b32.xlu0 %v4397_v50, %s4627_s14 }
 0x5a3   : > { %v3713_v46 = vpop.f32.mrf.mxu0 }
 0x5a6   : > { %3774 = vrot.lane.b32.xlu0 %v3713_v46, %s4628_s15 }
 0x5ad   : > { %v4400_v33 = vpop.f32.mrf.mxu0 }
 0x5af   : > { %v3726_v55 = vpop.f32.mrf.mxu0 }
 0x5b0   : > { %3786 = vrot.lane.b32.xlu1 %v3726_v55, %s4629_s16 }
 0x5b1   : > { %v4401_v32 = vpop.f32.mrf.mxu0 }
 0x5b3   : > { %v3729_v21 = vpop.f32.mrf.mxu0 }
 0x5b4   : > { %3794 = vrot.lane.b32.xlu1 %v4400_v33, %s4630_s17  ;;  %3790 = vrot.lane.b32.xlu0 %v3729_v21, %s4631_s18 }
 0x5b8   : > { %3798 = vrot.lane.b32.xlu0 %v4401_v32, %s4632_s19 }
 0x5ea   : > { %v3747_v59 = vpop.permute.xlu1 %3746 }
 0x5ee   : > { %v3751_v36 = vpop.permute.xlu0 %3750 }
 0x5f2   : > { %v3743_v26 = vpop.permute.xlu0 %3742 }
 0x5f3   : > { %v3801_v16 = vsel %vm7015_vm1, %v3678_v34, %v3743_v26 }
 0x5f4   : > { %v3803_v12 = vsel %vm3802_vm3, %v3801_v16, %v3747_v59 }
 0x5f5   : > { %v3805_v47 = vsel %vm3804_vm9, %v3803_v12, %v3751_v36 }
 0x604   : > { %v3763_v1 = vpop.permute.xlu1 %3762 }
 0x608   : > { %v3767_v45 = vpop.permute.xlu0 %3766  ;;  %v3755_v27 = vpop.permute.xlu1 %3754 }
 0x609   : > { %v3807_v62 = vsel %vm3806_vm8, %v3805_v47, %v3755_v27 }
 0x60c   : > { %v3759_v41 = vpop.permute.xlu0 %3758 }
 0x60d   : > { %v3809_v9 = vsel %vm3808_vm12, %v3807_v62, %v3759_v41 }
 0x60e   : > { %v3811_v57 = vsel %vm3810_vm14, %v3809_v9, %v3763_v1 }
 0x60f   : > { %v3813_v58 = vsel %vm3812_vm10, %v3811_v57, %v3767_v45 }
 0x610   : > { %v3779_v61 = vpop.permute.xlu1 %3778 }
 0x614   : > { %v3783_v53 = vpop.permute.xlu0 %3782  ;;  %v3771_v52 = vpop.permute.xlu1 %3770 }
 0x615   : > { %v3815_v49 = vsel %vm3814_vm5, %v3813_v58, %v3771_v52 }
 0x618   : > { %v3775_v23 = vpop.permute.xlu0 %3774 }
 0x619   : > { %v3817_v14 = vsel %vm3816_vm0, %v3815_v49, %v3775_v23 }
 0x61a   : > { %v3819_v3 = vsel %vm3818_vm2, %v3817_v14, %v3779_v61 }
 0x61b   : > { %v3821_v54 = vsel %vm3820_vm4, %v3819_v3, %v3783_v53 }
 0x622   : > { %v3787_v18 = vpop.permute.xlu1 %3786 }
 0x623   : > { %v3823_v0 = vsel %vm3822_vm7, %v3821_v54, %v3787_v18 }
 0x626   : > { %v3791_v19 = vpop.permute.xlu0 %3790  ;;  %v3795_v7 = vpop.permute.xlu1 %3794 }
 0x627   : > { %v3825_v40 = vsel %vm3824_vm11, %v3823_v0, %v3791_v19 }
 0x628   : > { %v3827_v25 = vsel %vm3826_vm6, %v3825_v40, %v3795_v7 }
 0x62a   : > { %v3799_v39 = vpop.permute.xlu0 %3798 }
 0x62b   : > { %v3829_v22 = vsel %vm3828_vm13, %v3827_v25, %v3799_v39 }
 0x62c   : > { %v3837_v63 = vadd.f32 %v4002_v44, %v3829_v22 }
 0x62e   : > { %v4003_v13 = vmul.f32 -1.442695, %v3837_v63 }
 0x630   : > { %4584 = vpow2.f32 %v4003_v13 }
 0x63d   : > { %v4585_v29 = vpop.eup %4584 }
 0x63e   : > { %v3841_v2 = vadd.f32 1.0, %v4585_v29 }
 0x640   : > { %4586 = vrcp.f32 %v3841_v2 }
 0x64d   : > { %v4587_v48 = vpop.eup %4586 }
 0x64e   : > { %3844 = vst [vmem:[%s305_s24] sm:$0xff] %v4587_v48 }
 0x64f PF: > { %s18_s27 = sadd.s32 1, %s4610_s27  }
 0x650   : > { %p15_p5 = scmp.ge.s32.totalorder %s18_s27, 4  }
 0x652   :  { %17 = sbr.rel (!%p15_p5) target bundleno = 1 (0x1), region = 82 }

</bundles_post_ra>
